<compile_context>
chip_gen: v5e
topology: v5e:2x2
jax: 0.10.0
libtpu: 0.0.40
codegen_flags: <defaults>
</compile_context>

<pallas_src>
import functools
import math

import jax
import jax.numpy as jnp
from jax import lax
from jax.experimental import pallas as pl
from jax.experimental.pallas import tpu as pltpu


# ---------------------------------------------------------------------------
# Tiling / spec / compiler-param helpers
# ---------------------------------------------------------------------------
def _row_tile(m, target=512):
    """Largest row tile <= target that divides m (multiple of 8), else m."""
    if m <= target:
        return m
    t = target
    while t >= 8:
        if m % t == 0:
            return t
        t //= 2
    return m


def _col_tile(n, target=512):
    """Largest lane tile <= target that divides n (multiple of 128), else n."""
    if n <= target:
        return n
    t = target
    while t >= 128:
        if n % t == 0:
            return t
        t //= 2
    return n


def _nbytes(shape, dtype):
    n = 1
    for s in shape:
        n *= int(s)
    return n * jnp.dtype(dtype).itemsize


def _compiler_params(dims, block_bytes, scratch_bytes=0):
    """dimension_semantics + explicit scoped-VMEM limit from the actual tile
    footprint (2x for double buffering + headroom), clamped so it is valid on
    v5e/v6e (128 MiB physical) and v7x (64 MiB physical)."""
    limit = int(2 * block_bytes + scratch_bytes + (4 << 20))
    limit = max(min(limit, 64 << 20), 8 << 20)
    return pltpu.CompilerParams(dimension_semantics=dims,
                                vmem_limit_bytes=limit)


def _probe_single_buffering():
    """pl.Buffered(1) on constant-index weight blocks halves their VMEM cost;
    probe once so we degrade gracefully if this jax build rejects it."""
    if not hasattr(pl, "Buffered"):
        return False
    try:
        def k(x_ref, w_ref, o_ref):
            o_ref[...] = x_ref[...] + w_ref[...]

        x = jnp.zeros((8, 128), jnp.float32)
        out = pl.pallas_call(
            k,
            grid=(1,),
            in_specs=[pl.BlockSpec((8, 128), lambda i: (0, 0)),
                      pl.BlockSpec((8, 128), lambda i: (0, 0),
                                   pipeline_mode=pl.Buffered(1))],
            out_specs=pl.BlockSpec((8, 128), lambda i: (0, 0)),
            out_shape=jax.ShapeDtypeStruct((8, 128), jnp.float32),
        )(x, x)
        jax.block_until_ready(out)
        return True
    except Exception:
        return False


_SINGLE_BUFFER_OK = _probe_single_buffering()


def _spec(shape, imap, constant=False):
    """BlockSpec; blocks whose index never changes (weights, LN params) are
    single-buffered so they are not held twice in VMEM."""
    if constant and _SINGLE_BUFFER_OK:
        return pl.BlockSpec(shape, imap, pipeline_mode=pl.Buffered(1))
    return pl.BlockSpec(shape, imap)


def _layer_norm_rows(x, a, b, eps):
    """Per-row LayerNorm in f32 (torch-style unbiased std, eps added to std)."""
    x = x.astype(jnp.float32)
    d = x.shape[-1]
    mean = jnp.mean(x, axis=-1, keepdims=True)
    var = jnp.sum((x - mean) ** 2, axis=-1, keepdims=True) / (d - 1)
    std = jnp.sqrt(var)
    return a * (x - mean) / (std + eps) + b


# ---------------------------------------------------------------------------
# Pallas kernels
# ---------------------------------------------------------------------------
def _ln_dense_kernel(x_ref, a_ref, b_ref, w_ref, bias_ref, o_ref, *, eps):
    """o = LayerNorm(x) @ w + bias   (LN fused as prologue; bf16 MXU, f32 acc)."""
    n = _layer_norm_rows(x_ref[...], a_ref[...], b_ref[...], eps)
    y = jnp.dot(n.astype(jnp.bfloat16), w_ref[...].astype(jnp.bfloat16),
                preferred_element_type=jnp.float32) + bias_ref[...]
    o_ref[...] = y.astype(o_ref.dtype)


def _dense_kernel(x_ref, w_ref, b_ref, o_ref):
    """o = x @ w + b."""
    y = jnp.dot(x_ref[...].astype(jnp.bfloat16), w_ref[...].astype(jnp.bfloat16),
                preferred_element_type=jnp.float32) + b_ref[...]
    o_ref[...] = y.astype(o_ref.dtype)


def _ffn_kernel(x_ref, a_ref, b_ref, w1_ref, b1_ref, w2_ref, b2_ref, o_ref,
                n_scr, acc_scr, *, eps):
    """o = x + (relu(LN(x) @ w1 + b1) @ w2 + b2), d_ff streamed over grid axis 1."""
    k = pl.program_id(1)

    @pl.when(k == 0)
    def _():
        n_scr[...] = _layer_norm_rows(x_ref[...], a_ref[...], b_ref[...],
                                      eps).astype(jnp.bfloat16)
        acc_scr[...] = jnp.zeros_like(acc_scr)

    h = jnp.dot(n_scr[...], w1_ref[...].astype(jnp.bfloat16),
                preferred_element_type=jnp.float32) + b1_ref[...]
    h = jnp.maximum(h, 0.0)
    acc_scr[...] += jnp.dot(h.astype(jnp.bfloat16),
                            w2_ref[...].astype(jnp.bfloat16),
                            preferred_element_type=jnp.float32)

    @pl.when(k == pl.num_programs(1) - 1)
    def _():
        y = acc_scr[...] + b2_ref[...] + x_ref[...].astype(jnp.float32)
        o_ref[...] = y.astype(o_ref.dtype)


def _attn_core(get_q, get_k, get_v, mask_bias, wo_ref, bo_ref, res_ref, o_ref,
               num_heads, dk, scale):
    """All heads in-register; per-head accumulation of the output projection
    (no lane concatenate); fused bias + residual add."""
    tq, d_model = o_ref.shape
    y = jnp.zeros((tq, d_model), jnp.float32)
    for h in range(num_heads):
        qh = get_q(h)                                     # (tq, dk)  bf16
        kh = get_k(h)                                     # (Sk, dk)  bf16
        vh = get_v(h)                                     # (Sk, dk)  bf16
        s = lax.dot_general(qh, kh, (((1,), (1,)), ((), ())),
                            preferred_element_type=jnp.float32) * scale
        s = s + mask_bias                                  # hoisted mask bias
        s = s - jnp.max(s, axis=-1, keepdims=True)
        p = jnp.exp(s)
        p = p * pl.reciprocal(jnp.sum(p, axis=-1, keepdims=True), approx=False)
        ctx = jnp.dot(p.astype(jnp.bfloat16), vh,
                      preferred_element_type=jnp.float32)  # (tq, dk)
        y = y + jnp.dot(ctx.astype(jnp.bfloat16),
                        wo_ref[h * dk:(h + 1) * dk, :].astype(jnp.bfloat16),
                        preferred_element_type=jnp.float32)
    o_ref[...] = (res_ref[...].astype(jnp.float32) + y
                  + bo_ref[...]).astype(o_ref.dtype)


def _self_attn_kernel(qkv_ref, m_ref, wo_ref, bo_ref, res_ref, o_ref,
                      *, num_heads, dk, d_model, scale, tq, causal):
    sk = qkv_ref.shape[0]
    row0 = pl.multiple_of(pl.program_id(1) * tq, tq)
    # mask bias computed once (hoisted out of the head loop)
    mask_bias = jnp.where(m_ref[...] == 0, jnp.float32(-1e9), jnp.float32(0.0))
    if causal:
        rows = row0 + lax.broadcasted_iota(jnp.int32, (tq, sk), 0)
        cols = lax.broadcasted_iota(jnp.int32, (tq, sk), 1)
        mask_bias = mask_bias + jnp.where(rows >= cols, jnp.float32(0.0),
                                          jnp.float32(-1e9))

    def q_h(h):  # query row tile sliced from the resident full block
        return qkv_ref[pl.ds(row0, tq), h * dk:(h + 1) * dk]

    def k_h(h):
        return qkv_ref[:, d_model + h * dk:d_model + (h + 1) * dk]

    def v_h(h):
        return qkv_ref[:, 2 * d_model + h * dk:2 * d_model + (h + 1) * dk]

    _attn_core(q_h, k_h, v_h, mask_bias, wo_ref, bo_ref, res_ref, o_ref,
               num_heads, dk, scale)


def _cross_attn_kernel(q_ref, kv_ref, m_ref, wo_ref, bo_ref, res_ref, o_ref,
                       *, num_heads, dk, d_model, scale):
    mask_bias = jnp.where(m_ref[...] == 0, jnp.float32(-1e9), jnp.float32(0.0))

    def q_h(h):
        return q_ref[:, h * dk:(h + 1) * dk]

    def k_h(h):
        return kv_ref[:, h * dk:(h + 1) * dk]

    def v_h(h):
        return kv_ref[:, d_model + h * dk:d_model + (h + 1) * dk]

    _attn_core(q_h, k_h, v_h, mask_bias, wo_ref, bo_ref, res_ref, o_ref,
               num_heads, dk, scale)


def _layernorm_kernel(x_ref, a_ref, b_ref, o_ref, *, eps):
    o_ref[...] = _layer_norm_rows(x_ref[...], a_ref[...], b_ref[...],
                                  eps).astype(o_ref.dtype)


# ---------------------------------------------------------------------------
# pallas_call wrappers
# ---------------------------------------------------------------------------
def ln_dense(x2d, alpha, beta, w, bias, eps=1e-6, out_dtype=None):
    """(LayerNorm(x) @ w + bias); rows and output columns tiled."""
    M, K = x2d.shape
    N = w.shape[1]
    out_dtype = x2d.dtype if out_dtype is None else out_dtype
    tm = _row_tile(M, 512)
    tn = _col_tile(N, 512)
    w_const = (tn == N)
    block_bytes = (_nbytes((tm, K), x2d.dtype) + 2 * _nbytes((1, K), jnp.float32)
                   + _nbytes((K, tn), w.dtype) + _nbytes((1, tn), jnp.float32)
                   + _nbytes((tm, tn), out_dtype))
    return pl.pallas_call(
        functools.partial(_ln_dense_kernel, eps=eps),
        grid=(M // tm, N // tn),
        in_specs=[
            pl.BlockSpec((tm, K), lambda i, j: (i, 0)),
            _spec((1, K), lambda i, j: (0, 0), constant=True),
            _spec((1, K), lambda i, j: (0, 0), constant=True),
            _spec((K, tn), lambda i, j: (0, j), constant=w_const),
            _spec((1, tn), lambda i, j: (0, j), constant=w_const),
        ],
        out_specs=pl.BlockSpec((tm, tn), lambda i, j: (i, j)),
        out_shape=jax.ShapeDtypeStruct((M, N), out_dtype),
        compiler_params=_compiler_params(("parallel", "parallel"), block_bytes),
    )(x2d, alpha.reshape(1, K), beta.reshape(1, K), w, bias.reshape(1, N))


def dense_layers(x2d, w_stack, b_stack, out_dtype=None):
    """out[l] = x @ w_stack[l] + b_stack[l] for all layers in ONE call.
    Grid order (rows, cols, layer): the activation block stays VMEM-resident
    while the per-layer weights stream past it."""
    L, K, N = w_stack.shape
    M = x2d.shape[0]
    out_dtype = x2d.dtype if out_dtype is None else out_dtype
    tm = _row_tile(M, 512)
    tn = _col_tile(N, 512)
    block_bytes = (_nbytes((tm, K), x2d.dtype) + _nbytes((K, tn), w_stack.dtype)
                   + _nbytes((1, tn), jnp.float32) + _nbytes((tm, tn), out_dtype))
    return pl.pallas_call(
        _dense_kernel,
        grid=(M // tm, N // tn, L),
        in_specs=[
            pl.BlockSpec((tm, K), lambda i, j, l: (i, 0)),
            pl.BlockSpec((None, K, tn), lambda i, j, l: (l, 0, j)),
            pl.BlockSpec((None, 1, tn), lambda i, j, l: (l, 0, j)),
        ],
        out_specs=pl.BlockSpec((None, tm, tn), lambda i, j, l: (l, i, j)),
        out_shape=jax.ShapeDtypeStruct((L, M, N), out_dtype),
        compiler_params=_compiler_params(("parallel", "parallel", "arbitrary"),
                                         block_bytes),
    )(x2d, w_stack, b_stack.reshape(L, 1, N))


def ffn_residual(x2d, alpha, beta, w1, b1, w2, b2, eps=1e-6):
    """x + FFN(LayerNorm(x)); d_ff streamed as an 'arbitrary' reduction axis."""
    M, D = x2d.shape
    F = w1.shape[1]
    tm = _row_tile(M, 512)
    tf = _col_tile(F, 512)
    w_const = (tf == F)
    scratch_bytes = _nbytes((tm, D), jnp.bfloat16) + _nbytes((tm, D), jnp.float32)
    block_bytes = (2 * _nbytes((tm, D), x2d.dtype)
                   + 3 * _nbytes((1, D), jnp.float32)
                   + _nbytes((D, tf), w1.dtype) + _nbytes((1, tf), jnp.float32)
                   + _nbytes((tf, D), w2.dtype))
    return pl.pallas_call(
        functools.partial(_ffn_kernel, eps=eps),
        grid=(M // tm, F // tf),
        in_specs=[
            pl.BlockSpec((tm, D), lambda i, k: (i, 0)),
            _spec((1, D), lambda i, k: (0, 0), constant=True),
            _spec((1, D), lambda i, k: (0, 0), constant=True),
            _spec((D, tf), lambda i, k: (0, k), constant=w_const),
            _spec((1, tf), lambda i, k: (0, k), constant=w_const),
            _spec((tf, D), lambda i, k: (k, 0), constant=w_const),
            _spec((1, D), lambda i, k: (0, 0), constant=True),
        ],
        out_specs=pl.BlockSpec((tm, D), lambda i, k: (i, 0)),
        out_shape=jax.ShapeDtypeStruct((M, D), x2d.dtype),
        scratch_shapes=[pltpu.VMEM((tm, D), jnp.bfloat16),
                        pltpu.VMEM((tm, D), jnp.float32)],
        compiler_params=_compiler_params(("parallel", "arbitrary"), block_bytes,
                                         scratch_bytes),
    )(x2d, alpha.reshape(1, D), beta.reshape(1, D), w1, b1.reshape(1, F),
      w2, b2.reshape(1, D))


def self_attention(qkv3d, mask, wo, bo, residual, num_heads, causal):
    """qkv3d: (B, Sq, 3D) bf16; mask: (B, 1 or Sq, Sq); residual: (B, Sq, D)."""
    B, Sq, threeD = qkv3d.shape
    D = threeD // 3
    dk = D // num_heads
    tq = _row_tile(Sq, 256)
    mask = mask.astype(jnp.int32)  # TODO(synk): int8 masks once lowering is verified
    mq, Sk = mask.shape[1], mask.shape[2]
    if mq == 1:
        m_spec = pl.BlockSpec((None, 1, Sk), lambda b, qi: (b, 0, 0))
        m_blk = (1, Sk)
    else:
        m_spec = pl.BlockSpec((None, tq, Sk), lambda b, qi: (b, qi, 0))
        m_blk = (tq, Sk)
    block_bytes = (_nbytes((Sq, threeD), qkv3d.dtype) + _nbytes(m_blk, jnp.int32)
                   + _nbytes((D, D), wo.dtype) + _nbytes((1, D), bo.dtype)
                   + 2 * _nbytes((tq, D), residual.dtype))
    kernel = functools.partial(_self_attn_kernel, num_heads=num_heads, dk=dk,
                               d_model=D, scale=1.0 / math.sqrt(dk),
                               tq=tq, causal=causal)
    return pl.pallas_call(
        kernel,
        grid=(B, Sq // tq),
        in_specs=[
            # full (Sq, 3D) block per batch: K/V need every row; the Q row tile
            # is sliced in-kernel from this block, whose index is constant
            # across the qi axis (DMA'd once per batch, stays resident).
            pl.BlockSpec((None, Sq, threeD), lambda b, qi: (b, 0, 0)),
            m_spec,
            _spec((D, D), lambda b, qi: (0, 0), constant=True),
            _spec((1, D), lambda b, qi: (0, 0), constant=True),
            pl.BlockSpec((None, tq, D), lambda b, qi: (b, qi, 0)),
        ],
        out_specs=pl.BlockSpec((None, tq, D), lambda b, qi: (b, qi, 0)),
        out_shape=jax.ShapeDtypeStruct((B, Sq, D), residual.dtype),
        compiler_params=_compiler_params(("parallel", "parallel"), block_bytes),
    )(qkv3d, mask, wo, bo.reshape(1, D), residual)


def cross_attention(q3d, kv3d, mask, wo, bo, residual, num_heads):
    """q3d: (B, Sq, D) bf16; kv3d: (B, Sk, 2D) bf16; mask: (B, 1 or Sq, Sk)."""
    B, Sq, D = q3d.shape
    Sk = kv3d.shape[1]
    dk = D // num_heads
    tq = _row_tile(Sq, 256)
    mask = mask.astype(jnp.int32)
    mq = mask.shape[1]
    if mq == 1:
        m_spec = pl.BlockSpec((None, 1, Sk), lambda b, qi: (b, 0, 0))
        m_blk = (1, Sk)
    else:
        m_spec = pl.BlockSpec((None, tq, Sk), lambda b, qi: (b, qi, 0))
        m_blk = (tq, Sk)
    block_bytes = (_nbytes((tq, D), q3d.dtype) + _nbytes((Sk, 2 * D), kv3d.dtype)
                   + _nbytes(m_blk, jnp.int32) + _nbytes((D, D), wo.dtype)
                   + _nbytes((1, D), bo.dtype)
                   + 2 * _nbytes((tq, D), residual.dtype))
    kernel = functools.partial(_cross_attn_kernel, num_heads=num_heads, dk=dk,
                               d_model=D, scale=1.0 / math.sqrt(dk))
    return pl.pallas_call(
        kernel,
        grid=(B, Sq // tq),
        in_specs=[
            pl.BlockSpec((None, tq, D), lambda b, qi: (b, qi, 0)),
            pl.BlockSpec((None, Sk, 2 * D), lambda b, qi: (b, 0, 0)),
            m_spec,
            _spec((D, D), lambda b, qi: (0, 0), constant=True),
            _spec((1, D), lambda b, qi: (0, 0), constant=True),
            pl.BlockSpec((None, tq, D), lambda b, qi: (b, qi, 0)),
        ],
        out_specs=pl.BlockSpec((None, tq, D), lambda b, qi: (b, qi, 0)),
        out_shape=jax.ShapeDtypeStruct((B, Sq, D), residual.dtype),
        compiler_params=_compiler_params(("parallel", "parallel"), block_bytes),
    )(q3d, kv3d, mask, wo, bo.reshape(1, D), residual)


def layer_norm(x2d, alpha, beta, eps=1e-6):
    M, D = x2d.shape
    tm = _row_tile(M, 512)
    block_bytes = 2 * _nbytes((tm, D), x2d.dtype) + 2 * _nbytes((1, D), jnp.float32)
    return pl.pallas_call(
        functools.partial(_layernorm_kernel, eps=eps),
        grid=(M // tm,),
        in_specs=[
            pl.BlockSpec((tm, D), lambda i: (i, 0)),
            _spec((1, D), lambda i: (0, 0), constant=True),
            _spec((1, D), lambda i: (0, 0), constant=True),
        ],
        out_specs=pl.BlockSpec((tm, D), lambda i: (i, 0)),
        out_shape=jax.ShapeDtypeStruct((M, D), x2d.dtype),
        compiler_params=_compiler_params(("parallel",), block_bytes),
    )(x2d, alpha.reshape(1, D), beta.reshape(1, D))


# ---------------------------------------------------------------------------
# Decoder forward (JAX glue is only reshapes / static slicing)
# ---------------------------------------------------------------------------
def decoder_layer(x, kv_mem, src_mask, tgt_mask, p, num_heads, causal_tgt):
    B, S, D = x.shape

    # sublayer 0: x + self_attn(norm(x))   (dropout = identity in eval mode)
    qkv = ln_dense(x.reshape(B * S, D), p["ln0_a"], p["ln0_b"],
                   p["self_wqkv"], p["self_bqkv"], out_dtype=jnp.bfloat16)
    x = self_attention(qkv.reshape(B, S, 3 * D), tgt_mask,
                       p["self_wo"], p["self_bo"], x, num_heads, causal_tgt)

    # sublayer 1: x + src_attn(norm(x), memory)   (memory K/V precomputed)
    q = ln_dense(x.reshape(B * S, D), p["ln1_a"], p["ln1_b"],
                 p["src_wq"], p["src_bq"], out_dtype=jnp.bfloat16)
    x = cross_attention(q.reshape(B, S, D), kv_mem, src_mask,
                        p["src_wo"], p["src_bo"], x, num_heads)

    # sublayer 2: x + ffn(norm(x))
    x = ffn_residual(x.reshape(B * S, D), p["ln2_a"], p["ln2_b"],
                     p["ff_w1"], p["ff_b1"], p["ff_w2"], p["ff_b2"]
                     ).reshape(B, S, D)
    return x


def decoder_forward(params, x, memory, src_mask, tgt_mask, num_heads,
                    causal_tgt=False):
    B, S, D = x.shape
    Sm = memory.shape[1]
    L = len(params["layers"])
    # Cross-attention K/V of the encoder memory for all layers in one call.
    kv_all = dense_layers(memory.reshape(B * Sm, D),
                          params["src_wkv_stack"], params["src_bkv_stack"],
                          out_dtype=jnp.bfloat16).reshape(L, B, Sm, 2 * D)
    for l, lp in enumerate(params["layers"]):
        x = decoder_layer(x, kv_all[l], src_mask, tgt_mask, lp, num_heads,
                          causal_tgt)
    return layer_norm(x.reshape(B * S, D),
                      params["norm_a"], params["norm_b"]).reshape(B, S, D)


# ---------------------------------------------------------------------------
# Deterministic parameter initialization
# ---------------------------------------------------------------------------
def init_params(key, d_model, d_ff, num_layers):
    def linear(k, din, dout):
        return (jax.random.normal(k, (din, dout), jnp.float32) * 0.02,
                jnp.zeros((dout,), jnp.float32))

    keys = jax.random.split(key, num_layers)
    layers, wkv_stack, bkv_stack = [], [], []
    for l in range(num_layers):
        kl = jax.random.split(keys[l], 10)
        s_wq, s_bq = linear(kl[0], d_model, d_model)
        s_wk, s_bk = linear(kl[1], d_model, d_model)
        s_wv, s_bv = linear(kl[2], d_model, d_model)
        s_wo, s_bo = linear(kl[3], d_model, d_model)
        c_wq, c_bq = linear(kl[4], d_model, d_model)
        c_wk, c_bk = linear(kl[5], d_model, d_model)
        c_wv, c_bv = linear(kl[6], d_model, d_model)
        c_wo, c_bo = linear(kl[7], d_model, d_model)
        ff_w1, ff_b1 = linear(kl[8], d_model, d_ff)
        ff_w2, ff_b2 = linear(kl[9], d_ff, d_model)
        wkv_stack.append(jnp.concatenate([c_wk, c_wv], axis=1))
        bkv_stack.append(jnp.concatenate([c_bk, c_bv], axis=0))
        layers.append(dict(
            self_wqkv=jnp.concatenate([s_wq, s_wk, s_wv], axis=1),
            self_bqkv=jnp.concatenate([s_bq, s_bk, s_bv], axis=0),
            self_wo=s_wo, self_bo=s_bo,
            src_wq=c_wq, src_bq=c_bq,
            src_wo=c_wo, src_bo=c_bo,
            ff_w1=ff_w1, ff_b1=ff_b1, ff_w2=ff_w2, ff_b2=ff_b2,
            ln0_a=jnp.ones((d_model,), jnp.float32),
            ln0_b=jnp.zeros((d_model,), jnp.float32),
            ln1_a=jnp.ones((d_model,), jnp.float32),
            ln1_b=jnp.zeros((d_model,), jnp.float32),
            ln2_a=jnp.ones((d_model,), jnp.float32),
            ln2_b=jnp.zeros((d_model,), jnp.float32),
        ))
    return dict(layers=layers,
                src_wkv_stack=jnp.stack(wkv_stack),   # (L, D, 2D)
                src_bkv_stack=jnp.stack(bkv_stack),   # (L, 2D)
                norm_a=jnp.ones((d_model,), jnp.float32),
                norm_b=jnp.zeros((d_model,), jnp.float32))


# ---------------------------------------------------------------------------
if __name__ == "__main__":
    # D_MODEL a multiple of 128 keeps every output BlockSpec lane-dense.
    B, S_TGT, S_SRC = 2, 8, 16
    D_MODEL, N_HEADS, D_FF, N_LAYERS = 128, 4, 512, 2

    key = jax.random.PRNGKey(0)
    kp, kx, km = jax.random.split(key, 3)

    params = init_params(kp, D_MODEL, D_FF, N_LAYERS)
    x = jax.random.normal(kx, (B, S_TGT, D_MODEL), jnp.float32)
    memory = jax.random.normal(km, (B, S_SRC, D_MODEL), jnp.float32)
    src_mask = jnp.ones((B, 1, S_SRC), jnp.int32)

    # Fast path: (B,1,S) padding mask + causal triangle generated in-kernel.
    tgt_pad_mask = jnp.ones((B, 1, S_TGT), jnp.int32)
    fwd_causal = jax.jit(functools.partial(decoder_forward, num_heads=N_HEADS,
                                           causal_tgt=True))
    out = fwd_causal(params, x, memory, src_mask, tgt_pad_mask)
    jax.block_until_ready(out)
    assert out.shape == (B, S_TGT, D_MODEL) and out.dtype == jnp.float32
    assert bool(jnp.all(jnp.isfinite(out)))

    # General path: explicit (B,S,S) tgt mask (reference semantics); must match.
    tgt_full_mask = jnp.broadcast_to(
        jnp.tril(jnp.ones((S_TGT, S_TGT), jnp.int32))[None], (B, S_TGT, S_TGT))
    fwd_masked = jax.jit(functools.partial(decoder_forward, num_heads=N_HEADS,
                                           causal_tgt=False))
    out_ref = fwd_masked(params, x, memory, src_mask, tgt_full_mask)
    jax.block_until_ready(out_ref)
    assert float(jnp.max(jnp.abs(out - out_ref))) < 1e-4

    print("KERNEL_OK")
</pallas_src>

<mosaic_0001>
module attributes {stable_mosaic.version = 11 : i64} {
  func.func @k(%arg0: i32, %arg1: memref<8x128xf32, #tpu.memory_space<vmem>>, %arg2: memref<8x128xf32, #tpu.memory_space<vmem>>, %arg3: memref<8x128xf32, #tpu.memory_space<vmem>>) attributes {dimension_semantics = [#tpu.dimension_semantics<arbitrary>], iteration_bounds = array<i64: 1>, scalar_prefetch = 0 : i64, scratch_operands = 0 : i64, tpu.core_type = #tpu.core_type<tc>, window_params = [{pipeline_mode = #tpu.pipeline_mode<synchronous>, transform_indices = @transform_0, window_bounds = array<i64: 8, 128>}, {pipeline_mode = #tpu.pipeline_mode<synchronous>, transform_indices = @transform_1, window_bounds = array<i64: 8, 128>}, {pipeline_mode = #tpu.pipeline_mode<synchronous>, transform_indices = @transform_2, window_bounds = array<i64: 8, 128>}]} {
    %c0 = arith.constant 0 : index
    %c0_0 = arith.constant 0 : index
    %0 = vector.load %arg1[%c0, %c0_0] : memref<8x128xf32, #tpu.memory_space<vmem>>, vector<8x128xf32>
    %c0_1 = arith.constant 0 : index
    %c0_2 = arith.constant 0 : index
    %1 = vector.load %arg2[%c0_1, %c0_2] : memref<8x128xf32, #tpu.memory_space<vmem>>, vector<8x128xf32>
    %2 = arith.addf %0, %1 : vector<8x128xf32>
    %c0_3 = arith.constant 0 : index
    %c0_4 = arith.constant 0 : index
    %3 = vector.load %arg3[%c0_3, %c0_4] : memref<8x128xf32, #tpu.memory_space<vmem>>, vector<8x128xf32>
    tpu.vector_store %arg3[%c0_3, %c0_4], %2 {strides = array<i32>} : memref<8x128xf32, #tpu.memory_space<vmem>>, vector<8x128xf32>,
    return
  }
  func.func @transform_0(%arg0: i32) -> (i32, i32) {
    %c0_i32 = arith.constant 0 : i32
    %c0_i32_0 = arith.constant 0 : i32
    %c0_i32_1 = arith.constant 0 : i32
    return %c0_i32, %c0_i32_0 : i32, i32
  }
  func.func @transform_1(%arg0: i32) -> (i32, i32) {
    %c0_i32 = arith.constant 0 : i32
    %c0_i32_0 = arith.constant 0 : i32
    %c0_i32_1 = arith.constant 0 : i32
    return %c0_i32, %c0_i32_0 : i32, i32
  }
  func.func @transform_2(%arg0: i32) -> (i32, i32) {
    %c0_i32 = arith.constant 0 : i32
    %c0_i32_0 = arith.constant 0 : i32
    %c0_i32_1 = arith.constant 0 : i32
    return %c0_i32, %c0_i32_0 : i32, i32
  }
}

module attributes {stable_mosaic.version = 11 : i64} {
  func.func @_ln_dense_kernel(%arg0: i32, %arg1: i32, %arg2: memref<16x128xf32, #tpu.memory_space<vmem>>, %arg3: memref<1x128xf32, #tpu.memory_space<vmem>>, %arg4: memref<1x128xf32, #tpu.memory_space<vmem>>, %arg5: memref<128x384xf32, #tpu.memory_space<vmem>>, %arg6: memref<1x384xf32, #tpu.memory_space<vmem>>, %arg7: memref<16x384xbf16, #tpu.memory_space<vmem>>) attributes {dimension_semantics = [#tpu.dimension_semantics<parallel>, #tpu.dimension_semantics<parallel>], iteration_bounds = array<i64: 1, 1>, scalar_prefetch = 0 : i64, scratch_operands = 0 : i64, tpu.core_type = #tpu.core_type<tc>, window_params = [{transform_indices = @transform_0, window_bounds = array<i64: 16, 128>}, {pipeline_mode = #tpu.pipeline_mode<synchronous>, transform_indices = @transform_1, window_bounds = array<i64: 1, 128>}, {pipeline_mode = #tpu.pipeline_mode<synchronous>, transform_indices = @transform_2, window_bounds = array<i64: 1, 128>}, {transform_indices = @transform_3, window_bounds = array<i64: 128, 384>}, {transform_indices = @transform_4, window_bounds = array<i64: 1, 384>}, {transform_indices = @transform_5, window_bounds = array<i64: 16, 384>}]} {
    %c0 = arith.constant 0 : index
    %c0_0 = arith.constant 0 : index
    %0 = vector.load %arg2[%c0, %c0_0] : memref<16x128xf32, #tpu.memory_space<vmem>>, vector<16x128xf32>
    %c0_1 = arith.constant 0 : index
    %c0_2 = arith.constant 0 : index
    %1 = vector.load %arg3[%c0_1, %c0_2] : memref<1x128xf32, #tpu.memory_space<vmem>>, vector<1x128xf32>
    %c0_3 = arith.constant 0 : index
    %c0_4 = arith.constant 0 : index
    %2 = vector.load %arg4[%c0_3, %c0_4] : memref<1x128xf32, #tpu.memory_space<vmem>>, vector<1x128xf32>
    %cst = arith.constant dense<0.000000e+00> : vector<16xf32>
    %3 = vector.multi_reduction <add>, %0, %cst [1] : vector<16x128xf32> to vector<16xf32>
    %4 = vector.shape_cast %3 : vector<16xf32> to vector<16x1xf32>
    %cst_5 = arith.constant 1.280000e+02 : f32
    %5 = vector.broadcast %cst_5 : f32 to vector<16x1xf32>
    %6 = arith.divf %4, %5 : vector<16x1xf32>
    %7 = vector.broadcast %6 : vector<16x1xf32> to vector<16x128xf32>
    %8 = arith.subf %0, %7 : vector<16x128xf32>
    %9 = arith.mulf %8, %8 : vector<16x128xf32>
    %cst_6 = arith.constant dense<0.000000e+00> : vector<16xf32>
    %10 = vector.multi_reduction <add>, %9, %cst_6 [1] : vector<16x128xf32> to vector<16xf32>
    %11 = vector.shape_cast %10 : vector<16xf32> to vector<16x1xf32>
    %cst_7 = arith.constant 1.270000e+02 : f32
    %12 = vector.broadcast %cst_7 : f32 to vector<16x1xf32>
    %13 = arith.divf %11, %12 : vector<16x1xf32>
    %14 = math.sqrt %13 : vector<16x1xf32>
    %15 = vector.broadcast %6 : vector<16x1xf32> to vector<16x128xf32>
    %16 = arith.subf %0, %15 : vector<16x128xf32>
    %17 = vector.broadcast %1 : vector<1x128xf32> to vector<16x128xf32>
    %18 = arith.mulf %17, %16 : vector<16x128xf32>
    %cst_8 = arith.constant 9.99999997E-7 : f32
    %19 = vector.broadcast %cst_8 : f32 to vector<16x1xf32>
    %20 = arith.addf %14, %19 : vector<16x1xf32>
    %21 = vector.broadcast %20 : vector<16x1xf32> to vector<16x128xf32>
    %22 = arith.divf %18, %21 : vector<16x128xf32>
    %23 = vector.broadcast %2 : vector<1x128xf32> to vector<16x128xf32>
    %24 = arith.addf %22, %23 : vector<16x128xf32>
    %25 = arith.truncf %24 : vector<16x128xf32> to vector<16x128xbf16>
    %c0_9 = arith.constant 0 : index
    %c0_10 = arith.constant 0 : index
    %26 = vector.load %arg5[%c0_9, %c0_10] : memref<128x384xf32, #tpu.memory_space<vmem>>, vector<128x384xf32>
    %27 = arith.truncf %26 : vector<128x384xf32> to vector<128x384xbf16>
    %cst_11 = arith.constant dense<0.000000e+00> : vector<16x384xf32>
    %28 = tpu.matmul %25, %27, %cst_11 {dimension_numbers = #tpu.dot_dimension_numbers<[1], [0], [0], [1], [0, 0, 1, 1], [], []>} : vector<16x128xbf16>, vector<128x384xbf16>, vector<16x384xf32> -> vector<16x384xf32>
    %c0_12 = arith.constant 0 : index
    %c0_13 = arith.constant 0 : index
    %29 = vector.load %arg6[%c0_12, %c0_13] : memref<1x384xf32, #tpu.memory_space<vmem>>, vector<1x384xf32>
    %30 = vector.broadcast %29 : vector<1x384xf32> to vector<16x384xf32>
    %31 = arith.addf %28, %30 : vector<16x384xf32>
    %32 = arith.truncf %31 : vector<16x384xf32> to vector<16x384xbf16>
    %c0_14 = arith.constant 0 : index
    %c0_15 = arith.constant 0 : index
    %33 = vector.load %arg7[%c0_14, %c0_15] : memref<16x384xbf16, #tpu.memory_space<vmem>>, vector<16x384xbf16>
    tpu.vector_store %arg7[%c0_14, %c0_15], %32 {strides = array<i32>} : memref<16x384xbf16, #tpu.memory_space<vmem>>, vector<16x384xbf16>,
    return
  }
  func.func @transform_0(%arg0: i32, %arg1: i32) -> (i32, i32) {
    %c0_i32 = arith.constant 0 : i32
    %c0_i32_0 = arith.constant 0 : i32
    return %arg0, %c0_i32 : i32, i32
  }
  func.func @transform_1(%arg0: i32, %arg1: i32) -> (i32, i32) {
    %c0_i32 = arith.constant 0 : i32
    %c0_i32_0 = arith.constant 0 : i32
    %c0_i32_1 = arith.constant 0 : i32
    return %c0_i32, %c0_i32_0 : i32, i32
  }
  func.func @transform_2(%arg0: i32, %arg1: i32) -> (i32, i32) {
    %c0_i32 = arith.constant 0 : i32
    %c0_i32_0 = arith.constant 0 : i32
    %c0_i32_1 = arith.constant 0 : i32
    return %c0_i32, %c0_i32_0 : i32, i32
  }
  func.func @transform_3(%arg0: i32, %arg1: i32) -> (i32, i32) {
    %c0_i32 = arith.constant 0 : i32
    %c0_i32_0 = arith.constant 0 : i32
    return %c0_i32, %arg1 : i32, i32
  }
  func.func @transform_4(%arg0: i32, %arg1: i32) -> (i32, i32) {
    %c0_i32 = arith.constant 0 : i32
    %c0_i32_0 = arith.constant 0 : i32
    return %c0_i32, %arg1 : i32, i32
  }
  func.func @transform_5(%arg0: i32, %arg1: i32) -> (i32, i32) {
    %c0_i32 = arith.constant 0 : i32
    return %arg0, %arg1 : i32, i32
  }
}

module attributes {stable_mosaic.version = 11 : i64} {
  func.func @_dense_kernel(%arg0: i32, %arg1: i32, %arg2: i32, %arg3: memref<32x128xf32, #tpu.memory_space<vmem>>, %arg4: memref<1x128x256xf32, #tpu.memory_space<vmem>>, %arg5: memref<1x1x256xf32, #tpu.memory_space<vmem>>, %arg6: memref<1x32x256xbf16, #tpu.memory_space<vmem>>) attributes {dimension_semantics = [#tpu.dimension_semantics<parallel>, #tpu.dimension_semantics<parallel>, #tpu.dimension_semantics<arbitrary>], iteration_bounds = array<i64: 1, 1, 2>, scalar_prefetch = 0 : i64, scratch_operands = 0 : i64, tpu.core_type = #tpu.core_type<tc>, window_params = [{transform_indices = @transform_0, window_bounds = array<i64: 32, 128>}, {transform_indices = @transform_1, window_bounds = array<i64: 1, 128, 256>}, {transform_indices = @transform_2, window_bounds = array<i64: 1, 1, 256>}, {transform_indices = @transform_3, window_bounds = array<i64: 1, 32, 256>}]} {
    %c0 = arith.constant 0 : index
    %c0_0 = arith.constant 0 : index
    %0 = vector.load %arg3[%c0, %c0_0] : memref<32x128xf32, #tpu.memory_space<vmem>>, vector<32x128xf32>
    %1 = arith.truncf %0 : vector<32x128xf32> to vector<32x128xbf16>
    %c0_1 = arith.constant 0 : index
    %c0_2 = arith.constant 0 : index
    %c0_3 = arith.constant 0 : index
    %2 = vector.load %arg4[%c0_1, %c0_2, %c0_3] : memref<1x128x256xf32, #tpu.memory_space<vmem>>, vector<1x128x256xf32>
    %3 = vector.shape_cast %2 : vector<1x128x256xf32> to vector<128x256xf32>
    %4 = arith.truncf %3 : vector<128x256xf32> to vector<128x256xbf16>
    %cst = arith.constant dense<0.000000e+00> : vector<32x256xf32>
    %5 = tpu.matmul %1, %4, %cst {dimension_numbers = #tpu.dot_dimension_numbers<[1], [0], [0], [1], [0, 0, 1, 1], [], []>} : vector<32x128xbf16>, vector<128x256xbf16>, vector<32x256xf32> -> vector<32x256xf32>
    %c0_4 = arith.constant 0 : index
    %c0_5 = arith.constant 0 : index
    %c0_6 = arith.constant 0 : index
    %6 = vector.load %arg5[%c0_4, %c0_5, %c0_6] : memref<1x1x256xf32, #tpu.memory_space<vmem>>, vector<1x1x256xf32>
    %7 = vector.shape_cast %6 : vector<1x1x256xf32> to vector<1x256xf32>
    %8 = vector.broadcast %7 : vector<1x256xf32> to vector<32x256xf32>
    %9 = arith.addf %5, %8 : vector<32x256xf32>
    %10 = arith.truncf %9 : vector<32x256xf32> to vector<32x256xbf16>
    %c0_7 = arith.constant 0 : index
    %c0_8 = arith.constant 0 : index
    %c0_9 = arith.constant 0 : index
    %11 = vector.load %arg6[%c0_7, %c0_8, %c0_9] : memref<1x32x256xbf16, #tpu.memory_space<vmem>>, vector<1x32x256xbf16>
    %12 = vector.shape_cast %11 : vector<1x32x256xbf16> to vector<32x256xbf16>
    %13 = vector.shape_cast %10 : vector<32x256xbf16> to vector<1x32x256xbf16>
    tpu.vector_store %arg6[%c0_7, %c0_8, %c0_9], %13 {strides = array<i32>} : memref<1x32x256xbf16, #tpu.memory_space<vmem>>, vector<1x32x256xbf16>,
    return
  }
  func.func @transform_0(%arg0: i32, %arg1: i32, %arg2: i32) -> (i32, i32) {
    %c0_i32 = arith.constant 0 : i32
    %c0_i32_0 = arith.constant 0 : i32
    return %arg0, %c0_i32 : i32, i32
  }
  func.func @transform_1(%arg0: i32, %arg1: i32, %arg2: i32) -> (i32, i32, i32) {
    %c0_i32 = arith.constant 0 : i32
    %c0_i32_0 = arith.constant 0 : i32
    return %arg2, %c0_i32, %arg1 : i32, i32, i32
  }
  func.func @transform_2(%arg0: i32, %arg1: i32, %arg2: i32) -> (i32, i32, i32) {
    %c0_i32 = arith.constant 0 : i32
    %c0_i32_0 = arith.constant 0 : i32
    return %arg2, %c0_i32, %arg1 : i32, i32, i32
  }
  func.func @transform_3(%arg0: i32, %arg1: i32, %arg2: i32) -> (i32, i32, i32) {
    %c0_i32 = arith.constant 0 : i32
    return %arg2, %arg0, %arg1 : i32, i32, i32
  }
}

module attributes {stable_mosaic.version = 11 : i64} {
  func.func @_ln_dense_kernel(%arg0: i32, %arg1: i32, %arg2: memref<16x128xf32, #tpu.memory_space<vmem>>, %arg3: memref<1x128xf32, #tpu.memory_space<vmem>>, %arg4: memref<1x128xf32, #tpu.memory_space<vmem>>, %arg5: memref<128x128xf32, #tpu.memory_space<vmem>>, %arg6: memref<1x128xf32, #tpu.memory_space<vmem>>, %arg7: memref<16x128xbf16, #tpu.memory_space<vmem>>) attributes {dimension_semantics = [#tpu.dimension_semantics<parallel>, #tpu.dimension_semantics<parallel>], iteration_bounds = array<i64: 1, 1>, scalar_prefetch = 0 : i64, scratch_operands = 0 : i64, tpu.core_type = #tpu.core_type<tc>, window_params = [{transform_indices = @transform_0, window_bounds = array<i64: 16, 128>}, {pipeline_mode = #tpu.pipeline_mode<synchronous>, transform_indices = @transform_1, window_bounds = array<i64: 1, 128>}, {pipeline_mode = #tpu.pipeline_mode<synchronous>, transform_indices = @transform_2, window_bounds = array<i64: 1, 128>}, {transform_indices = @transform_3, window_bounds = array<i64: 128, 128>}, {transform_indices = @transform_4, window_bounds = array<i64: 1, 128>}, {transform_indices = @transform_5, window_bounds = array<i64: 16, 128>}]} {
    %c0 = arith.constant 0 : index
    %c0_0 = arith.constant 0 : index
    %0 = vector.load %arg2[%c0, %c0_0] : memref<16x128xf32, #tpu.memory_space<vmem>>, vector<16x128xf32>
    %c0_1 = arith.constant 0 : index
    %c0_2 = arith.constant 0 : index
    %1 = vector.load %arg3[%c0_1, %c0_2] : memref<1x128xf32, #tpu.memory_space<vmem>>, vector<1x128xf32>
    %c0_3 = arith.constant 0 : index
    %c0_4 = arith.constant 0 : index
    %2 = vector.load %arg4[%c0_3, %c0_4] : memref<1x128xf32, #tpu.memory_space<vmem>>, vector<1x128xf32>
    %cst = arith.constant dense<0.000000e+00> : vector<16xf32>
    %3 = vector.multi_reduction <add>, %0, %cst [1] : vector<16x128xf32> to vector<16xf32>
    %4 = vector.shape_cast %3 : vector<16xf32> to vector<16x1xf32>
    %cst_5 = arith.constant 1.280000e+02 : f32
    %5 = vector.broadcast %cst_5 : f32 to vector<16x1xf32>
    %6 = arith.divf %4, %5 : vector<16x1xf32>
    %7 = vector.broadcast %6 : vector<16x1xf32> to vector<16x128xf32>
    %8 = arith.subf %0, %7 : vector<16x128xf32>
    %9 = arith.mulf %8, %8 : vector<16x128xf32>
    %cst_6 = arith.constant dense<0.000000e+00> : vector<16xf32>
    %10 = vector.multi_reduction <add>, %9, %cst_6 [1] : vector<16x128xf32> to vector<16xf32>
    %11 = vector.shape_cast %10 : vector<16xf32> to vector<16x1xf32>
    %cst_7 = arith.constant 1.270000e+02 : f32
    %12 = vector.broadcast %cst_7 : f32 to vector<16x1xf32>
    %13 = arith.divf %11, %12 : vector<16x1xf32>
    %14 = math.sqrt %13 : vector<16x1xf32>
    %15 = vector.broadcast %6 : vector<16x1xf32> to vector<16x128xf32>
    %16 = arith.subf %0, %15 : vector<16x128xf32>
    %17 = vector.broadcast %1 : vector<1x128xf32> to vector<16x128xf32>
    %18 = arith.mulf %17, %16 : vector<16x128xf32>
    %cst_8 = arith.constant 9.99999997E-7 : f32
    %19 = vector.broadcast %cst_8 : f32 to vector<16x1xf32>
    %20 = arith.addf %14, %19 : vector<16x1xf32>
    %21 = vector.broadcast %20 : vector<16x1xf32> to vector<16x128xf32>
    %22 = arith.divf %18, %21 : vector<16x128xf32>
    %23 = vector.broadcast %2 : vector<1x128xf32> to vector<16x128xf32>
    %24 = arith.addf %22, %23 : vector<16x128xf32>
    %25 = arith.truncf %24 : vector<16x128xf32> to vector<16x128xbf16>
    %c0_9 = arith.constant 0 : index
    %c0_10 = arith.constant 0 : index
    %26 = vector.load %arg5[%c0_9, %c0_10] : memref<128x128xf32, #tpu.memory_space<vmem>>, vector<128x128xf32>
    %27 = arith.truncf %26 : vector<128x128xf32> to vector<128x128xbf16>
    %cst_11 = arith.constant dense<0.000000e+00> : vector<16x128xf32>
    %28 = tpu.matmul %25, %27, %cst_11 {dimension_numbers = #tpu.dot_dimension_numbers<[1], [0], [0], [1], [0, 0, 1, 1], [], []>} : vector<16x128xbf16>, vector<128x128xbf16>, vector<16x128xf32> -> vector<16x128xf32>
    %c0_12 = arith.constant 0 : index
    %c0_13 = arith.constant 0 : index
    %29 = vector.load %arg6[%c0_12, %c0_13] : memref<1x128xf32, #tpu.memory_space<vmem>>, vector<1x128xf32>
    %30 = vector.broadcast %29 : vector<1x128xf32> to vector<16x128xf32>
    %31 = arith.addf %28, %30 : vector<16x128xf32>
    %32 = arith.truncf %31 : vector<16x128xf32> to vector<16x128xbf16>
    %c0_14 = arith.constant 0 : index
    %c0_15 = arith.constant 0 : index
    %33 = vector.load %arg7[%c0_14, %c0_15] : memref<16x128xbf16, #tpu.memory_space<vmem>>, vector<16x128xbf16>
    tpu.vector_store %arg7[%c0_14, %c0_15], %32 {strides = array<i32>} : memref<16x128xbf16, #tpu.memory_space<vmem>>, vector<16x128xbf16>,
    return
  }
  func.func @transform_0(%arg0: i32, %arg1: i32) -> (i32, i32) {
    %c0_i32 = arith.constant 0 : i32
    %c0_i32_0 = arith.constant 0 : i32
    return %arg0, %c0_i32 : i32, i32
  }
  func.func @transform_1(%arg0: i32, %arg1: i32) -> (i32, i32) {
    %c0_i32 = arith.constant 0 : i32
    %c0_i32_0 = arith.constant 0 : i32
    %c0_i32_1 = arith.constant 0 : i32
    return %c0_i32, %c0_i32_0 : i32, i32
  }
  func.func @transform_2(%arg0: i32, %arg1: i32) -> (i32, i32) {
    %c0_i32 = arith.constant 0 : i32
    %c0_i32_0 = arith.constant 0 : i32
    %c0_i32_1 = arith.constant 0 : i32
    return %c0_i32, %c0_i32_0 : i32, i32
  }
  func.func @transform_3(%arg0: i32, %arg1: i32) -> (i32, i32) {
    %c0_i32 = arith.constant 0 : i32
    %c0_i32_0 = arith.constant 0 : i32
    return %c0_i32, %arg1 : i32, i32
  }
  func.func @transform_4(%arg0: i32, %arg1: i32) -> (i32, i32) {
    %c0_i32 = arith.constant 0 : i32
    %c0_i32_0 = arith.constant 0 : i32
    return %c0_i32, %arg1 : i32, i32
  }
  func.func @transform_5(%arg0: i32, %arg1: i32) -> (i32, i32) {
    %c0_i32 = arith.constant 0 : i32
    return %arg0, %arg1 : i32, i32
  }
}

module attributes {stable_mosaic.version = 11 : i64} {
  func.func @_self_attn_kernel(%arg0: i32, %arg1: i32, %arg2: memref<1x8x384xbf16, #tpu.memory_space<vmem>>, %arg3: memref<1x1x8xi32, #tpu.memory_space<vmem>>, %arg4: memref<128x128xf32, #tpu.memory_space<vmem>>, %arg5: memref<1x128xf32, #tpu.memory_space<vmem>>, %arg6: memref<1x8x128xf32, #tpu.memory_space<vmem>>, %arg7: memref<1x8x128xf32, #tpu.memory_space<vmem>>) attributes {dimension_semantics = [#tpu.dimension_semantics<parallel>, #tpu.dimension_semantics<parallel>], iteration_bounds = array<i64: 2, 1>, scalar_prefetch = 0 : i64, scratch_operands = 0 : i64, tpu.core_type = #tpu.core_type<tc>, window_params = [{transform_indices = @transform_0, window_bounds = array<i64: 1, 8, 384>}, {transform_indices = @transform_1, window_bounds = array<i64: 1, 1, 8>}, {pipeline_mode = #tpu.pipeline_mode<synchronous>, transform_indices = @transform_2, window_bounds = array<i64: 128, 128>}, {pipeline_mode = #tpu.pipeline_mode<synchronous>, transform_indices = @transform_3, window_bounds = array<i64: 1, 128>}, {transform_indices = @transform_4, window_bounds = array<i64: 1, 8, 128>}, {transform_indices = @transform_5, window_bounds = array<i64: 1, 8, 128>}]} {
    %c8_i32 = arith.constant 8 : i32
    %0 = arith.muli %arg1, %c8_i32 : i32
    %1 = tpu.assume_multiple %0, 8 : i32
    %c0 = arith.constant 0 : index
    %c0_0 = arith.constant 0 : index
    %c0_1 = arith.constant 0 : index
    %2 = vector.load %arg3[%c0, %c0_0, %c0_1] : memref<1x1x8xi32, #tpu.memory_space<vmem>>, vector<1x1x8xi32>
    %3 = vector.shape_cast %2 : vector<1x1x8xi32> to vector<1x8xi32>
    %c0_i32 = arith.constant 0 : i32
    %4 = vector.broadcast %c0_i32 : i32 to vector<1x8xi32>
    %5 = arith.cmpi eq, %3, %4 : vector<1x8xi32>
    %cst = arith.constant -1.000000e+09 : f32
    %cst_2 = arith.constant 0.000000e+00 : f32
    %6 = vector.broadcast %cst : f32 to vector<1x8xf32>
    %7 = vector.broadcast %cst_2 : f32 to vector<1x8xf32>
    %8 = arith.select %5, %6, %7 : vector<1x8xi1>, vector<1x8xf32>
    %9 = tpu.iota {dimensions = array<i32: 0>} : vector<8x8xi32>
    %10 = vector.broadcast %1 : i32 to vector<8x8xi32>
    %11 = arith.addi %10, %9 : vector<8x8xi32>
    %12 = tpu.iota {dimensions = array<i32: 1>} : vector<8x8xi32>
    %13 = arith.cmpi sge, %11, %12 : vector<8x8xi32>
    %cst_3 = arith.constant 0.000000e+00 : f32
    %cst_4 = arith.constant -1.000000e+09 : f32
    %14 = vector.broadcast %cst_3 : f32 to vector<8x8xf32>
    %15 = vector.broadcast %cst_4 : f32 to vector<8x8xf32>
    %16 = arith.select %13, %14, %15 : vector<8x8xi1>, vector<8x8xf32>
    %17 = vector.broadcast %8 : vector<1x8xf32> to vector<8x8xf32>
    %18 = arith.addf %17, %16 : vector<8x8xf32>
    %cst_5 = arith.constant 0.000000e+00 : f32
    %19 = vector.broadcast %cst_5 : f32 to vector<8x128xf32>
    %c0_6 = arith.constant 0 : index
    %20 = arith.index_cast %1 : i32 to index
    %c0_7 = arith.constant 0 : index
    %21 = vector.load %arg2[%c0_6, %20, %c0_7] : memref<1x8x384xbf16, #tpu.memory_space<vmem>>, vector<1x8x32xbf16>
    %22 = vector.shape_cast %21 : vector<1x8x32xbf16> to vector<8x32xbf16>
    %c0_8 = arith.constant 0 : index
    %c0_9 = arith.constant 0 : index
    %c128 = arith.constant 128 : index
    %23 = vector.load %arg2[%c0_8, %c0_9, %c128] : memref<1x8x384xbf16, #tpu.memory_space<vmem>>, vector<1x8x32xbf16>
    %24 = vector.shape_cast %23 : vector<1x8x32xbf16> to vector<8x32xbf16>
    %c0_10 = arith.constant 0 : index
    %c0_11 = arith.constant 0 : index
    %c256 = arith.constant 256 : index
    %25 = vector.load %arg2[%c0_10, %c0_11, %c256] : memref<1x8x384xbf16, #tpu.memory_space<vmem>>, vector<1x8x32xbf16>
    %26 = vector.shape_cast %25 : vector<1x8x32xbf16> to vector<8x32xbf16>
    %cst_12 = arith.constant dense<0.000000e+00> : vector<8x8xf32>
    %27 = tpu.matmul %22, %24, %cst_12 {dimension_numbers = #tpu.dot_dimension_numbers<[1], [1], [0], [0], [0, 0, 1, 0], [], []>} : vector<8x32xbf16>, vector<8x32xbf16>, vector<8x8xf32> -> vector<8x8xf32>
    %cst_13 = arith.constant 0.176776692 : f32
    %28 = vector.broadcast %cst_13 : f32 to vector<8x8xf32>
    %29 = arith.mulf %27, %28 : vector<8x8xf32>
    %30 = arith.addf %29, %18 : vector<8x8xf32>
    %cst_14 = arith.constant dense<0xFF800000> : vector<8xf32>
    %31 = vector.multi_reduction <maximumf>, %30, %cst_14 [1] : vector<8x8xf32> to vector<8xf32>
    %32 = vector.shape_cast %31 : vector<8xf32> to vector<8x1xf32>
    %33 = vector.broadcast %32 : vector<8x1xf32> to vector<8x8xf32>
    %34 = arith.subf %30, %33 : vector<8x8xf32>
    %35 = math.exp %34 : vector<8x8xf32>
    %cst_15 = arith.constant dense<0.000000e+00> : vector<8xf32>
    %36 = vector.multi_reduction <add>, %35, %cst_15 [1] : vector<8x8xf32> to vector<8xf32>
    %37 = vector.shape_cast %36 : vector<8xf32> to vector<8x1xf32>
    %38 = tpu.reciprocal %37 : vector<8x1xf32> -> vector<8x1xf32>
    %39 = vector.broadcast %38 : vector<8x1xf32> to vector<8x8xf32>
    %40 = arith.mulf %35, %39 : vector<8x8xf32>
    %41 = arith.truncf %40 : vector<8x8xf32> to vector<8x8xbf16>
    %cst_16 = arith.constant dense<0.000000e+00> : vector<8x32xf32>
    %42 = tpu.matmul %41, %26, %cst_16 {dimension_numbers = #tpu.dot_dimension_numbers<[1], [0], [0], [1], [0, 0, 1, 1], [], []>} : vector<8x8xbf16>, vector<8x32xbf16>, vector<8x32xf32> -> vector<8x32xf32>
    %43 = arith.truncf %42 : vector<8x32xf32> to vector<8x32xbf16>
    %c0_17 = arith.constant 0 : index
    %c0_18 = arith.constant 0 : index
    %44 = vector.load %arg4[%c0_17, %c0_18] : memref<128x128xf32, #tpu.memory_space<vmem>>, vector<32x128xf32>
    %45 = arith.truncf %44 : vector<32x128xf32> to vector<32x128xbf16>
    %cst_19 = arith.constant dense<0.000000e+00> : vector<8x128xf32>
    %46 = tpu.matmul %43, %45, %cst_19 {dimension_numbers = #tpu.dot_dimension_numbers<[1], [0], [0], [1], [0, 0, 1, 1], [], []>} : vector<8x32xbf16>, vector<32x128xbf16>, vector<8x128xf32> -> vector<8x128xf32>
    %47 = arith.addf %19, %46 : vector<8x128xf32>
    %c0_20 = arith.constant 0 : index
    %48 = arith.index_cast %1 : i32 to index
    %c32 = arith.constant 32 : index
    %49 = vector.load %arg2[%c0_20, %48, %c32] : memref<1x8x384xbf16, #tpu.memory_space<vmem>>, vector<1x8x32xbf16>
    %50 = vector.shape_cast %49 : vector<1x8x32xbf16> to vector<8x32xbf16>
    %c0_21 = arith.constant 0 : index
    %c0_22 = arith.constant 0 : index
    %c160 = arith.constant 160 : index
    %51 = vector.load %arg2[%c0_21, %c0_22, %c160] : memref<1x8x384xbf16, #tpu.memory_space<vmem>>, vector<1x8x32xbf16>
    %52 = vector.shape_cast %51 : vector<1x8x32xbf16> to vector<8x32xbf16>
    %c0_23 = arith.constant 0 : index
    %c0_24 = arith.constant 0 : index
    %c288 = arith.constant 288 : index
    %53 = vector.load %arg2[%c0_23, %c0_24, %c288] : memref<1x8x384xbf16, #tpu.memory_space<vmem>>, vector<1x8x32xbf16>
    %54 = vector.shape_cast %53 : vector<1x8x32xbf16> to vector<8x32xbf16>
    %cst_25 = arith.constant dense<0.000000e+00> : vector<8x8xf32>
    %55 = tpu.matmul %50, %52, %cst_25 {dimension_numbers = #tpu.dot_dimension_numbers<[1], [1], [0], [0], [0, 0, 1, 0], [], []>} : vector<8x32xbf16>, vector<8x32xbf16>, vector<8x8xf32> -> vector<8x8xf32>
    %cst_26 = arith.constant 0.176776692 : f32
    %56 = vector.broadcast %cst_26 : f32 to vector<8x8xf32>
    %57 = arith.mulf %55, %56 : vector<8x8xf32>
    %58 = arith.addf %57, %18 : vector<8x8xf32>
    %cst_27 = arith.constant dense<0xFF800000> : vector<8xf32>
    %59 = vector.multi_reduction <maximumf>, %58, %cst_27 [1] : vector<8x8xf32> to vector<8xf32>
    %60 = vector.shape_cast %59 : vector<8xf32> to vector<8x1xf32>
    %61 = vector.broadcast %60 : vector<8x1xf32> to vector<8x8xf32>
    %62 = arith.subf %58, %61 : vector<8x8xf32>
    %63 = math.exp %62 : vector<8x8xf32>
    %cst_28 = arith.constant dense<0.000000e+00> : vector<8xf32>
    %64 = vector.multi_reduction <add>, %63, %cst_28 [1] : vector<8x8xf32> to vector<8xf32>
    %65 = vector.shape_cast %64 : vector<8xf32> to vector<8x1xf32>
    %66 = tpu.reciprocal %65 : vector<8x1xf32> -> vector<8x1xf32>
    %67 = vector.broadcast %66 : vector<8x1xf32> to vector<8x8xf32>
    %68 = arith.mulf %63, %67 : vector<8x8xf32>
    %69 = arith.truncf %68 : vector<8x8xf32> to vector<8x8xbf16>
    %cst_29 = arith.constant dense<0.000000e+00> : vector<8x32xf32>
    %70 = tpu.matmul %69, %54, %cst_29 {dimension_numbers = #tpu.dot_dimension_numbers<[1], [0], [0], [1], [0, 0, 1, 1], [], []>} : vector<8x8xbf16>, vector<8x32xbf16>, vector<8x32xf32> -> vector<8x32xf32>
    %71 = arith.truncf %70 : vector<8x32xf32> to vector<8x32xbf16>
    %c32_30 = arith.constant 32 : index
    %c0_31 = arith.constant 0 : index
    %72 = vector.load %arg4[%c32_30, %c0_31] : memref<128x128xf32, #tpu.memory_space<vmem>>, vector<32x128xf32>
    %73 = arith.truncf %72 : vector<32x128xf32> to vector<32x128xbf16>
    %cst_32 = arith.constant dense<0.000000e+00> : vector<8x128xf32>
    %74 = tpu.matmul %71, %73, %cst_32 {dimension_numbers = #tpu.dot_dimension_numbers<[1], [0], [0], [1], [0, 0, 1, 1], [], []>} : vector<8x32xbf16>, vector<32x128xbf16>, vector<8x128xf32> -> vector<8x128xf32>
    %75 = arith.addf %47, %74 : vector<8x128xf32>
    %c0_33 = arith.constant 0 : index
    %76 = arith.index_cast %1 : i32 to index
    %c64 = arith.constant 64 : index
    %77 = vector.load %arg2[%c0_33, %76, %c64] : memref<1x8x384xbf16, #tpu.memory_space<vmem>>, vector<1x8x32xbf16>
    %78 = vector.shape_cast %77 : vector<1x8x32xbf16> to vector<8x32xbf16>
    %c0_34 = arith.constant 0 : index
    %c0_35 = arith.constant 0 : index
    %c192 = arith.constant 192 : index
    %79 = vector.load %arg2[%c0_34, %c0_35, %c192] : memref<1x8x384xbf16, #tpu.memory_space<vmem>>, vector<1x8x32xbf16>
    %80 = vector.shape_cast %79 : vector<1x8x32xbf16> to vector<8x32xbf16>
    %c0_36 = arith.constant 0 : index
    %c0_37 = arith.constant 0 : index
    %c320 = arith.constant 320 : index
    %81 = vector.load %arg2[%c0_36, %c0_37, %c320] : memref<1x8x384xbf16, #tpu.memory_space<vmem>>, vector<1x8x32xbf16>
    %82 = vector.shape_cast %81 : vector<1x8x32xbf16> to vector<8x32xbf16>
    %cst_38 = arith.constant dense<0.000000e+00> : vector<8x8xf32>
    %83 = tpu.matmul %78, %80, %cst_38 {dimension_numbers = #tpu.dot_dimension_numbers<[1], [1], [0], [0], [0, 0, 1, 0], [], []>} : vector<8x32xbf16>, vector<8x32xbf16>, vector<8x8xf32> -> vector<8x8xf32>
    %cst_39 = arith.constant 0.176776692 : f32
    %84 = vector.broadcast %cst_39 : f32 to vector<8x8xf32>
    %85 = arith.mulf %83, %84 : vector<8x8xf32>
    %86 = arith.addf %85, %18 : vector<8x8xf32>
    %cst_40 = arith.constant dense<0xFF800000> : vector<8xf32>
    %87 = vector.multi_reduction <maximumf>, %86, %cst_40 [1] : vector<8x8xf32> to vector<8xf32>
    %88 = vector.shape_cast %87 : vector<8xf32> to vector<8x1xf32>
    %89 = vector.broadcast %88 : vector<8x1xf32> to vector<8x8xf32>
    %90 = arith.subf %86, %89 : vector<8x8xf32>
    %91 = math.exp %90 : vector<8x8xf32>
    %cst_41 = arith.constant dense<0.000000e+00> : vector<8xf32>
    %92 = vector.multi_reduction <add>, %91, %cst_41 [1] : vector<8x8xf32> to vector<8xf32>
    %93 = vector.shape_cast %92 : vector<8xf32> to vector<8x1xf32>
    %94 = tpu.reciprocal %93 : vector<8x1xf32> -> vector<8x1xf32>
    %95 = vector.broadcast %94 : vector<8x1xf32> to vector<8x8xf32>
    %96 = arith.mulf %91, %95 : vector<8x8xf32>
    %97 = arith.truncf %96 : vector<8x8xf32> to vector<8x8xbf16>
    %cst_42 = arith.constant dense<0.000000e+00> : vector<8x32xf32>
    %98 = tpu.matmul %97, %82, %cst_42 {dimension_numbers = #tpu.dot_dimension_numbers<[1], [0], [0], [1], [0, 0, 1, 1], [], []>} : vector<8x8xbf16>, vector<8x32xbf16>, vector<8x32xf32> -> vector<8x32xf32>
    %99 = arith.truncf %98 : vector<8x32xf32> to vector<8x32xbf16>
    %c64_43 = arith.constant 64 : index
    %c0_44 = arith.constant 0 : index
    %100 = vector.load %arg4[%c64_43, %c0_44] : memref<128x128xf32, #tpu.memory_space<vmem>>, vector<32x128xf32>
    %101 = arith.truncf %100 : vector<32x128xf32> to vector<32x128xbf16>
    %cst_45 = arith.constant dense<0.000000e+00> : vector<8x128xf32>
    %102 = tpu.matmul %99, %101, %cst_45 {dimension_numbers = #tpu.dot_dimension_numbers<[1], [0], [0], [1], [0, 0, 1, 1], [], []>} : vector<8x32xbf16>, vector<32x128xbf16>, vector<8x128xf32> -> vector<8x128xf32>
    %103 = arith.addf %75, %102 : vector<8x128xf32>
    %c0_46 = arith.constant 0 : index
    %104 = arith.index_cast %1 : i32 to index
    %c96 = arith.constant 96 : index
    %105 = vector.load %arg2[%c0_46, %104, %c96] : memref<1x8x384xbf16, #tpu.memory_space<vmem>>, vector<1x8x32xbf16>
    %106 = vector.shape_cast %105 : vector<1x8x32xbf16> to vector<8x32xbf16>
    %c0_47 = arith.constant 0 : index
    %c0_48 = arith.constant 0 : index
    %c224 = arith.constant 224 : index
    %107 = vector.load %arg2[%c0_47, %c0_48, %c224] : memref<1x8x384xbf16, #tpu.memory_space<vmem>>, vector<1x8x32xbf16>
    %108 = vector.shape_cast %107 : vector<1x8x32xbf16> to vector<8x32xbf16>
    %c0_49 = arith.constant 0 : index
    %c0_50 = arith.constant 0 : index
    %c352 = arith.constant 352 : index
    %109 = vector.load %arg2[%c0_49, %c0_50, %c352] : memref<1x8x384xbf16, #tpu.memory_space<vmem>>, vector<1x8x32xbf16>
    %110 = vector.shape_cast %109 : vector<1x8x32xbf16> to vector<8x32xbf16>
    %cst_51 = arith.constant dense<0.000000e+00> : vector<8x8xf32>
    %111 = tpu.matmul %106, %108, %cst_51 {dimension_numbers = #tpu.dot_dimension_numbers<[1], [1], [0], [0], [0, 0, 1, 0], [], []>} : vector<8x32xbf16>, vector<8x32xbf16>, vector<8x8xf32> -> vector<8x8xf32>
    %cst_52 = arith.constant 0.176776692 : f32
    %112 = vector.broadcast %cst_52 : f32 to vector<8x8xf32>
    %113 = arith.mulf %111, %112 : vector<8x8xf32>
    %114 = arith.addf %113, %18 : vector<8x8xf32>
    %cst_53 = arith.constant dense<0xFF800000> : vector<8xf32>
    %115 = vector.multi_reduction <maximumf>, %114, %cst_53 [1] : vector<8x8xf32> to vector<8xf32>
    %116 = vector.shape_cast %115 : vector<8xf32> to vector<8x1xf32>
    %117 = vector.broadcast %116 : vector<8x1xf32> to vector<8x8xf32>
    %118 = arith.subf %114, %117 : vector<8x8xf32>
    %119 = math.exp %118 : vector<8x8xf32>
    %cst_54 = arith.constant dense<0.000000e+00> : vector<8xf32>
    %120 = vector.multi_reduction <add>, %119, %cst_54 [1] : vector<8x8xf32> to vector<8xf32>
    %121 = vector.shape_cast %120 : vector<8xf32> to vector<8x1xf32>
    %122 = tpu.reciprocal %121 : vector<8x1xf32> -> vector<8x1xf32>
    %123 = vector.broadcast %122 : vector<8x1xf32> to vector<8x8xf32>
    %124 = arith.mulf %119, %123 : vector<8x8xf32>
    %125 = arith.truncf %124 : vector<8x8xf32> to vector<8x8xbf16>
    %cst_55 = arith.constant dense<0.000000e+00> : vector<8x32xf32>
    %126 = tpu.matmul %125, %110, %cst_55 {dimension_numbers = #tpu.dot_dimension_numbers<[1], [0], [0], [1], [0, 0, 1, 1], [], []>} : vector<8x8xbf16>, vector<8x32xbf16>, vector<8x32xf32> -> vector<8x32xf32>
    %127 = arith.truncf %126 : vector<8x32xf32> to vector<8x32xbf16>
    %c96_56 = arith.constant 96 : index
    %c0_57 = arith.constant 0 : index
    %128 = vector.load %arg4[%c96_56, %c0_57] : memref<128x128xf32, #tpu.memory_space<vmem>>, vector<32x128xf32>
    %129 = arith.truncf %128 : vector<32x128xf32> to vector<32x128xbf16>
    %cst_58 = arith.constant dense<0.000000e+00> : vector<8x128xf32>
    %130 = tpu.matmul %127, %129, %cst_58 {dimension_numbers = #tpu.dot_dimension_numbers<[1], [0], [0], [1], [0, 0, 1, 1], [], []>} : vector<8x32xbf16>, vector<32x128xbf16>, vector<8x128xf32> -> vector<8x128xf32>
    %131 = arith.addf %103, %130 : vector<8x128xf32>
    %c0_59 = arith.constant 0 : index
    %c0_60 = arith.constant 0 : index
    %c0_61 = arith.constant 0 : index
    %132 = vector.load %arg6[%c0_59, %c0_60, %c0_61] : memref<1x8x128xf32, #tpu.memory_space<vmem>>, vector<1x8x128xf32>
    %133 = vector.shape_cast %132 : vector<1x8x128xf32> to vector<8x128xf32>
    %134 = arith.addf %133, %131 : vector<8x128xf32>
    %c0_62 = arith.constant 0 : index
    %c0_63 = arith.constant 0 : index
    %135 = vector.load %arg5[%c0_62, %c0_63] : memref<1x128xf32, #tpu.memory_space<vmem>>, vector<1x128xf32>
    %136 = vector.broadcast %135 : vector<1x128xf32> to vector<8x128xf32>
    %137 = arith.addf %134, %136 : vector<8x128xf32>
    %c0_64 = arith.constant 0 : index
    %c0_65 = arith.constant 0 : index
    %c0_66 = arith.constant 0 : index
    %138 = vector.load %arg7[%c0_64, %c0_65, %c0_66] : memref<1x8x128xf32, #tpu.memory_space<vmem>>, vector<1x8x128xf32>
    %139 = vector.shape_cast %138 : vector<1x8x128xf32> to vector<8x128xf32>
    %140 = vector.shape_cast %137 : vector<8x128xf32> to vector<1x8x128xf32>
    tpu.vector_store %arg7[%c0_64, %c0_65, %c0_66], %140 {strides = array<i32>} : memref<1x8x128xf32, #tpu.memory_space<vmem>>, vector<1x8x128xf32>,
    return
  }
  func.func @transform_0(%arg0: i32, %arg1: i32) -> (i32, i32, i32) {
    %c0_i32 = arith.constant 0 : i32
    %c0_i32_0 = arith.constant 0 : i32
    %c0_i32_1 = arith.constant 0 : i32
    return %arg0, %c0_i32, %c0_i32_0 : i32, i32, i32
  }
  func.func @transform_1(%arg0: i32, %arg1: i32) -> (i32, i32, i32) {
    %c0_i32 = arith.constant 0 : i32
    %c0_i32_0 = arith.constant 0 : i32
    %c0_i32_1 = arith.constant 0 : i32
    return %arg0, %c0_i32, %c0_i32_0 : i32, i32, i32
  }
  func.func @transform_2(%arg0: i32, %arg1: i32) -> (i32, i32) {
    %c0_i32 = arith.constant 0 : i32
    %c0_i32_0 = arith.constant 0 : i32
    %c0_i32_1 = arith.constant 0 : i32
    return %c0_i32, %c0_i32_0 : i32, i32
  }
  func.func @transform_3(%arg0: i32, %arg1: i32) -> (i32, i32) {
    %c0_i32 = arith.constant 0 : i32
    %c0_i32_0 = arith.constant 0 : i32
    %c0_i32_1 = arith.constant 0 : i32
    return %c0_i32, %c0_i32_0 : i32, i32
  }
  func.func @transform_4(%arg0: i32, %arg1: i32) -> (i32, i32, i32) {
    %c0_i32 = arith.constant 0 : i32
    %c0_i32_0 = arith.constant 0 : i32
    return %arg0, %arg1, %c0_i32 : i32, i32, i32
  }
  func.func @transform_5(%arg0: i32, %arg1: i32) -> (i32, i32, i32) {
    %c0_i32 = arith.constant 0 : i32
    %c0_i32_0 = arith.constant 0 : i32
    return %arg0, %arg1, %c0_i32 : i32, i32, i32
  }
}

module attributes {stable_mosaic.version = 11 : i64} {
  func.func @_ffn_kernel(%arg0: i32, %arg1: i32, %arg2: memref<16x128xf32, #tpu.memory_space<vmem>>, %arg3: memref<1x128xf32, #tpu.memory_space<vmem>>, %arg4: memref<1x128xf32, #tpu.memory_space<vmem>>, %arg5: memref<128x512xf32, #tpu.memory_space<vmem>>, %arg6: memref<1x512xf32, #tpu.memory_space<vmem>>, %arg7: memref<512x128xf32, #tpu.memory_space<vmem>>, %arg8: memref<1x128xf32, #tpu.memory_space<vmem>>, %arg9: memref<16x128xf32, #tpu.memory_space<vmem>>, %arg10: memref<16x128xbf16, #tpu.memory_space<vmem>>, %arg11: memref<16x128xf32, #tpu.memory_space<vmem>>) attributes {dimension_semantics = [#tpu.dimension_semantics<parallel>, #tpu.dimension_semantics<arbitrary>], iteration_bounds = array<i64: 1, 1>, scalar_prefetch = 0 : i64, scratch_operands = 2 : i64, tpu.core_type = #tpu.core_type<tc>, window_params = [{transform_indices = @transform_0, window_bounds = array<i64: 16, 128>}, {pipeline_mode = #tpu.pipeline_mode<synchronous>, transform_indices = @transform_1, window_bounds = array<i64: 1, 128>}, {pipeline_mode = #tpu.pipeline_mode<synchronous>, transform_indices = @transform_2, window_bounds = array<i64: 1, 128>}, {transform_indices = @transform_3, window_bounds = array<i64: 128, 512>}, {transform_indices = @transform_4, window_bounds = array<i64: 1, 512>}, {transform_indices = @transform_5, window_bounds = array<i64: 512, 128>}, {pipeline_mode = #tpu.pipeline_mode<synchronous>, transform_indices = @transform_6, window_bounds = array<i64: 1, 128>}, {transform_indices = @transform_7, window_bounds = array<i64: 16, 128>}]} {
    %c0_i32 = arith.constant 0 : i32
    %0 = arith.cmpi eq, %arg1, %c0_i32 : i32
    %1 = arith.extui %0 : i1 to i32
    %c0_i32_0 = arith.constant 0 : i32
    %2 = arith.cmpi ne, %1, %c0_i32_0 : i32
    scf.if %2 {
      %c0_16 = arith.constant 0 : index
      %c0_17 = arith.constant 0 : index
      %22 = vector.load %arg2[%c0_16, %c0_17] : memref<16x128xf32, #tpu.memory_space<vmem>>, vector<16x128xf32>
      %c0_18 = arith.constant 0 : index
      %c0_19 = arith.constant 0 : index
      %23 = vector.load %arg3[%c0_18, %c0_19] : memref<1x128xf32, #tpu.memory_space<vmem>>, vector<1x128xf32>
      %c0_20 = arith.constant 0 : index
      %c0_21 = arith.constant 0 : index
      %24 = vector.load %arg4[%c0_20, %c0_21] : memref<1x128xf32, #tpu.memory_space<vmem>>, vector<1x128xf32>
      %cst_22 = arith.constant dense<0.000000e+00> : vector<16xf32>
      %25 = vector.multi_reduction <add>, %22, %cst_22 [1] : vector<16x128xf32> to vector<16xf32>
      %26 = vector.shape_cast %25 : vector<16xf32> to vector<16x1xf32>
      %cst_23 = arith.constant 1.280000e+02 : f32
      %27 = vector.broadcast %cst_23 : f32 to vector<16x1xf32>
      %28 = arith.divf %26, %27 : vector<16x1xf32>
      %29 = vector.broadcast %28 : vector<16x1xf32> to vector<16x128xf32>
      %30 = arith.subf %22, %29 : vector<16x128xf32>
      %31 = arith.mulf %30, %30 : vector<16x128xf32>
      %cst_24 = arith.constant dense<0.000000e+00> : vector<16xf32>
      %32 = vector.multi_reduction <add>, %31, %cst_24 [1] : vector<16x128xf32> to vector<16xf32>
      %33 = vector.shape_cast %32 : vector<16xf32> to vector<16x1xf32>
      %cst_25 = arith.constant 1.270000e+02 : f32
      %34 = vector.broadcast %cst_25 : f32 to vector<16x1xf32>
      %35 = arith.divf %33, %34 : vector<16x1xf32>
      %36 = math.sqrt %35 : vector<16x1xf32>
      %37 = vector.broadcast %28 : vector<16x1xf32> to vector<16x128xf32>
      %38 = arith.subf %22, %37 : vector<16x128xf32>
      %39 = vector.broadcast %23 : vector<1x128xf32> to vector<16x128xf32>
      %40 = arith.mulf %39, %38 : vector<16x128xf32>
      %cst_26 = arith.constant 9.99999997E-7 : f32
      %41 = vector.broadcast %cst_26 : f32 to vector<16x1xf32>
      %42 = arith.addf %36, %41 : vector<16x1xf32>
      %43 = vector.broadcast %42 : vector<16x1xf32> to vector<16x128xf32>
      %44 = arith.divf %40, %43 : vector<16x128xf32>
      %45 = vector.broadcast %24 : vector<1x128xf32> to vector<16x128xf32>
      %46 = arith.addf %44, %45 : vector<16x128xf32>
      %47 = arith.truncf %46 : vector<16x128xf32> to vector<16x128xbf16>
      %c0_27 = arith.constant 0 : index
      %c0_28 = arith.constant 0 : index
      %48 = vector.load %arg10[%c0_27, %c0_28] : memref<16x128xbf16, #tpu.memory_space<vmem>>, vector<16x128xbf16>
      tpu.vector_store %arg10[%c0_27, %c0_28], %47 {strides = array<i32>} : memref<16x128xbf16, #tpu.memory_space<vmem>>, vector<16x128xbf16>,
      %cst_29 = arith.constant 0.000000e+00 : f32
      %49 = vector.broadcast %cst_29 : f32 to vector<16x128xf32>
      %c0_30 = arith.constant 0 : index
      %c0_31 = arith.constant 0 : index
      %50 = vector.load %arg11[%c0_30, %c0_31] : memref<16x128xf32, #tpu.memory_space<vmem>>, vector<16x128xf32>
      tpu.vector_store %arg11[%c0_30, %c0_31], %49 {strides = array<i32>} : memref<16x128xf32, #tpu.memory_space<vmem>>, vector<16x128xf32>,
    } else {
    }
    %c0 = arith.constant 0 : index
    %c0_1 = arith.constant 0 : index
    %3 = vector.load %arg10[%c0, %c0_1] : memref<16x128xbf16, #tpu.memory_space<vmem>>, vector<16x128xbf16>
    %c0_2 = arith.constant 0 : index
    %c0_3 = arith.constant 0 : index
    %4 = vector.load %arg5[%c0_2, %c0_3] : memref<128x512xf32, #tpu.memory_space<vmem>>, vector<128x512xf32>
    %5 = arith.truncf %4 : vector<128x512xf32> to vector<128x512xbf16>
    %cst = arith.constant dense<0.000000e+00> : vector<16x512xf32>
    %6 = tpu.matmul %3, %5, %cst {dimension_numbers = #tpu.dot_dimension_numbers<[1], [0], [0], [1], [0, 0, 1, 1], [], []>} : vector<16x128xbf16>, vector<128x512xbf16>, vector<16x512xf32> -> vector<16x512xf32>
    %c0_4 = arith.constant 0 : index
    %c0_5 = arith.constant 0 : index
    %7 = vector.load %arg6[%c0_4, %c0_5] : memref<1x512xf32, #tpu.memory_space<vmem>>, vector<1x512xf32>
    %8 = vector.broadcast %7 : vector<1x512xf32> to vector<16x512xf32>
    %9 = arith.addf %6, %8 : vector<16x512xf32>
    %cst_6 = arith.constant 0.000000e+00 : f32
    %10 = vector.broadcast %cst_6 : f32 to vector<16x512xf32>
    %11 = arith.maximumf %9, %10 : vector<16x512xf32>
    %c0_7 = arith.constant 0 : index
    %c0_8 = arith.constant 0 : index
    %12 = vector.load %arg11[%c0_7, %c0_8] : memref<16x128xf32, #tpu.memory_space<vmem>>, vector<16x128xf32>
    %13 = arith.truncf %11 : vector<16x512xf32> to vector<16x512xbf16>
    %c0_9 = arith.constant 0 : index
    %c0_10 = arith.constant 0 : index
    %14 = vector.load %arg7[%c0_9, %c0_10] : memref<512x128xf32, #tpu.memory_space<vmem>>, vector<512x128xf32>
    %15 = arith.truncf %14 : vector<512x128xf32> to vector<512x128xbf16>
    %cst_11 = arith.constant dense<0.000000e+00> : vector<16x128xf32>
    %16 = tpu.matmul %13, %15, %cst_11 {dimension_numbers = #tpu.dot_dimension_numbers<[1], [0], [0], [1], [0, 0, 1, 1], [], []>} : vector<16x512xbf16>, vector<512x128xbf16>, vector<16x128xf32> -> vector<16x128xf32>
    %17 = arith.addf %12, %16 : vector<16x128xf32>
    %c0_12 = arith.constant 0 : index
    %c0_13 = arith.constant 0 : index
    %18 = vector.load %arg11[%c0_12, %c0_13] : memref<16x128xf32, #tpu.memory_space<vmem>>, vector<16x128xf32>
    tpu.vector_store %arg11[%c0_12, %c0_13], %17 {strides = array<i32>} : memref<16x128xf32, #tpu.memory_space<vmem>>, vector<16x128xf32>,
    %c0_i32_14 = arith.constant 0 : i32
    %19 = arith.cmpi eq, %arg1, %c0_i32_14 : i32
    %20 = arith.extui %19 : i1 to i32
    %c0_i32_15 = arith.constant 0 : i32
    %21 = arith.cmpi ne, %20, %c0_i32_15 : i32
    scf.if %21 {
      %c0_16 = arith.constant 0 : index
      %c0_17 = arith.constant 0 : index
      %22 = vector.load %arg11[%c0_16, %c0_17] : memref<16x128xf32, #tpu.memory_space<vmem>>, vector<16x128xf32>
      %c0_18 = arith.constant 0 : index
      %c0_19 = arith.constant 0 : index
      %23 = vector.load %arg8[%c0_18, %c0_19] : memref<1x128xf32, #tpu.memory_space<vmem>>, vector<1x128xf32>
      %24 = vector.broadcast %23 : vector<1x128xf32> to vector<16x128xf32>
      %25 = arith.addf %22, %24 : vector<16x128xf32>
      %c0_20 = arith.constant 0 : index
      %c0_21 = arith.constant 0 : index
      %26 = vector.load %arg2[%c0_20, %c0_21] : memref<16x128xf32, #tpu.memory_space<vmem>>, vector<16x128xf32>
      %27 = arith.addf %25, %26 : vector<16x128xf32>
      %c0_22 = arith.constant 0 : index
      %c0_23 = arith.constant 0 : index
      %28 = vector.load %arg9[%c0_22, %c0_23] : memref<16x128xf32, #tpu.memory_space<vmem>>, vector<16x128xf32>
      tpu.vector_store %arg9[%c0_22, %c0_23], %27 {strides = array<i32>} : memref<16x128xf32, #tpu.memory_space<vmem>>, vector<16x128xf32>,
    } else {
    }
    return
  }
  func.func @transform_0(%arg0: i32, %arg1: i32) -> (i32, i32) {
    %c0_i32 = arith.constant 0 : i32
    %c0_i32_0 = arith.constant 0 : i32
    return %arg0, %c0_i32 : i32, i32
  }
  func.func @transform_1(%arg0: i32, %arg1: i32) -> (i32, i32) {
    %c0_i32 = arith.constant 0 : i32
    %c0_i32_0 = arith.constant 0 : i32
    %c0_i32_1 = arith.constant 0 : i32
    return %c0_i32, %c0_i32_0 : i32, i32
  }
  func.func @transform_2(%arg0: i32, %arg1: i32) -> (i32, i32) {
    %c0_i32 = arith.constant 0 : i32
    %c0_i32_0 = arith.constant 0 : i32
    %c0_i32_1 = arith.constant 0 : i32
    return %c0_i32, %c0_i32_0 : i32, i32
  }
  func.func @transform_3(%arg0: i32, %arg1: i32) -> (i32, i32) {
    %c0_i32 = arith.constant 0 : i32
    %c0_i32_0 = arith.constant 0 : i32
    return %c0_i32, %arg1 : i32, i32
  }
  func.func @transform_4(%arg0: i32, %arg1: i32) -> (i32, i32) {
    %c0_i32 = arith.constant 0 : i32
    %c0_i32_0 = arith.constant 0 : i32
    return %c0_i32, %arg1 : i32, i32
  }
  func.func @transform_5(%arg0: i32, %arg1: i32) -> (i32, i32) {
    %c0_i32 = arith.constant 0 : i32
    %c0_i32_0 = arith.constant 0 : i32
    return %arg1, %c0_i32 : i32, i32
  }
  func.func @transform_6(%arg0: i32, %arg1: i32) -> (i32, i32) {
    %c0_i32 = arith.constant 0 : i32
    %c0_i32_0 = arith.constant 0 : i32
    %c0_i32_1 = arith.constant 0 : i32
    return %c0_i32, %c0_i32_0 : i32, i32
  }
  func.func @transform_7(%arg0: i32, %arg1: i32) -> (i32, i32) {
    %c0_i32 = arith.constant 0 : i32
    %c0_i32_0 = arith.constant 0 : i32
    return %arg0, %c0_i32 : i32, i32
  }
}

module attributes {stable_mosaic.version = 11 : i64} {
  func.func @_cross_attn_kernel(%arg0: i32, %arg1: i32, %arg2: memref<1x8x128xbf16, #tpu.memory_space<vmem>>, %arg3: memref<1x16x256xbf16, #tpu.memory_space<vmem>>, %arg4: memref<1x1x16xi32, #tpu.memory_space<vmem>>, %arg5: memref<128x128xf32, #tpu.memory_space<vmem>>, %arg6: memref<1x128xf32, #tpu.memory_space<vmem>>, %arg7: memref<1x8x128xf32, #tpu.memory_space<vmem>>, %arg8: memref<1x8x128xf32, #tpu.memory_space<vmem>>) attributes {dimension_semantics = [#tpu.dimension_semantics<parallel>, #tpu.dimension_semantics<parallel>], iteration_bounds = array<i64: 2, 1>, scalar_prefetch = 0 : i64, scratch_operands = 0 : i64, tpu.core_type = #tpu.core_type<tc>, window_params = [{transform_indices = @transform_0, window_bounds = array<i64: 1, 8, 128>}, {transform_indices = @transform_1, window_bounds = array<i64: 1, 16, 256>}, {transform_indices = @transform_2, window_bounds = array<i64: 1, 1, 16>}, {pipeline_mode = #tpu.pipeline_mode<synchronous>, transform_indices = @transform_3, window_bounds = array<i64: 128, 128>}, {pipeline_mode = #tpu.pipeline_mode<synchronous>, transform_indices = @transform_4, window_bounds = array<i64: 1, 128>}, {transform_indices = @transform_5, window_bounds = array<i64: 1, 8, 128>}, {transform_indices = @transform_6, window_bounds = array<i64: 1, 8, 128>}]} {
    %c0 = arith.constant 0 : index
    %c0_0 = arith.constant 0 : index
    %c0_1 = arith.constant 0 : index
    %0 = vector.load %arg4[%c0, %c0_0, %c0_1] : memref<1x1x16xi32, #tpu.memory_space<vmem>>, vector<1x1x16xi32>
    %1 = vector.shape_cast %0 : vector<1x1x16xi32> to vector<1x16xi32>
    %c0_i32 = arith.constant 0 : i32
    %2 = vector.broadcast %c0_i32 : i32 to vector<1x16xi32>
    %3 = arith.cmpi eq, %1, %2 : vector<1x16xi32>
    %cst = arith.constant -1.000000e+09 : f32
    %cst_2 = arith.constant 0.000000e+00 : f32
    %4 = vector.broadcast %cst : f32 to vector<1x16xf32>
    %5 = vector.broadcast %cst_2 : f32 to vector<1x16xf32>
    %6 = arith.select %3, %4, %5 : vector<1x16xi1>, vector<1x16xf32>
    %cst_3 = arith.constant 0.000000e+00 : f32
    %7 = vector.broadcast %cst_3 : f32 to vector<8x128xf32>
    %c0_4 = arith.constant 0 : index
    %c0_5 = arith.constant 0 : index
    %c0_6 = arith.constant 0 : index
    %8 = vector.load %arg2[%c0_4, %c0_5, %c0_6] : memref<1x8x128xbf16, #tpu.memory_space<vmem>>, vector<1x8x32xbf16>
    %9 = vector.shape_cast %8 : vector<1x8x32xbf16> to vector<8x32xbf16>
    %c0_7 = arith.constant 0 : index
    %c0_8 = arith.constant 0 : index
    %c0_9 = arith.constant 0 : index
    %10 = vector.load %arg3[%c0_7, %c0_8, %c0_9] : memref<1x16x256xbf16, #tpu.memory_space<vmem>>, vector<1x16x32xbf16>
    %11 = vector.shape_cast %10 : vector<1x16x32xbf16> to vector<16x32xbf16>
    %c0_10 = arith.constant 0 : index
    %c0_11 = arith.constant 0 : index
    %c128 = arith.constant 128 : index
    %12 = vector.load %arg3[%c0_10, %c0_11, %c128] : memref<1x16x256xbf16, #tpu.memory_space<vmem>>, vector<1x16x32xbf16>
    %13 = vector.shape_cast %12 : vector<1x16x32xbf16> to vector<16x32xbf16>
    %cst_12 = arith.constant dense<0.000000e+00> : vector<8x16xf32>
    %14 = tpu.matmul %9, %11, %cst_12 {dimension_numbers = #tpu.dot_dimension_numbers<[1], [1], [0], [0], [0, 0, 1, 0], [], []>} : vector<8x32xbf16>, vector<16x32xbf16>, vector<8x16xf32> -> vector<8x16xf32>
    %cst_13 = arith.constant 0.176776692 : f32
    %15 = vector.broadcast %cst_13 : f32 to vector<8x16xf32>
    %16 = arith.mulf %14, %15 : vector<8x16xf32>
    %17 = vector.broadcast %6 : vector<1x16xf32> to vector<8x16xf32>
    %18 = arith.addf %16, %17 : vector<8x16xf32>
    %cst_14 = arith.constant dense<0xFF800000> : vector<8xf32>
    %19 = vector.multi_reduction <maximumf>, %18, %cst_14 [1] : vector<8x16xf32> to vector<8xf32>
    %20 = vector.shape_cast %19 : vector<8xf32> to vector<8x1xf32>
    %21 = vector.broadcast %20 : vector<8x1xf32> to vector<8x16xf32>
    %22 = arith.subf %18, %21 : vector<8x16xf32>
    %23 = math.exp %22 : vector<8x16xf32>
    %cst_15 = arith.constant dense<0.000000e+00> : vector<8xf32>
    %24 = vector.multi_reduction <add>, %23, %cst_15 [1] : vector<8x16xf32> to vector<8xf32>
    %25 = vector.shape_cast %24 : vector<8xf32> to vector<8x1xf32>
    %26 = tpu.reciprocal %25 : vector<8x1xf32> -> vector<8x1xf32>
    %27 = vector.broadcast %26 : vector<8x1xf32> to vector<8x16xf32>
    %28 = arith.mulf %23, %27 : vector<8x16xf32>
    %29 = arith.truncf %28 : vector<8x16xf32> to vector<8x16xbf16>
    %cst_16 = arith.constant dense<0.000000e+00> : vector<8x32xf32>
    %30 = tpu.matmul %29, %13, %cst_16 {dimension_numbers = #tpu.dot_dimension_numbers<[1], [0], [0], [1], [0, 0, 1, 1], [], []>} : vector<8x16xbf16>, vector<16x32xbf16>, vector<8x32xf32> -> vector<8x32xf32>
    %31 = arith.truncf %30 : vector<8x32xf32> to vector<8x32xbf16>
    %c0_17 = arith.constant 0 : index
    %c0_18 = arith.constant 0 : index
    %32 = vector.load %arg5[%c0_17, %c0_18] : memref<128x128xf32, #tpu.memory_space<vmem>>, vector<32x128xf32>
    %33 = arith.truncf %32 : vector<32x128xf32> to vector<32x128xbf16>
    %cst_19 = arith.constant dense<0.000000e+00> : vector<8x128xf32>
    %34 = tpu.matmul %31, %33, %cst_19 {dimension_numbers = #tpu.dot_dimension_numbers<[1], [0], [0], [1], [0, 0, 1, 1], [], []>} : vector<8x32xbf16>, vector<32x128xbf16>, vector<8x128xf32> -> vector<8x128xf32>
    %35 = arith.addf %7, %34 : vector<8x128xf32>
    %c0_20 = arith.constant 0 : index
    %c0_21 = arith.constant 0 : index
    %c32 = arith.constant 32 : index
    %36 = vector.load %arg2[%c0_20, %c0_21, %c32] : memref<1x8x128xbf16, #tpu.memory_space<vmem>>, vector<1x8x32xbf16>
    %37 = vector.shape_cast %36 : vector<1x8x32xbf16> to vector<8x32xbf16>
    %c0_22 = arith.constant 0 : index
    %c0_23 = arith.constant 0 : index
    %c32_24 = arith.constant 32 : index
    %38 = vector.load %arg3[%c0_22, %c0_23, %c32_24] : memref<1x16x256xbf16, #tpu.memory_space<vmem>>, vector<1x16x32xbf16>
    %39 = vector.shape_cast %38 : vector<1x16x32xbf16> to vector<16x32xbf16>
    %c0_25 = arith.constant 0 : index
    %c0_26 = arith.constant 0 : index
    %c160 = arith.constant 160 : index
    %40 = vector.load %arg3[%c0_25, %c0_26, %c160] : memref<1x16x256xbf16, #tpu.memory_space<vmem>>, vector<1x16x32xbf16>
    %41 = vector.shape_cast %40 : vector<1x16x32xbf16> to vector<16x32xbf16>
    %cst_27 = arith.constant dense<0.000000e+00> : vector<8x16xf32>
    %42 = tpu.matmul %37, %39, %cst_27 {dimension_numbers = #tpu.dot_dimension_numbers<[1], [1], [0], [0], [0, 0, 1, 0], [], []>} : vector<8x32xbf16>, vector<16x32xbf16>, vector<8x16xf32> -> vector<8x16xf32>
    %cst_28 = arith.constant 0.176776692 : f32
    %43 = vector.broadcast %cst_28 : f32 to vector<8x16xf32>
    %44 = arith.mulf %42, %43 : vector<8x16xf32>
    %45 = vector.broadcast %6 : vector<1x16xf32> to vector<8x16xf32>
    %46 = arith.addf %44, %45 : vector<8x16xf32>
    %cst_29 = arith.constant dense<0xFF800000> : vector<8xf32>
    %47 = vector.multi_reduction <maximumf>, %46, %cst_29 [1] : vector<8x16xf32> to vector<8xf32>
    %48 = vector.shape_cast %47 : vector<8xf32> to vector<8x1xf32>
    %49 = vector.broadcast %48 : vector<8x1xf32> to vector<8x16xf32>
    %50 = arith.subf %46, %49 : vector<8x16xf32>
    %51 = math.exp %50 : vector<8x16xf32>
    %cst_30 = arith.constant dense<0.000000e+00> : vector<8xf32>
    %52 = vector.multi_reduction <add>, %51, %cst_30 [1] : vector<8x16xf32> to vector<8xf32>
    %53 = vector.shape_cast %52 : vector<8xf32> to vector<8x1xf32>
    %54 = tpu.reciprocal %53 : vector<8x1xf32> -> vector<8x1xf32>
    %55 = vector.broadcast %54 : vector<8x1xf32> to vector<8x16xf32>
    %56 = arith.mulf %51, %55 : vector<8x16xf32>
    %57 = arith.truncf %56 : vector<8x16xf32> to vector<8x16xbf16>
    %cst_31 = arith.constant dense<0.000000e+00> : vector<8x32xf32>
    %58 = tpu.matmul %57, %41, %cst_31 {dimension_numbers = #tpu.dot_dimension_numbers<[1], [0], [0], [1], [0, 0, 1, 1], [], []>} : vector<8x16xbf16>, vector<16x32xbf16>, vector<8x32xf32> -> vector<8x32xf32>
    %59 = arith.truncf %58 : vector<8x32xf32> to vector<8x32xbf16>
    %c32_32 = arith.constant 32 : index
    %c0_33 = arith.constant 0 : index
    %60 = vector.load %arg5[%c32_32, %c0_33] : memref<128x128xf32, #tpu.memory_space<vmem>>, vector<32x128xf32>
    %61 = arith.truncf %60 : vector<32x128xf32> to vector<32x128xbf16>
    %cst_34 = arith.constant dense<0.000000e+00> : vector<8x128xf32>
    %62 = tpu.matmul %59, %61, %cst_34 {dimension_numbers = #tpu.dot_dimension_numbers<[1], [0], [0], [1], [0, 0, 1, 1], [], []>} : vector<8x32xbf16>, vector<32x128xbf16>, vector<8x128xf32> -> vector<8x128xf32>
    %63 = arith.addf %35, %62 : vector<8x128xf32>
    %c0_35 = arith.constant 0 : index
    %c0_36 = arith.constant 0 : index
    %c64 = arith.constant 64 : index
    %64 = vector.load %arg2[%c0_35, %c0_36, %c64] : memref<1x8x128xbf16, #tpu.memory_space<vmem>>, vector<1x8x32xbf16>
    %65 = vector.shape_cast %64 : vector<1x8x32xbf16> to vector<8x32xbf16>
    %c0_37 = arith.constant 0 : index
    %c0_38 = arith.constant 0 : index
    %c64_39 = arith.constant 64 : index
    %66 = vector.load %arg3[%c0_37, %c0_38, %c64_39] : memref<1x16x256xbf16, #tpu.memory_space<vmem>>, vector<1x16x32xbf16>
    %67 = vector.shape_cast %66 : vector<1x16x32xbf16> to vector<16x32xbf16>
    %c0_40 = arith.constant 0 : index
    %c0_41 = arith.constant 0 : index
    %c192 = arith.constant 192 : index
    %68 = vector.load %arg3[%c0_40, %c0_41, %c192] : memref<1x16x256xbf16, #tpu.memory_space<vmem>>, vector<1x16x32xbf16>
    %69 = vector.shape_cast %68 : vector<1x16x32xbf16> to vector<16x32xbf16>
    %cst_42 = arith.constant dense<0.000000e+00> : vector<8x16xf32>
    %70 = tpu.matmul %65, %67, %cst_42 {dimension_numbers = #tpu.dot_dimension_numbers<[1], [1], [0], [0], [0, 0, 1, 0], [], []>} : vector<8x32xbf16>, vector<16x32xbf16>, vector<8x16xf32> -> vector<8x16xf32>
    %cst_43 = arith.constant 0.176776692 : f32
    %71 = vector.broadcast %cst_43 : f32 to vector<8x16xf32>
    %72 = arith.mulf %70, %71 : vector<8x16xf32>
    %73 = vector.broadcast %6 : vector<1x16xf32> to vector<8x16xf32>
    %74 = arith.addf %72, %73 : vector<8x16xf32>
    %cst_44 = arith.constant dense<0xFF800000> : vector<8xf32>
    %75 = vector.multi_reduction <maximumf>, %74, %cst_44 [1] : vector<8x16xf32> to vector<8xf32>
    %76 = vector.shape_cast %75 : vector<8xf32> to vector<8x1xf32>
    %77 = vector.broadcast %76 : vector<8x1xf32> to vector<8x16xf32>
    %78 = arith.subf %74, %77 : vector<8x16xf32>
    %79 = math.exp %78 : vector<8x16xf32>
    %cst_45 = arith.constant dense<0.000000e+00> : vector<8xf32>
    %80 = vector.multi_reduction <add>, %79, %cst_45 [1] : vector<8x16xf32> to vector<8xf32>
    %81 = vector.shape_cast %80 : vector<8xf32> to vector<8x1xf32>
    %82 = tpu.reciprocal %81 : vector<8x1xf32> -> vector<8x1xf32>
    %83 = vector.broadcast %82 : vector<8x1xf32> to vector<8x16xf32>
    %84 = arith.mulf %79, %83 : vector<8x16xf32>
    %85 = arith.truncf %84 : vector<8x16xf32> to vector<8x16xbf16>
    %cst_46 = arith.constant dense<0.000000e+00> : vector<8x32xf32>
    %86 = tpu.matmul %85, %69, %cst_46 {dimension_numbers = #tpu.dot_dimension_numbers<[1], [0], [0], [1], [0, 0, 1, 1], [], []>} : vector<8x16xbf16>, vector<16x32xbf16>, vector<8x32xf32> -> vector<8x32xf32>
    %87 = arith.truncf %86 : vector<8x32xf32> to vector<8x32xbf16>
    %c64_47 = arith.constant 64 : index
    %c0_48 = arith.constant 0 : index
    %88 = vector.load %arg5[%c64_47, %c0_48] : memref<128x128xf32, #tpu.memory_space<vmem>>, vector<32x128xf32>
    %89 = arith.truncf %88 : vector<32x128xf32> to vector<32x128xbf16>
    %cst_49 = arith.constant dense<0.000000e+00> : vector<8x128xf32>
    %90 = tpu.matmul %87, %89, %cst_49 {dimension_numbers = #tpu.dot_dimension_numbers<[1], [0], [0], [1], [0, 0, 1, 1], [], []>} : vector<8x32xbf16>, vector<32x128xbf16>, vector<8x128xf32> -> vector<8x128xf32>
    %91 = arith.addf %63, %90 : vector<8x128xf32>
    %c0_50 = arith.constant 0 : index
    %c0_51 = arith.constant 0 : index
    %c96 = arith.constant 96 : index
    %92 = vector.load %arg2[%c0_50, %c0_51, %c96] : memref<1x8x128xbf16, #tpu.memory_space<vmem>>, vector<1x8x32xbf16>
    %93 = vector.shape_cast %92 : vector<1x8x32xbf16> to vector<8x32xbf16>
    %c0_52 = arith.constant 0 : index
    %c0_53 = arith.constant 0 : index
    %c96_54 = arith.constant 96 : index
    %94 = vector.load %arg3[%c0_52, %c0_53, %c96_54] : memref<1x16x256xbf16, #tpu.memory_space<vmem>>, vector<1x16x32xbf16>
    %95 = vector.shape_cast %94 : vector<1x16x32xbf16> to vector<16x32xbf16>
    %c0_55 = arith.constant 0 : index
    %c0_56 = arith.constant 0 : index
    %c224 = arith.constant 224 : index
    %96 = vector.load %arg3[%c0_55, %c0_56, %c224] : memref<1x16x256xbf16, #tpu.memory_space<vmem>>, vector<1x16x32xbf16>
    %97 = vector.shape_cast %96 : vector<1x16x32xbf16> to vector<16x32xbf16>
    %cst_57 = arith.constant dense<0.000000e+00> : vector<8x16xf32>
    %98 = tpu.matmul %93, %95, %cst_57 {dimension_numbers = #tpu.dot_dimension_numbers<[1], [1], [0], [0], [0, 0, 1, 0], [], []>} : vector<8x32xbf16>, vector<16x32xbf16>, vector<8x16xf32> -> vector<8x16xf32>
    %cst_58 = arith.constant 0.176776692 : f32
    %99 = vector.broadcast %cst_58 : f32 to vector<8x16xf32>
    %100 = arith.mulf %98, %99 : vector<8x16xf32>
    %101 = vector.broadcast %6 : vector<1x16xf32> to vector<8x16xf32>
    %102 = arith.addf %100, %101 : vector<8x16xf32>
    %cst_59 = arith.constant dense<0xFF800000> : vector<8xf32>
    %103 = vector.multi_reduction <maximumf>, %102, %cst_59 [1] : vector<8x16xf32> to vector<8xf32>
    %104 = vector.shape_cast %103 : vector<8xf32> to vector<8x1xf32>
    %105 = vector.broadcast %104 : vector<8x1xf32> to vector<8x16xf32>
    %106 = arith.subf %102, %105 : vector<8x16xf32>
    %107 = math.exp %106 : vector<8x16xf32>
    %cst_60 = arith.constant dense<0.000000e+00> : vector<8xf32>
    %108 = vector.multi_reduction <add>, %107, %cst_60 [1] : vector<8x16xf32> to vector<8xf32>
    %109 = vector.shape_cast %108 : vector<8xf32> to vector<8x1xf32>
    %110 = tpu.reciprocal %109 : vector<8x1xf32> -> vector<8x1xf32>
    %111 = vector.broadcast %110 : vector<8x1xf32> to vector<8x16xf32>
    %112 = arith.mulf %107, %111 : vector<8x16xf32>
    %113 = arith.truncf %112 : vector<8x16xf32> to vector<8x16xbf16>
    %cst_61 = arith.constant dense<0.000000e+00> : vector<8x32xf32>
    %114 = tpu.matmul %113, %97, %cst_61 {dimension_numbers = #tpu.dot_dimension_numbers<[1], [0], [0], [1], [0, 0, 1, 1], [], []>} : vector<8x16xbf16>, vector<16x32xbf16>, vector<8x32xf32> -> vector<8x32xf32>
    %115 = arith.truncf %114 : vector<8x32xf32> to vector<8x32xbf16>
    %c96_62 = arith.constant 96 : index
    %c0_63 = arith.constant 0 : index
    %116 = vector.load %arg5[%c96_62, %c0_63] : memref<128x128xf32, #tpu.memory_space<vmem>>, vector<32x128xf32>
    %117 = arith.truncf %116 : vector<32x128xf32> to vector<32x128xbf16>
    %cst_64 = arith.constant dense<0.000000e+00> : vector<8x128xf32>
    %118 = tpu.matmul %115, %117, %cst_64 {dimension_numbers = #tpu.dot_dimension_numbers<[1], [0], [0], [1], [0, 0, 1, 1], [], []>} : vector<8x32xbf16>, vector<32x128xbf16>, vector<8x128xf32> -> vector<8x128xf32>
    %119 = arith.addf %91, %118 : vector<8x128xf32>
    %c0_65 = arith.constant 0 : index
    %c0_66 = arith.constant 0 : index
    %c0_67 = arith.constant 0 : index
    %120 = vector.load %arg7[%c0_65, %c0_66, %c0_67] : memref<1x8x128xf32, #tpu.memory_space<vmem>>, vector<1x8x128xf32>
    %121 = vector.shape_cast %120 : vector<1x8x128xf32> to vector<8x128xf32>
    %122 = arith.addf %121, %119 : vector<8x128xf32>
    %c0_68 = arith.constant 0 : index
    %c0_69 = arith.constant 0 : index
    %123 = vector.load %arg6[%c0_68, %c0_69] : memref<1x128xf32, #tpu.memory_space<vmem>>, vector<1x128xf32>
    %124 = vector.broadcast %123 : vector<1x128xf32> to vector<8x128xf32>
    %125 = arith.addf %122, %124 : vector<8x128xf32>
    %c0_70 = arith.constant 0 : index
    %c0_71 = arith.constant 0 : index
    %c0_72 = arith.constant 0 : index
    %126 = vector.load %arg8[%c0_70, %c0_71, %c0_72] : memref<1x8x128xf32, #tpu.memory_space<vmem>>, vector<1x8x128xf32>
    %127 = vector.shape_cast %126 : vector<1x8x128xf32> to vector<8x128xf32>
    %128 = vector.shape_cast %125 : vector<8x128xf32> to vector<1x8x128xf32>
    tpu.vector_store %arg8[%c0_70, %c0_71, %c0_72], %128 {strides = array<i32>} : memref<1x8x128xf32, #tpu.memory_space<vmem>>, vector<1x8x128xf32>,
    return
  }
  func.func @transform_0(%arg0: i32, %arg1: i32) -> (i32, i32, i32) {
    %c0_i32 = arith.constant 0 : i32
    %c0_i32_0 = arith.constant 0 : i32
    return %arg0, %arg1, %c0_i32 : i32, i32, i32
  }
  func.func @transform_1(%arg0: i32, %arg1: i32) -> (i32, i32, i32) {
    %c0_i32 = arith.constant 0 : i32
    %c0_i32_0 = arith.constant 0 : i32
    %c0_i32_1 = arith.constant 0 : i32
    return %arg0, %c0_i32, %c0_i32_0 : i32, i32, i32
  }
  func.func @transform_2(%arg0: i32, %arg1: i32) -> (i32, i32, i32) {
    %c0_i32 = arith.constant 0 : i32
    %c0_i32_0 = arith.constant 0 : i32
    %c0_i32_1 = arith.constant 0 : i32
    return %arg0, %c0_i32, %c0_i32_0 : i32, i32, i32
  }
  func.func @transform_3(%arg0: i32, %arg1: i32) -> (i32, i32) {
    %c0_i32 = arith.constant 0 : i32
    %c0_i32_0 = arith.constant 0 : i32
    %c0_i32_1 = arith.constant 0 : i32
    return %c0_i32, %c0_i32_0 : i32, i32
  }
  func.func @transform_4(%arg0: i32, %arg1: i32) -> (i32, i32) {
    %c0_i32 = arith.constant 0 : i32
    %c0_i32_0 = arith.constant 0 : i32
    %c0_i32_1 = arith.constant 0 : i32
    return %c0_i32, %c0_i32_0 : i32, i32
  }
  func.func @transform_5(%arg0: i32, %arg1: i32) -> (i32, i32, i32) {
    %c0_i32 = arith.constant 0 : i32
    %c0_i32_0 = arith.constant 0 : i32
    return %arg0, %arg1, %c0_i32 : i32, i32, i32
  }
  func.func @transform_6(%arg0: i32, %arg1: i32) -> (i32, i32, i32) {
    %c0_i32 = arith.constant 0 : i32
    %c0_i32_0 = arith.constant 0 : i32
    return %arg0, %arg1, %c0_i32 : i32, i32, i32
  }
}

module attributes {stable_mosaic.version = 11 : i64} {
  func.func @_layernorm_kernel(%arg0: i32, %arg1: memref<16x128xf32, #tpu.memory_space<vmem>>, %arg2: memref<1x128xf32, #tpu.memory_space<vmem>>, %arg3: memref<1x128xf32, #tpu.memory_space<vmem>>, %arg4: memref<16x128xf32, #tpu.memory_space<vmem>>) attributes {dimension_semantics = [#tpu.dimension_semantics<parallel>], iteration_bounds = array<i64: 1>, scalar_prefetch = 0 : i64, scratch_operands = 0 : i64, tpu.core_type = #tpu.core_type<tc>, window_params = [{transform_indices = @transform_0, window_bounds = array<i64: 16, 128>}, {pipeline_mode = #tpu.pipeline_mode<synchronous>, transform_indices = @transform_1, window_bounds = array<i64: 1, 128>}, {pipeline_mode = #tpu.pipeline_mode<synchronous>, transform_indices = @transform_2, window_bounds = array<i64: 1, 128>}, {transform_indices = @transform_3, window_bounds = array<i64: 16, 128>}]} {
    %c0 = arith.constant 0 : index
    %c0_0 = arith.constant 0 : index
    %0 = vector.load %arg1[%c0, %c0_0] : memref<16x128xf32, #tpu.memory_space<vmem>>, vector<16x128xf32>
    %c0_1 = arith.constant 0 : index
    %c0_2 = arith.constant 0 : index
    %1 = vector.load %arg2[%c0_1, %c0_2] : memref<1x128xf32, #tpu.memory_space<vmem>>, vector<1x128xf32>
    %c0_3 = arith.constant 0 : index
    %c0_4 = arith.constant 0 : index
    %2 = vector.load %arg3[%c0_3, %c0_4] : memref<1x128xf32, #tpu.memory_space<vmem>>, vector<1x128xf32>
    %cst = arith.constant dense<0.000000e+00> : vector<16xf32>
    %3 = vector.multi_reduction <add>, %0, %cst [1] : vector<16x128xf32> to vector<16xf32>
    %4 = vector.shape_cast %3 : vector<16xf32> to vector<16x1xf32>
    %cst_5 = arith.constant 1.280000e+02 : f32
    %5 = vector.broadcast %cst_5 : f32 to vector<16x1xf32>
    %6 = arith.divf %4, %5 : vector<16x1xf32>
    %7 = vector.broadcast %6 : vector<16x1xf32> to vector<16x128xf32>
    %8 = arith.subf %0, %7 : vector<16x128xf32>
    %9 = arith.mulf %8, %8 : vector<16x128xf32>
    %cst_6 = arith.constant dense<0.000000e+00> : vector<16xf32>
    %10 = vector.multi_reduction <add>, %9, %cst_6 [1] : vector<16x128xf32> to vector<16xf32>
    %11 = vector.shape_cast %10 : vector<16xf32> to vector<16x1xf32>
    %cst_7 = arith.constant 1.270000e+02 : f32
    %12 = vector.broadcast %cst_7 : f32 to vector<16x1xf32>
    %13 = arith.divf %11, %12 : vector<16x1xf32>
    %14 = math.sqrt %13 : vector<16x1xf32>
    %15 = vector.broadcast %6 : vector<16x1xf32> to vector<16x128xf32>
    %16 = arith.subf %0, %15 : vector<16x128xf32>
    %17 = vector.broadcast %1 : vector<1x128xf32> to vector<16x128xf32>
    %18 = arith.mulf %17, %16 : vector<16x128xf32>
    %cst_8 = arith.constant 9.99999997E-7 : f32
    %19 = vector.broadcast %cst_8 : f32 to vector<16x1xf32>
    %20 = arith.addf %14, %19 : vector<16x1xf32>
    %21 = vector.broadcast %20 : vector<16x1xf32> to vector<16x128xf32>
    %22 = arith.divf %18, %21 : vector<16x128xf32>
    %23 = vector.broadcast %2 : vector<1x128xf32> to vector<16x128xf32>
    %24 = arith.addf %22, %23 : vector<16x128xf32>
    %c0_9 = arith.constant 0 : index
    %c0_10 = arith.constant 0 : index
    %25 = vector.load %arg4[%c0_9, %c0_10] : memref<16x128xf32, #tpu.memory_space<vmem>>, vector<16x128xf32>
    tpu.vector_store %arg4[%c0_9, %c0_10], %24 {strides = array<i32>} : memref<16x128xf32, #tpu.memory_space<vmem>>, vector<16x128xf32>,
    return
  }
  func.func @transform_0(%arg0: i32) -> (i32, i32) {
    %c0_i32 = arith.constant 0 : i32
    %c0_i32_0 = arith.constant 0 : i32
    return %arg0, %c0_i32 : i32, i32
  }
  func.func @transform_1(%arg0: i32) -> (i32, i32) {
    %c0_i32 = arith.constant 0 : i32
    %c0_i32_0 = arith.constant 0 : i32
    %c0_i32_1 = arith.constant 0 : i32
    return %c0_i32, %c0_i32_0 : i32, i32
  }
  func.func @transform_2(%arg0: i32) -> (i32, i32) {
    %c0_i32 = arith.constant 0 : i32
    %c0_i32_0 = arith.constant 0 : i32
    %c0_i32_1 = arith.constant 0 : i32
    return %c0_i32, %c0_i32_0 : i32, i32
  }
  func.func @transform_3(%arg0: i32) -> (i32, i32) {
    %c0_i32 = arith.constant 0 : i32
    %c0_i32_0 = arith.constant 0 : i32
    return %arg0, %c0_i32 : i32, i32
  }
}

</mosaic_0001>

<bundles_post_ra>
// kernel: tpu_custom_call.1
= control target key start
LH: loop header
LB: loop body
LE: loop exit
PB: predicated region body
PF: predicated region fallthrough
CT: control target
= control target key end

     0   :  { %7 = vsyncpa [#allocation3], 0  ;;  %s170_s0 = inlined_call_operand.hbm [shape: f32[8,128], index: 0, kind: input, shape index: {}]   ;;  %s171_s1 = inlined_call_operand.hbm [shape: f32[8,128], index: 1, kind: input, shape index: {}]   ;;  %s172_s2 = inlined_call_operand.hbm [shape: f32[8,128], index: 2, kind: output, shape index: {}]  }
   0x1   :  { %8 = vsyncpa [#allocation6], 0 }
   0x2   :  { %9 = vsyncpa [#allocation4], 0  ;;  %s15_s11 = sshll.u32 %s170_s0, 4  ;;  %s143_s12 = smov [#allocation2]   ;;  %s16_s11 = int_to_ptr.hbm [resolvable:$true] %s15_s11 }
   0x3   :  { %s17_s13 = sshll.u32 %s143_s12, 4  ;;  %s26_s16 = sshll.u32 %s171_s1, 4  ;;  %s18_s13 = int_to_ptr.vmem [resolvable:$true] %s17_s13  ;;  %s27_s16 = int_to_ptr.hbm [resolvable:$true] %s26_s16 }
   0x4   :  { %20 = dma.hbm_to_vmem [thread:$0]  %s16_s11, 128, %s18_s13, [#allocation3]  }
   0x5   :  { %s144_s17 = smov [#allocation5]  }
   0x6   :  { %s28_s18 = sshll.u32 %s144_s17, 4  ;;  %s29_s18 = int_to_ptr.vmem [resolvable:$true] %s28_s18 }
   0x7   :  { %31 = dma.hbm_to_vmem [thread:$0]  %s27_s16, 128, %s29_s18, [#allocation6]  }
   0x8   :  { %137 = dma.done.wait [#allocation3], 128  }
   0x9   :  { %138 = vsyncadd [#allocation3], 4294967168 }
   0xa   :  { %139 = dma.done.wait [#allocation6], 128  }
   0xb   :  { %140 = vsyncadd [#allocation6], 4294967168  ;;  %s145_s19 = smov [#allocation7]   ;;  %s51_s22 = sshll.u32 %s172_s2, 4  ;;  %v40_v0 = vld [vmem:[#allocation2] sm:$0xff]  ;;  %v41_v1 = vld [vmem:[#allocation5] sm:$0xff]  ;;  %s52_s22 = int_to_ptr.hbm [resolvable:$true] %s51_s22 }
   0xc   :  { %s49_s0 = sshll.u32 %s145_s19, 4  ;;  %v42_v2 = vadd.f32 %v41_v1, %v40_v0  ;;  %s50_s0 = int_to_ptr.vmem [resolvable:$true] %s49_s0 }
   0xe   :  { %43 = vst [vmem:[#allocation7] sm:$0xff] %v42_v2 }
   0xf   :  { %54 = dma.vmem_to_hbm [thread:$0]  %s50_s0, 128, %s52_s22, [#allocation4]  }
  0x10   :  { %141 = dma.done.wait [#allocation4], 128  }
  0x11   :  { %142 = vsyncadd [#allocation4], 4294967168 }
  0x12   :  { %59 = vsyncpa [#allocation3], 1 }
  0x13   :  { %60 = vsyncpa [#allocation6], 1 }
  0x14   :  { %61 = vsyncpa [#allocation4], 1 }

// kernel: decoder_forward.12
= control target key start
LH: loop header
LB: loop body
LE: loop exit
PB: predicated region body
PF: predicated region fallthrough
CT: control target
= control target key end

     0   :  { %8 = vsyncpa [#allocation3], 0  ;;  %s880_s0 = inlined_call_operand.vmem [shape: f32[32,128], index: 0, kind: input, shape index: {}]   ;;  %s881_s1 = inlined_call_operand.hbm [shape: f32[2,128,256], index: 1, kind: input, shape index: {}]   ;;  %s882_s2 = inlined_call_operand.vmem [shape: f32[2,1,256], index: 2, kind: input, shape index: {}]   ;;  %s883_s3 = inlined_call_operand.vmem [shape: bf16[2,32,256], index: 3, kind: output, shape index: {}]  }
   0x1   :  { %10 = vsyncpa [#allocation3 + $0x1], 0  ;;  %s743_s12 = smov 0   ;;  %s745_s13 = smov 0  }
   0x2   :  { %s747_s14 = smov 0   ;;  %s749_s15 = smov 0  }
   0x3   :  { %s751_s16 = smov 0   ;;  %s753_s17 = smov 0  }
   0x4 LB: > { %s549_s18 = sadd.s32 4294967295, %s719_s17   ;;  %s28_s19 = sadd.s32 1, %s715_s16  ;;  %s719_s17 = sphi %s753_s17, %s16_s17   ;;  %s715_s16 = sphi %s751_s16, %s890_s16   ;;  %s711_s15 = sphi %s749_s15, %s889_s15   ;;  %s707_s14 = sphi %s747_s14, %s888_s14   ;;  %s703_s13 = sphi %s745_s13, %s887_s13   ;;  %s699_s12 = sphi %s743_s12, %s886_s12  }
   0x5   : > { %p29_p0 = scmp.ge.s32.totalorder %s28_s19, 2  ;;  %s70_s20 = sadd.s32 1, %s707_s14 }
   0x6   : > { %p77_p1 = scmp.ne.s32.totalorder %s707_s14, %s703_s13  ;;  %p78_p2 = scmp.eq.s32.totalorder %s719_s17, 0 }
   0x7   : > { %s892_s19 = smov (%p29_p0, %s28_s19), 0  ;;  %p83_p4 = scmp.ne.s32.totalorder %s703_s13, %s699_s12 }
   0x8   : > { %p779_p3 = por %p78_p2, %p77_p1  ;;  %s65_s22 = ssub.s32 %s715_s16, %s892_s19 }
   0x9   : > { %p84_p5 = scmp.eq.s32.totalorder %s549_s18, 0  ;;  %p68_p6 = scmp.eq.s32.totalorder %s65_s22, 0 }
   0xa   : > { %p588_p8 = scmp.lt.s32.totalorder %s719_s17, 2  ;;  %s174_s25 = sand.u32 1, %s707_s14  }
   0xb   : > { %p786_p7 = por %p84_p5, %p83_p4  ;;  %s564_s26 = sshll.u32 %s715_s16, 8 }
   0xc   : > { %s792_s24 = scalar_select %p68_p6, %s707_s14, %s70_s20  }
   0xd   : > { %s554_s27 = sshll.u32 %s174_s25, 8  ;;  %s185_s30 = scalar_lea.hbm %s881_s1, %s564_s26 }
   0xe   : > { %s186_s4 = sshll.u32 %s185_s30, 4  ;;  %s178_s5 = scalar_lea.vmem [#allocation2], %s554_s27  ;;  %s187_s4 = int_to_ptr.hbm [resolvable:$true] %s186_s4 }
   0xf   : > { %s188_s6 = sshll.u32 %s178_s5, 4  ;;  %p585_p9 = pnand %p588_p8, %p779_p3  ;;  %s189_s6 = int_to_ptr.vmem [resolvable:$true] %s188_s6 }
  0x10   : > { %p557_p10 = scmp.ge.s32.totalorder %s719_s17, 1  ;;  %p208_p11 = scmp.lt.s32.totalorder %s719_s17, 3 }
  0x11   : > { %s175_s7 = scalar_lea.sflag [#allocation3], %s174_s25  ;;  %s721_s8 = smov 256  }
  0x12   : > { %s722_s9 = smov 16   ;;  %p209_p12 = pnand %p557_p10, %p208_p11 }
  0x13   : > { %587 = dma.hbm_to_vmem [thread:$0]  (!%p585_p9), %s187_s4, 4096, %s189_s6, %s175_s7, %s721_s8, %s721_s8, %s722_s9  }
  0x14   : > { %212 = sbr.rel (%p209_p12) target bundleno = 206 (0xce), region = 32  ;;  %s214_s10 = sand.u32 (!%p209_p12), 1, %s703_s13  }
  0x15   : > { %s558_s11 = sshll.u32 (!%p209_p12), %s214_s10, 8  ;;  %s215_s12 = scalar_lea.sflag (!%p209_p12), [#allocation3], %s214_s10 }
  0x16   : > { %s804_s18 = scalar_lea.vmem (!%p209_p12), [#allocation2], %s558_s11 }
  0x19   : > { %694 = dma.done.wait (%p786_p7), %s215_s12, 4096  }
  0x1a   : > { %696 = vsyncadd (%p786_p7), %s215_s12, 4294963200  ;;  %v330_v0 = vld [vmem:[%s804_s18 + $0xe0] sm:$0xff]  ;;  %v332_v1 = vld [vmem:[%s804_s18 + $0xf0] sm:$0xff]  ;;  %p272_p13 = scmp.lt.s32.totalorder %s711_s15, 1 }
  0x1b   : > { %v331_v2 = vld [vmem:[%s804_s18 + $0xe8] sm:$0xff]  ;;  %v348_v3 = vpack.c.bf16 %v332_v1, %v330_v0  ;;  %v333_v4 = vld [vmem:[%s804_s18 + $0xf8] sm:$0xff]  ;;  %v326_v5 = vld [vmem:[%s804_s18 + $0xc0] sm:$0xff] }
  0x1c   : > { %v328_v6 = vld [vmem:[%s804_s18 + $0xd0] sm:$0xff]  ;;  %v349_v7 = vpack.c.bf16 %v333_v4, %v331_v2  ;;  %v327_v8 = vld [vmem:[%s804_s18 + $0xc8] sm:$0xff]  ;;  %v329_v9 = vld [vmem:[%s804_s18 + $0xd8] sm:$0xff]  ;;  %s894_s15 = smov (!%p272_p13, %s711_s15), 1 }
  0x1d   : > { %356 = vmatpush.bf16.msra.mxu0 %v348_v3  ;;  %566 = vmatpush.bf16.msra.mxu2 %v348_v3  ;;  %v346_v10 = vpack.c.bf16 %v328_v6, %v326_v5  ;;  %v347_v11 = vpack.c.bf16 %v329_v9, %v327_v8  ;;  %v322_v12 = vld [vmem:[%s804_s18 + $0xa0] sm:$0xff]  ;;  %v324_v13 = vld [vmem:[%s804_s18 + $0xb0] sm:$0xff]  ;;  %v323_v14 = vld [vmem:[%s804_s18 + $0xa8] sm:$0xff]  ;;  %s559_s29 = sshll.u32 %s894_s15, 1  ;;  %s565_s6 = sshll.u32 %s894_s15, 5 }
  0x1e   : > { %375 = vmatpush.bf16.msra.mxu1 %v349_v7  ;;  %574 = vmatpush.bf16.msra.mxu3 %v349_v7  ;;  %v325_v15 = vld [vmem:[%s804_s18 + $0xb8] sm:$0xff]  ;;  %v344_v16 = vpack.c.bf16 %v324_v13, %v322_v12  ;;  %v318_v18 = vld [vmem:[%s804_s18 + $0x80] sm:$0xff]  ;;  %v320_v19 = vld [vmem:[%s804_s18 + $0x90] sm:$0xff]  ;;  %s278_s5 = scalar_lea.vmem %s882_s2, %s559_s29  ;;  %s293_s9 = scalar_lea.vmem %s883_s3, %s565_s6 }
  0x1f   : > { %v345_v17 = vpack.c.bf16 %v325_v15, %v323_v14  ;;  %v319_v20 = vld [vmem:[%s804_s18 + $0x88] sm:$0xff]  ;;  %v321_v21 = vld [vmem:[%s804_s18 + $0x98] sm:$0xff]  ;;  %v342_v22 = vpack.c.bf16 %v320_v19, %v318_v18  ;;  %v314_v24 = vld [vmem:[%s804_s18 + $0x60] sm:$0xff] }
  0x20   : > { %v343_v23 = vpack.c.bf16 %v321_v21, %v319_v20  ;;  %v316_v25 = vld [vmem:[%s804_s18 + $0x70] sm:$0xff]  ;;  %v315_v26 = vld [vmem:[%s804_s18 + $0x68] sm:$0xff]  ;;  %v317_v27 = vld [vmem:[%s804_s18 + $0x78] sm:$0xff] }
  0x21   : > { %357 = vmatpush.bf16.msra.mxu0 %v346_v10  ;;  %567 = vmatpush.bf16.msra.mxu2 %v346_v10  ;;  %v340_v28 = vpack.c.bf16 %v316_v25, %v314_v24  ;;  %v341_v29 = vpack.c.bf16 %v317_v27, %v315_v26  ;;  %v310_v30 = vld [vmem:[%s804_s18 + $0x40] sm:$0xff]  ;;  %v312_v31 = vld [vmem:[%s804_s18 + $0x50] sm:$0xff]  ;;  %v311_v32 = vld [vmem:[%s804_s18 + $0x48] sm:$0xff] }
  0x22   : > { %376 = vmatpush.bf16.msra.mxu1 %v347_v11  ;;  %575 = vmatpush.bf16.msra.mxu3 %v347_v11  ;;  %v313_v33 = vld [vmem:[%s804_s18 + $0x58] sm:$0xff]  ;;  %v338_v34 = vpack.c.bf16 %v312_v31, %v310_v30  ;;  %v306_v36 = vld [vmem:[%s804_s18 + $0x20] sm:$0xff]  ;;  %v308_v37 = vld [vmem:[%s804_s18 + $0x30] sm:$0xff] }
  0x23   : > { %v339_v35 = vpack.c.bf16 %v313_v33, %v311_v32  ;;  %v307_v38 = vld [vmem:[%s804_s18 + $0x28] sm:$0xff]  ;;  %v309_v39 = vld [vmem:[%s804_s18 + $0x38] sm:$0xff]  ;;  %v336_v40 = vpack.c.bf16 %v308_v37, %v306_v36  ;;  %v302_v42 = vld [vmem:[%s804_s18] sm:$0xff] }
  0x24   : > { %v337_v41 = vpack.c.bf16 %v309_v39, %v307_v38  ;;  %v304_v43 = vld [vmem:[%s804_s18 + $0x10] sm:$0xff]  ;;  %v303_v44 = vld [vmem:[%s804_s18 + $0x8] sm:$0xff]  ;;  %v305_v45 = vld [vmem:[%s804_s18 + $0x18] sm:$0xff] }
  0x25   : > { %358 = vmatpush.bf16.msra.mxu0 %v344_v16  ;;  %568 = vmatpush.bf16.msra.mxu2 %v344_v16  ;;  %v296_v46 = vld [vmem:[%s880_s0] sm:$0xff]  ;;  %v334_v47 = vpack.c.bf16 %v304_v43, %v302_v42  ;;  %v297_v48 = vld [vmem:[%s880_s0 + $0x8] sm:$0xff]  ;;  %v298_v49 = vld [vmem:[%s880_s0 + $0x10] sm:$0xff]  ;;  %v335_v51 = vpack.c.bf16 %v305_v45, %v303_v44 }
  0x26   : > { %377 = vmatpush.bf16.msra.mxu1 %v345_v17  ;;  %576 = vmatpush.bf16.msra.mxu3 %v345_v17  ;;  %v299_v50 = vld [vmem:[%s880_s0 + $0x18] sm:$0xff]  ;;  %v300_v52 = vpack.c.bf16 %v297_v48, %v296_v46  ;;  %v350_v54 = vld [vmem:[%s278_s5] sm:$0x3] }
  0x27   : > { %v301_v53 = vpack.c.bf16 %v299_v50, %v298_v49  ;;  %v352_v55 = vperm.slane %v350_v54, 0  ;;  %v353_v56 = vperm.slane %v350_v54, 1 }
  0x29   : > { %359 = vmatpush.bf16.msra.mxu0 %v342_v22  ;;  %569 = vmatpush.bf16.msra.mxu2 %v342_v22 }
  0x2a   : > { %378 = vmatpush.bf16.msra.mxu1 %v343_v23  ;;  %577 = vmatpush.bf16.msra.mxu3 %v343_v23 }
  0x2d   : > { %360 = vmatpush.bf16.msra.mxu0 %v340_v28  ;;  %570 = vmatpush.bf16.msra.mxu2 %v340_v28 }
  0x2e   : > { %379 = vmatpush.bf16.msra.mxu1 %v341_v29  ;;  %578 = vmatpush.bf16.msra.mxu3 %v341_v29 }
  0x31   : > { %361 = vmatpush.bf16.msra.mxu0 %v338_v34  ;;  %571 = vmatpush.bf16.msra.mxu2 %v338_v34 }
  0x32   : > { %380 = vmatpush.bf16.msra.mxu1 %v339_v35  ;;  %579 = vmatpush.bf16.msra.mxu3 %v339_v35 }
  0x35   : > { %362 = vmatpush.bf16.msra.mxu0 %v336_v40  ;;  %572 = vmatpush.bf16.msra.mxu2 %v336_v40 }
  0x36   : > { %381 = vmatpush.bf16.msra.mxu1 %v337_v41  ;;  %580 = vmatpush.bf16.msra.mxu3 %v337_v41 }
  0x39   : > { %363 = vmatpush.bf16.msra.mxu0 %v334_v47  ;;  %573 = vmatpush.bf16.msra.mxu2 %v334_v47 }
  0x3a   : > { %382 = vmatpush.bf16.msra.mxu1 %v335_v51  ;;  %581 = vmatpush.bf16.msra.mxu3 %v335_v51 }
  0x3c   : > { %364 = vmatmul.bf16.vlgmr.msra.gmra.mxu0 %v300_v52  ;;  %369 = vmatmul.bf16.vlgmr.msra.gmra.mxu2 %v301_v53 }
  0x3d   : > { %383 = vmatmul.bf16.vlgmr.msra.gmra.mxu1 %v300_v52  ;;  %388 = vmatmul.bf16.vlgmr.msra.gmra.mxu3 %v301_v53 }
  0xb9   : > { %v365_v57 = vpop.f32.mrf.mxu0 }
  0xba   : > { %v366_v58 = vadd.f32 %v365_v57, %v352_v55  ;;  %v384_v59 = vpop.f32.mrf.mxu1 }
  0xbb   : > { %v385_v60 = vadd.f32 %v384_v59, %v353_v56 }
  0xbd   : > { %v394_v61 = vpack.c.bf16 %v385_v60, %v366_v58 }
  0xbf   : > { %398 = vst [vmem:[%s293_s9] sm:$0xff] %v394_v61  ;;  %v370_v62 = vpop.f32.mrf.mxu2 }
  0xc0   : > { %v371_v63 = vadd.f32 %v370_v62, %v352_v55  ;;  %v389_v0 = vpop.f32.mrf.mxu3 }
  0xc1   : > { %v390_v1 = vadd.f32 %v389_v0, %v353_v56  ;;  %v367_v2 = vpop.f32.mrf.mxu0 }
  0xc2   : > { %v368_v3 = vadd.f32 %v367_v2, %v352_v55  ;;  %v386_v4 = vpop.f32.mrf.mxu1 }
  0xc3   : > { %v396_v5 = vpack.c.bf16 %v390_v1, %v371_v63  ;;  %v387_v6 = vadd.f32 %v386_v4, %v353_v56 }
  0xc5   : > { %400 = vst [vmem:[%s293_s9 + $0x10] sm:$0xff] %v396_v5  ;;  %v395_v7 = vpack.c.bf16 %v387_v6, %v368_v3 }
  0xc7   : > { %399 = vst [vmem:[%s293_s9 + $0x8] sm:$0xff] %v395_v7  ;;  %v372_v8 = vpop.f32.mrf.mxu2 }
  0xc8   : > { %v373_v9 = vadd.f32 %v372_v8, %v352_v55  ;;  %v391_v10 = vpop.f32.mrf.mxu3 }
  0xc9   : > { %v392_v11 = vadd.f32 %v391_v10, %v353_v56 }
  0xcb   : > { %v397_v12 = vpack.c.bf16 %v392_v11, %v373_v9 }
  0xcd   : > { %401 = vst [vmem:[%s293_s9 + $0x18] sm:$0xff] %v397_v12 }
  0xce PF: > { %s16_s17 = sadd.s32 1, %s719_s17   ;;  %s886_s12 = smov %s703_s13 }
  0xcf   : > { %p13_p0 = scmp.ge.s32.totalorder %s16_s17, 4   ;;  %s887_s13 = smov %s707_s14 }
  0xd0   : > { %s888_s14 = smov %s792_s24  ;;  %s889_s15 = smov %s715_s16 }
  0xd1   : > { %s890_s16 = smov %s892_s19  ;;  %15 = sbr.rel (!%p13_p0) target bundleno = 4 (0x4), region = 78 }
  0xd6   :  { %443 = vsyncpa [#allocation3], 1 }
  0xd7   :  { %445 = vsyncpa [#allocation3 + $0x1], 1 }

// kernel: decoder_forward.13
= control target key start
LH: loop header
LB: loop body
LE: loop exit
PB: predicated region body
PF: predicated region fallthrough
CT: control target
= control target key end

     0   :  { %10 = vsyncpa [#allocation3], 0  ;;  %s317_s21 = smov [#allocation2]   ;;  %s318_s23 = smov 384   ;;  %s401_s0 = inlined_call_operand.vmem [shape: f32[16,128], index: 0, kind: input, shape index: {}]   ;;  %s402_s1 = inlined_call_operand.vmem [shape: f32[1,128], index: 1, kind: input, shape index: {}]   ;;  %s403_s2 = inlined_call_operand.vmem [shape: f32[1,128], index: 2, kind: input, shape index: {}]   ;;  %s404_s3 = inlined_call_operand.hbm [shape: f32[128,384], index: 3, kind: input, shape index: {}]   ;;  %s405_s4 = inlined_call_operand.vmem [shape: f32[1,384], index: 4, kind: input, shape index: {}]   ;;  %s406_s5 = inlined_call_operand.vmem [shape: bf16[16,384], index: 5, kind: output, shape index: {}]  }
   0x1   :  { %s21_s20 = sshll.u32 %s404_s3, 4  ;;  %s23_s22 = sshll.u32 %s317_s21, 4  ;;  %s22_s20 = int_to_ptr.hbm [resolvable:$true] %s21_s20  ;;  %s24_s22 = int_to_ptr.vmem [resolvable:$true] %s23_s22 }
   0x2   :  { %s319_s24 = smov 24  }
   0x3   :  { %29 = dma.hbm_to_vmem [thread:$0]  %s22_s20, 6144, %s24_s22, [#allocation3], %s318_s23, %s318_s23, %s319_s24  }
   0x4   :  { %315 = dma.done.wait [#allocation3], 6144  }
   0x5   :  { %316 = vsyncadd [#allocation3], 4294961152  ;;  %v36_v0 = vld [vmem:[%s401_s0] sm:$0xff]  ;;  %v37_v1 = vld [vmem:[%s401_s0 + $0x8] sm:$0xff]  ;;  %v320_v2 = vmov 128.0   ;;  %v321_v17 = vmov 127.0  }
   0x6   :  { %40 = vadd.xlane.f32.xlu0 %v36_v0  ;;  %279 = vrcp.f32 %v320_v2  ;;  %v179_v22 = vld [vmem:[#allocation2 + $0x150] sm:$0xff]  ;;  %v182_v23 = vld [vmem:[#allocation2 + $0x168] sm:$0xff]  ;;  %v180_v24 = vld [vmem:[#allocation2 + $0x158] sm:$0xff] }
   0x7   :  { %281 = vrcp.f32 %v321_v17  ;;  %v206_v25 = vpack.c.bf16 %v182_v23, %v179_v22  ;;  %v183_v26 = vld [vmem:[#allocation2 + $0x170] sm:$0xff]  ;;  %v181_v27 = vld [vmem:[#allocation2 + $0x160] sm:$0xff]  ;;  %v184_v28 = vld [vmem:[#allocation2 + $0x178] sm:$0xff] }
   0x8   :  { %v207_v29 = vpack.c.bf16 %v183_v26, %v180_v24  ;;  %v208_v30 = vpack.c.bf16 %v184_v28, %v181_v27  ;;  %v173_v32 = vld [vmem:[#allocation2 + $0x120] sm:$0xff]  ;;  %v176_v33 = vld [vmem:[#allocation2 + $0x138] sm:$0xff]  ;;  %v174_v34 = vld [vmem:[#allocation2 + $0x128] sm:$0xff] }
   0x9   :  { %217 = vmatpush.bf16.msra.mxu0 %v206_v25  ;;  %v203_v35 = vpack.c.bf16 %v176_v33, %v173_v32  ;;  %v177_v36 = vld [vmem:[#allocation2 + $0x140] sm:$0xff]  ;;  %v175_v37 = vld [vmem:[#allocation2 + $0x130] sm:$0xff]  ;;  %v178_v38 = vld [vmem:[#allocation2 + $0x148] sm:$0xff] }
   0xa   :  { %231 = vmatpush.bf16.msra.mxu1 %v207_v29  ;;  %245 = vmatpush.bf16.msra.mxu2 %v208_v30  ;;  %v204_v39 = vpack.c.bf16 %v177_v36, %v174_v34  ;;  %v205_v40 = vpack.c.bf16 %v178_v38, %v175_v37  ;;  %v167_v42 = vld [vmem:[#allocation2 + $0xf0] sm:$0xff]  ;;  %v170_v43 = vld [vmem:[#allocation2 + $0x108] sm:$0xff]  ;;  %v168_v44 = vld [vmem:[#allocation2 + $0xf8] sm:$0xff] }
   0xb   :  { %v200_v45 = vpack.c.bf16 %v170_v43, %v167_v42  ;;  %v171_v46 = vld [vmem:[#allocation2 + $0x110] sm:$0xff]  ;;  %v169_v47 = vld [vmem:[#allocation2 + $0x100] sm:$0xff]  ;;  %v172_v48 = vld [vmem:[#allocation2 + $0x118] sm:$0xff] }
   0xc   :  { %v280_v3 = vpop.eup %279  ;;  %v201_v50 = vpack.c.bf16 %v171_v46, %v168_v44  ;;  %v202_v51 = vpack.c.bf16 %v172_v48, %v169_v47  ;;  %v161_v52 = vld [vmem:[#allocation2 + $0xc0] sm:$0xff]  ;;  %v164_v53 = vld [vmem:[#allocation2 + $0xd8] sm:$0xff]  ;;  %v162_v54 = vld [vmem:[#allocation2 + $0xc8] sm:$0xff] }
   0xd   :  { %v45_v4 = vmul.f32 128.0, %v280_v3  ;;  %vm49_vm0 = vweird.f32 %v280_v3  ;;  %v282_v18 = vpop.eup %281  ;;  %218 = vmatpush.bf16.msra.mxu0 %v203_v35  ;;  %v165_v56 = vld [vmem:[#allocation2 + $0xe0] sm:$0xff]  ;;  %v163_v57 = vld [vmem:[#allocation2 + $0xd0] sm:$0xff]  ;;  %v166_v58 = vld [vmem:[#allocation2 + $0xe8] sm:$0xff]  ;;  %v197_v59 = vpack.c.bf16 %v164_v53, %v161_v52 }
   0xe   :  { %42 = vadd.xlane.f32.xlu0 %v37_v1  ;;  %v62_v19 = vmul.f32 127.0, %v282_v18  ;;  %vm66_vm1 = vweird.f32 %v282_v18  ;;  %232 = vmatpush.bf16.msra.mxu1 %v204_v39  ;;  %v198_v60 = vpack.c.bf16 %v165_v56, %v162_v54  ;;  %v199_v61 = vpack.c.bf16 %v166_v58, %v163_v57  ;;  %v155_v62 = vld [vmem:[#allocation2 + $0x90] sm:$0xff]  ;;  %v158_v63 = vld [vmem:[#allocation2 + $0xa8] sm:$0xff]  ;;  %v157_v2 = vld [vmem:[#allocation2 + $0xa0] sm:$0xff] }
   0xf   :  { %v46_v5 = vsub.f32 1.0, %v45_v4  ;;  %246 = vmatpush.bf16.msra.mxu2 %v205_v40  ;;  %v194_v4 = vpack.c.bf16 %v158_v63, %v155_v62  ;;  %v143_v22 = vld [vmem:[#allocation2 + $0x30] sm:$0xff]  ;;  %v146_v23 = vld [vmem:[#allocation2 + $0x48] sm:$0xff]  ;;  %v144_v24 = vld [vmem:[#allocation2 + $0x38] sm:$0xff] }
  0x10   :  { %v63_v20 = vsub.f32 1.0, %v62_v19  ;;  %v147_v26 = vld [vmem:[#allocation2 + $0x50] sm:$0xff]  ;;  %v145_v27 = vld [vmem:[#allocation2 + $0x40] sm:$0xff]  ;;  %v148_v28 = vld [vmem:[#allocation2 + $0x58] sm:$0xff]  ;;  %v188_v30 = vpack.c.bf16 %v146_v23, %v143_v22 }
  0x11   :  { %v47_v6 = vmul.f32 %v280_v3, %v46_v5  ;;  %219 = vmatpush.bf16.msra.mxu0 %v200_v45  ;;  %v190_v32 = vpack.c.bf16 %v148_v28, %v145_v27  ;;  %v137_v33 = vld [vmem:[#allocation2] sm:$0xff]  ;;  %v140_v34 = vld [vmem:[#allocation2 + $0x18] sm:$0xff]  ;;  %v138_v35 = vld [vmem:[#allocation2 + $0x8] sm:$0xff] }
  0x12   :  { %v64_v21 = vmul.f32 %v282_v18, %v63_v20  ;;  %233 = vmatpush.bf16.msra.mxu1 %v201_v50  ;;  %v141_v37 = vld [vmem:[#allocation2 + $0x20] sm:$0xff]  ;;  %v139_v38 = vld [vmem:[#allocation2 + $0x10] sm:$0xff]  ;;  %v142_v39 = vld [vmem:[#allocation2 + $0x28] sm:$0xff]  ;;  %v185_v43 = vpack.c.bf16 %v140_v34, %v137_v33 }
  0x13   :  { %v48_v7 = vadd.f32 %v280_v3, %v47_v6  ;;  %247 = vmatpush.bf16.msra.mxu2 %v202_v51  ;;  %v186_v44 = vpack.c.bf16 %v141_v37, %v138_v35  ;;  %v187_v45 = vpack.c.bf16 %v142_v39, %v139_v38 }
  0x14   :  { %v65_v31 = vadd.f32 %v282_v18, %v64_v21 }
  0x15   :  { %v50_v8 = vsel %vm49_vm0, %v280_v3, %v48_v7  ;;  %v160_v3 = vld [vmem:[#allocation2 + $0xb8] sm:$0xff]  ;;  %220 = vmatpush.bf16.msra.mxu0 %v197_v59  ;;  %v149_v7 = vld [vmem:[#allocation2 + $0x60] sm:$0xff] }
  0x16   :  { %v67_v41 = vsel %vm66_vm1, %v282_v18, %v65_v31  ;;  %234 = vmatpush.bf16.msra.mxu1 %v198_v60  ;;  %v196_v6 = vpack.c.bf16 %v160_v3, %v157_v2  ;;  %v189_v31 = vpack.c.bf16 %v147_v26, %v144_v24 }
  0x17   :  { %248 = vmatpush.bf16.msra.mxu2 %v199_v61 }
  0x19   :  { %221 = vmatpush.bf16.msra.mxu0 %v194_v4 }
  0x1b   :  { %249 = vmatpush.bf16.msra.mxu2 %v196_v6 }
  0x79   :  { %v41_v9 = vpop.xlane.xlu0 %40 }
  0x7a   :  { %v51_v10 = vmul.f32 %v50_v8, %v41_v9  ;;  %v150_v9 = vld [vmem:[#allocation2 + $0x68] sm:$0xff] }
  0x7c   :  { %v361_v11 = vsub.f32 %v36_v0, %v51_v10  ;;  %v156_v0 = vld [vmem:[#allocation2 + $0x98] sm:$0xff] }
  0x7e   :  { %v55_v12 = vmul.f32 %v361_v11, %v361_v11 }
  0x80   :  { %57 = vadd.xlane.f32.xlu1 %v55_v12  ;;  %v153_v12 = vld [vmem:[#allocation2 + $0x80] sm:$0xff] }
  0x81   :  { %v43_v13 = vpop.xlane.xlu0 %42  ;;  %v192_v20 = vpack.c.bf16 %v153_v12, %v150_v9 }
  0x82   :  { %v52_v14 = vmul.f32 %v50_v8, %v43_v13  ;;  %v152_v8 = vld [vmem:[#allocation2 + $0x78] sm:$0xff]  ;;  %v151_v13 = vld [vmem:[#allocation2 + $0x70] sm:$0xff] }
  0x83   :  { %v191_v19 = vpack.c.bf16 %v152_v8, %v149_v7 }
  0x84   :  { %v365_v15 = vsub.f32 %v37_v1, %v52_v14  ;;  %v159_v1 = vld [vmem:[#allocation2 + $0xb0] sm:$0xff]  ;;  %v154_v14 = vld [vmem:[#allocation2 + $0x88] sm:$0xff] }
  0x85   :  { %v195_v5 = vpack.c.bf16 %v159_v1, %v156_v0  ;;  %v193_v21 = vpack.c.bf16 %v154_v14, %v151_v13  ;;  %222 = vmatpush.bf16.msra.mxu0 %v191_v19 }
  0x86   :  { %v56_v16 = vmul.f32 %v365_v15, %v365_v15 }
  0x87   :  { %235 = vmatpush.bf16.msra.mxu1 %v195_v5  ;;  %250 = vmatpush.bf16.msra.mxu2 %v193_v21  ;;  %v277_v5 = vld [vmem:[%s402_s1] ss:$0 sm:$0xff] }
  0x88   :  { %59 = vadd.xlane.f32.xlu1 %v56_v16  ;;  %v97_v14 = vmul.f32 %v277_v5, %v361_v11  ;;  %v278_v21 = vld [vmem:[%s403_s2] ss:$0 sm:$0xff] }
  0x89   :  { %223 = vmatpush.bf16.msra.mxu0 %v188_v30  ;;  %v209_v11 = vld [vmem:[%s405_s4] sm:$0x7] }
  0x8a   :  { %v212_v27 = vperm.slane %v209_v11, 1  ;;  %v213_v33 = vperm.slane %v209_v11, 2 }
  0x8b   :  { %236 = vmatpush.bf16.msra.mxu1 %v192_v20  ;;  %251 = vmatpush.bf16.msra.mxu2 %v190_v32 }
  0x8d   :  { %224 = vmatpush.bf16.msra.mxu0 %v185_v43 }
  0x8f   :  { %237 = vmatpush.bf16.msra.mxu1 %v189_v31  ;;  %252 = vmatpush.bf16.msra.mxu2 %v187_v45 }
  0x93   :  { %238 = vmatpush.bf16.msra.mxu1 %v186_v44 }
  0xf3   :  { %v58_v49 = vpop.xlane.xlu1 %57 }
  0xf4   :  { %v369_v55 = vmul.f32 %v67_v41, %v58_v49 }
  0xf6   :  { %283 = vrsqrt.f32 %v369_v55  ;;  %vm77_vm2 = vcmp.eq.f32.partialorder %v369_v55, inf  ;;  %v80_v48 = vand.u32 2147483648, %v369_v55  ;;  %vm79_vm3 = vcmp.eq.f32.partialorder %v369_v55, 0.0 }
  0xfb   :  { %v60_v10 = vpop.xlane.xlu1 %59 }
  0xfc   :  { %v284_v16 = vpop.eup %283  ;;  %v69_v17 = vmul.f32 %v67_v41, %v60_v10 }
  0xfd   :  { %v71_v18 = vmul.f32 %v284_v16, %v369_v55 }
  0xfe   :  { %285 = vrsqrt.f32 %v69_v17  ;;  %vm89_vm4 = vcmp.eq.f32.partialorder %v69_v17, inf  ;;  %v92_v57 = vand.u32 2147483648, %v69_v17  ;;  %vm91_vm5 = vcmp.eq.f32.partialorder %v69_v17, 0.0 }
  0xff   :  { %v72_v25 = vmul.f32 %v284_v16, %v71_v18  ;;  %v98_v18 = vmul.f32 %v277_v5, %v365_v15  ;;  %v211_v15 = vperm.slane %v209_v11, 0 }
 0x101   :  { %v73_v29 = vmul.f32 0.5, %v72_v25 }
 0x103   :  { %v74_v36 = vsub.f32 1.5, %v73_v29 }
 0x104   :  { %v286_v40 = vpop.eup %285 }
 0x105   :  { %v75_v41 = vmul.f32 %v284_v16, %v74_v36  ;;  %v83_v42 = vmul.f32 %v286_v40, %v69_v17 }
 0x107   :  { %v76_v46 = vmul.f32 %v75_v41, %v369_v55  ;;  %v84_v47 = vmul.f32 %v286_v40, %v83_v42 }
 0x109   :  { %v78_v49 = vsel %vm77_vm2, %v369_v55, %v76_v46  ;;  %v85_v50 = vmul.f32 0.5, %v84_v47 }
 0x10a   :  { %v81_v51 = vsel %vm79_vm3, %v80_v48, %v78_v49 }
 0x10b   :  { %v86_v52 = vsub.f32 1.5, %v85_v50  ;;  %v99_v53 = vadd.f32 1e-06, %v81_v51 }
 0x10d   :  { %v87_v54 = vmul.f32 %v286_v40, %v86_v52  ;;  %287 = vrcp.f32 %v99_v53  ;;  %v112_v2 = vand.u32 2147483648, %v99_v53  ;;  %vm106_vm7 = vweird.f32 %v99_v53 }
 0x10e   :  { %v110_v3 = vand.u32 2147483647, %v99_v53 }
 0x10f   :  { %v88_v56 = vmul.f32 %v87_v54, %v69_v17  ;;  %v113_v8 = vor.u32 1.1754944e-38, %v112_v2 }
 0x110   :  { %vm111_vm9 = vcmp.eq.f32.partialorder %v110_v3, 8.507059e+37 }
 0x111   :  { %v90_v58 = vsel %vm89_vm4, %v69_v17, %v88_v56 }
 0x112   :  { %v93_v59 = vsel %vm91_vm5, %v92_v57, %v90_v58 }
 0x113   :  { %v288_v60 = vpop.eup %287  ;;  %v100_v61 = vadd.f32 1e-06, %v93_v59 }
 0x114   :  { %v102_v62 = vmul.f32 %v288_v60, %v99_v53  ;;  %vm107_vm6 = vweird.f32 %v288_v60 }
 0x115   :  { %289 = vrcp.f32 %v100_v61  ;;  %vm108_vm8 = vmor %vm106_vm7, %vm107_vm6  ;;  %v127_v9 = vand.u32 2147483648, %v100_v61  ;;  %v125_v12 = vand.u32 2147483647, %v100_v61  ;;  %vm121_vm11 = vweird.f32 %v100_v61 }
 0x116   :  { %v103_v55 = vsub.f32 1.0, %v102_v62 }
 0x117   :  { %v128_v17 = vor.u32 1.1754944e-38, %v127_v9  ;;  %vm126_vm13 = vcmp.eq.f32.partialorder %v125_v12, 8.507059e+37 }
 0x118   :  { %v104_v63 = vmul.f32 %v288_v60, %v103_v55 }
 0x11a   :  { %v105_v0 = vadd.f32 %v288_v60, %v104_v63 }
 0x11b   :  { %v290_v1 = vpop.eup %289 }
 0x11c   :  { %v117_v4 = vmul.f32 %v290_v1, %v100_v61  ;;  %v109_v6 = vsel %vm108_vm8, %v288_v60, %v105_v0  ;;  %vm122_vm10 = vweird.f32 %v290_v1 }
 0x11d   :  { %v114_v13 = vsel %vm111_vm9, %v113_v8, %v109_v6  ;;  %vm123_vm12 = vmor %vm121_vm11, %vm122_vm10 }
 0x11e   :  { %v118_v7 = vsub.f32 1.0, %v117_v4  ;;  %v115_v19 = vmul.f32 %v114_v13, %v97_v14 }
 0x120   :  { %v119_v10 = vmul.f32 %v290_v1, %v118_v7  ;;  %v134_v24 = vadd.f32 %v278_v21, %v115_v19 }
 0x122   :  { %v120_v16 = vadd.f32 %v290_v1, %v119_v10 }
 0x124   :  { %v124_v20 = vsel %vm123_vm12, %v290_v1, %v120_v16 }
 0x125   :  { %v129_v22 = vsel %vm126_vm13, %v128_v17, %v124_v20 }
 0x126   :  { %v130_v23 = vmul.f32 %v129_v22, %v98_v18 }
 0x128   :  { %v135_v25 = vadd.f32 %v278_v21, %v130_v23 }
 0x12a   :  { %v136_v26 = vpack.c.bf16 %v135_v25, %v134_v24 }
 0x12c   :  { %225 = vmatmul.bf16.vlgmr.msra.gmra.mxu0 %v136_v26  ;;  %239 = vmatmul.bf16.vlgmr.msra.gmra.mxu1 %v136_v26 }
 0x12d   :  { %253 = vmatmul.bf16.vlgmr.msra.gmra.mxu2 %v136_v26 }
 0x1a9   :  { %v226_v28 = vpop.f32.mrf.mxu0  ;;  %v240_v29 = vpop.f32.mrf.mxu1 }
 0x1aa   :  { %v227_v30 = vadd.f32 %v226_v28, %v211_v15  ;;  %v241_v31 = vadd.f32 %v240_v29, %v212_v27 }
 0x1ac   :  { %v259_v32 = vpack.c.bf16 %v241_v31, %v227_v30 }
 0x1ae   :  { %263 = vst [vmem:[%s406_s5] sm:$0xff] %v259_v32 }
 0x1b0   :  { %v254_v34 = vpop.f32.mrf.mxu2 }
 0x1b1   :  { %v255_v35 = vadd.f32 %v254_v34, %v213_v33  ;;  %v228_v36 = vpop.f32.mrf.mxu0  ;;  %v242_v37 = vpop.f32.mrf.mxu1 }
 0x1b2   :  { %v229_v38 = vadd.f32 %v228_v36, %v211_v15  ;;  %v243_v39 = vadd.f32 %v242_v37, %v212_v27 }
 0x1b3   :  { %v260_v40 = vpack.c.bf16 %v255_v35, %v255_v35 }
 0x1b4   :  { %v261_v41 = vpack.c.bf16 %v243_v39, %v229_v38 }
 0x1b5   :  { %264 = vst [vmem:[%s406_s5 + $0x8] sm:$0xf] %v260_v40 }
 0x1b6   :  { %265 = vst [vmem:[%s406_s5 + $0xc] sm:$0xff] %v261_v41 }
 0x1b8   :  { %v256_v42 = vpop.f32.mrf.mxu2 }
 0x1b9   :  { %v257_v43 = vadd.f32 %v256_v42, %v213_v33 }
 0x1bb   :  { %v262_v44 = vpack.c.bf16 %v257_v43, %v257_v43 }
 0x1bd   :  { %266 = vst [vmem:[%s406_s5 + $0x14] sm:$0xf] %v262_v44 }
 0x1be   :  { %271 = vsyncpa [#allocation3], 1 }

// kernel: decoder_forward.15
= control target key start
LH: loop header
LB: loop body
LE: loop exit
PB: predicated region body
PF: predicated region fallthrough
CT: control target
= control target key end

     0   :  { %10 = vsyncpa [#allocation3], 0  ;;  %s239_s21 = smov [#allocation2]   ;;  %s240_s23 = smov 128   ;;  %s305_s0 = inlined_call_operand.vmem [shape: f32[16,128], index: 0, kind: input, shape index: {}]   ;;  %s306_s1 = inlined_call_operand.vmem [shape: f32[1,128], index: 1, kind: input, shape index: {}]   ;;  %s307_s2 = inlined_call_operand.vmem [shape: f32[1,128], index: 2, kind: input, shape index: {}]   ;;  %s308_s3 = inlined_call_operand.hbm [shape: f32[128,128], index: 3, kind: input, shape index: {}]   ;;  %s309_s4 = inlined_call_operand.vmem [shape: f32[1,128], index: 4, kind: input, shape index: {}]   ;;  %s310_s5 = inlined_call_operand.vmem [shape: bf16[16,128], index: 5, kind: output, shape index: {}]  }
   0x1   :  { %s21_s20 = sshll.u32 %s308_s3, 4  ;;  %s23_s22 = sshll.u32 %s239_s21, 4  ;;  %s22_s20 = int_to_ptr.hbm [resolvable:$true] %s21_s20  ;;  %s24_s22 = int_to_ptr.vmem [resolvable:$true] %s23_s22 }
   0x2   :  { %s241_s24 = smov 8  }
   0x3   :  { %29 = dma.hbm_to_vmem [thread:$0]  %s22_s20, 2048, %s24_s22, [#allocation3], %s240_s23, %s240_s23, %s241_s24  }
   0x4   :  { %237 = dma.done.wait [#allocation3], 2048  }
   0x5   :  { %238 = vsyncadd [#allocation3], 4294965248  ;;  %v36_v0 = vld [vmem:[%s305_s0] sm:$0xff]  ;;  %v37_v1 = vld [vmem:[%s305_s0 + $0x8] sm:$0xff]  ;;  %v242_v2 = vmov 128.0   ;;  %v243_v17 = vmov 127.0  }
   0x6   :  { %40 = vadd.xlane.f32.xlu0 %v36_v0  ;;  %201 = vrcp.f32 %v242_v2  ;;  %v151_v22 = vld [vmem:[#allocation2 + $0x70] sm:$0xff]  ;;  %v152_v23 = vld [vmem:[#allocation2 + $0x78] sm:$0xff]  ;;  %v149_v26 = vld [vmem:[#allocation2 + $0x60] sm:$0xff] }
   0x7   :  { %203 = vrcp.f32 %v243_v17  ;;  %v160_v24 = vpack.c.bf16 %v152_v23, %v151_v22  ;;  %v150_v27 = vld [vmem:[#allocation2 + $0x68] sm:$0xff]  ;;  %v147_v29 = vld [vmem:[#allocation2 + $0x50] sm:$0xff]  ;;  %v148_v30 = vld [vmem:[#allocation2 + $0x58] sm:$0xff] }
   0x8   :  { %v159_v28 = vpack.c.bf16 %v150_v27, %v149_v26  ;;  %v158_v32 = vpack.c.bf16 %v148_v30, %v147_v29  ;;  %v145_v33 = vld [vmem:[#allocation2 + $0x40] sm:$0xff]  ;;  %v146_v34 = vld [vmem:[#allocation2 + $0x48] sm:$0xff]  ;;  %v143_v38 = vld [vmem:[#allocation2 + $0x30] sm:$0xff] }
   0x9   :  { %165 = vmatpush.bf16.msra.mxu0 %v160_v24  ;;  %v157_v37 = vpack.c.bf16 %v146_v34, %v145_v33  ;;  %v144_v39 = vld [vmem:[#allocation2 + $0x38] sm:$0xff]  ;;  %v141_v41 = vld [vmem:[#allocation2 + $0x20] sm:$0xff]  ;;  %v142_v42 = vld [vmem:[#allocation2 + $0x28] sm:$0xff] }
   0xa   :  { %v156_v40 = vpack.c.bf16 %v144_v39, %v143_v38  ;;  %v155_v47 = vpack.c.bf16 %v142_v42, %v141_v41  ;;  %v139_v48 = vld [vmem:[#allocation2 + $0x10] sm:$0xff]  ;;  %v140_v49 = vld [vmem:[#allocation2 + $0x18] sm:$0xff]  ;;  %v137_v53 = vld [vmem:[#allocation2] sm:$0xff] }
   0xb   :  { %v154_v52 = vpack.c.bf16 %v140_v49, %v139_v48  ;;  %v138_v54 = vld [vmem:[#allocation2 + $0x8] sm:$0xff]  ;;  %v200_v41 = vld [vmem:[%s309_s4] ss:$0 sm:$0xff] }
   0xc   :  { %v202_v3 = vpop.eup %201  ;;  %v153_v59 = vpack.c.bf16 %v138_v54, %v137_v53 }
   0xd   :  { %v45_v4 = vmul.f32 128.0, %v202_v3  ;;  %vm49_vm0 = vweird.f32 %v202_v3  ;;  %v204_v18 = vpop.eup %203  ;;  %166 = vmatpush.bf16.msra.mxu0 %v159_v28 }
   0xe   :  { %42 = vadd.xlane.f32.xlu0 %v37_v1  ;;  %v62_v19 = vmul.f32 127.0, %v204_v18  ;;  %vm66_vm1 = vweird.f32 %v204_v18 }
   0xf   :  { %v46_v5 = vsub.f32 1.0, %v45_v4 }
  0x10   :  { %v63_v20 = vsub.f32 1.0, %v62_v19 }
  0x11   :  { %v47_v6 = vmul.f32 %v202_v3, %v46_v5  ;;  %167 = vmatpush.bf16.msra.mxu0 %v158_v32 }
  0x12   :  { %v64_v21 = vmul.f32 %v204_v18, %v63_v20 }
  0x13   :  { %v48_v7 = vadd.f32 %v202_v3, %v47_v6 }
  0x14   :  { %v65_v25 = vadd.f32 %v204_v18, %v64_v21  ;;  %v198_v21 = vld [vmem:[%s306_s1] ss:$0 sm:$0xff] }
  0x15   :  { %v50_v8 = vsel %vm49_vm0, %v202_v3, %v48_v7  ;;  %168 = vmatpush.bf16.msra.mxu0 %v157_v37 }
  0x16   :  { %v67_v31 = vsel %vm66_vm1, %v204_v18, %v65_v25 }
  0x19   :  { %169 = vmatpush.bf16.msra.mxu0 %v156_v40 }
  0x1d   :  { %170 = vmatpush.bf16.msra.mxu0 %v155_v47 }
  0x21   :  { %171 = vmatpush.bf16.msra.mxu0 %v154_v52 }
  0x25   :  { %172 = vmatpush.bf16.msra.mxu0 %v153_v59 }
  0x79   :  { %v41_v9 = vpop.xlane.xlu0 %40 }
  0x7a   :  { %v51_v10 = vmul.f32 %v50_v8, %v41_v9 }
  0x7c   :  { %v283_v11 = vsub.f32 %v36_v0, %v51_v10 }
  0x7e   :  { %v55_v12 = vmul.f32 %v283_v11, %v283_v11  ;;  %v97_v29 = vmul.f32 %v198_v21, %v283_v11 }
  0x80   :  { %57 = vadd.xlane.f32.xlu1 %v55_v12 }
  0x81   :  { %v43_v13 = vpop.xlane.xlu0 %42 }
  0x82   :  { %v52_v14 = vmul.f32 %v50_v8, %v43_v13 }
  0x84   :  { %v287_v15 = vsub.f32 %v37_v1, %v52_v14 }
  0x86   :  { %v56_v16 = vmul.f32 %v287_v15, %v287_v15  ;;  %v98_v32 = vmul.f32 %v198_v21, %v287_v15 }
  0x88   :  { %59 = vadd.xlane.f32.xlu1 %v56_v16 }
  0xf3   :  { %v58_v35 = vpop.xlane.xlu1 %57 }
  0xf4   :  { %v68_v36 = vmul.f32 %v67_v31, %v58_v35  ;;  %v199_v35 = vld [vmem:[%s307_s2] ss:$0 sm:$0xff] }
  0xf6   :  { %205 = vrsqrt.f32 %v68_v36  ;;  %vm77_vm2 = vcmp.eq.f32.partialorder %v68_v36, inf  ;;  %v80_v62 = vand.u32 2147483648, %v68_v36  ;;  %vm79_vm3 = vcmp.eq.f32.partialorder %v68_v36, 0.0 }
  0xfb   :  { %v60_v43 = vpop.xlane.xlu1 %59 }
  0xfc   :  { %v206_v44 = vpop.eup %205  ;;  %v69_v45 = vmul.f32 %v67_v31, %v60_v43 }
  0xfd   :  { %v71_v46 = vmul.f32 %v206_v44, %v68_v36 }
  0xfe   :  { %207 = vrsqrt.f32 %v69_v45  ;;  %vm89_vm4 = vcmp.eq.f32.partialorder %v69_v45, inf  ;;  %v92_v6 = vand.u32 2147483648, %v69_v45  ;;  %vm91_vm5 = vcmp.eq.f32.partialorder %v69_v45, 0.0 }
  0xff   :  { %v72_v50 = vmul.f32 %v206_v44, %v71_v46 }
 0x101   :  { %v73_v51 = vmul.f32 0.5, %v72_v50 }
 0x103   :  { %v74_v55 = vsub.f32 1.5, %v73_v51 }
 0x104   :  { %v208_v56 = vpop.eup %207 }
 0x105   :  { %v75_v57 = vmul.f32 %v206_v44, %v74_v55  ;;  %v83_v58 = vmul.f32 %v208_v56, %v69_v45 }
 0x107   :  { %v76_v60 = vmul.f32 %v75_v57, %v68_v36  ;;  %v84_v61 = vmul.f32 %v208_v56, %v83_v58 }
 0x109   :  { %v85_v63 = vmul.f32 0.5, %v84_v61  ;;  %v78_v0 = vsel %vm77_vm2, %v68_v36, %v76_v60 }
 0x10a   :  { %v81_v1 = vsel %vm79_vm3, %v80_v62, %v78_v0 }
 0x10b   :  { %v86_v2 = vsub.f32 1.5, %v85_v63  ;;  %v99_v3 = vadd.f32 1e-06, %v81_v1 }
 0x10d   :  { %v87_v4 = vmul.f32 %v208_v56, %v86_v2  ;;  %209 = vrcp.f32 %v99_v3  ;;  %v112_v18 = vand.u32 2147483648, %v99_v3  ;;  %vm106_vm7 = vweird.f32 %v99_v3 }
 0x10e   :  { %v110_v19 = vand.u32 2147483647, %v99_v3 }
 0x10f   :  { %v88_v5 = vmul.f32 %v87_v4, %v69_v45  ;;  %v113_v24 = vor.u32 1.1754944e-38, %v112_v18 }
 0x110   :  { %vm111_vm9 = vcmp.eq.f32.partialorder %v110_v19, 8.507059e+37 }
 0x111   :  { %v90_v7 = vsel %vm89_vm4, %v69_v45, %v88_v5 }
 0x112   :  { %v93_v8 = vsel %vm91_vm5, %v92_v6, %v90_v7 }
 0x113   :  { %v210_v9 = vpop.eup %209  ;;  %v100_v10 = vadd.f32 1e-06, %v93_v8 }
 0x114   :  { %v102_v12 = vmul.f32 %v210_v9, %v99_v3  ;;  %vm107_vm6 = vweird.f32 %v210_v9 }
 0x115   :  { %211 = vrcp.f32 %v100_v10  ;;  %vm108_vm8 = vmor %vm106_vm7, %vm107_vm6  ;;  %v127_v25 = vand.u32 2147483648, %v100_v10  ;;  %v125_v27 = vand.u32 2147483647, %v100_v10  ;;  %vm121_vm11 = vweird.f32 %v100_v10 }
 0x116   :  { %v103_v13 = vsub.f32 1.0, %v102_v12 }
 0x117   :  { %v128_v31 = vor.u32 1.1754944e-38, %v127_v25  ;;  %vm126_vm13 = vcmp.eq.f32.partialorder %v125_v27, 8.507059e+37 }
 0x118   :  { %v104_v14 = vmul.f32 %v210_v9, %v103_v13 }
 0x11a   :  { %v105_v16 = vadd.f32 %v210_v9, %v104_v14 }
 0x11b   :  { %v212_v17 = vpop.eup %211 }
 0x11c   :  { %v117_v20 = vmul.f32 %v212_v17, %v100_v10  ;;  %v109_v22 = vsel %vm108_vm8, %v210_v9, %v105_v16  ;;  %vm122_vm10 = vweird.f32 %v212_v17 }
 0x11d   :  { %v114_v28 = vsel %vm111_vm9, %v113_v24, %v109_v22  ;;  %vm123_vm12 = vmor %vm121_vm11, %vm122_vm10 }
 0x11e   :  { %v118_v23 = vsub.f32 1.0, %v117_v20  ;;  %v115_v33 = vmul.f32 %v114_v28, %v97_v29 }
 0x120   :  { %v119_v26 = vmul.f32 %v212_v17, %v118_v23  ;;  %v134_v38 = vadd.f32 %v199_v35, %v115_v33 }
 0x122   :  { %v120_v30 = vadd.f32 %v212_v17, %v119_v26 }
 0x124   :  { %v124_v34 = vsel %vm123_vm12, %v212_v17, %v120_v30 }
 0x125   :  { %v129_v36 = vsel %vm126_vm13, %v128_v31, %v124_v34 }
 0x126   :  { %v130_v37 = vmul.f32 %v129_v36, %v98_v32 }
 0x128   :  { %v135_v39 = vadd.f32 %v199_v35, %v130_v37 }
 0x12a   :  { %v136_v40 = vpack.c.bf16 %v135_v39, %v134_v38 }
 0x12c   :  { %173 = vmatmul.bf16.vlgmr.msra.gmra.mxu0 %v136_v40 }
 0x1a9   :  { %v174_v11 = vpop.f32.mrf.mxu0 }
 0x1aa   :  { %v175_v15 = vadd.f32 %v200_v41, %v174_v11 }
 0x1b1   :  { %v176_v42 = vpop.f32.mrf.mxu0 }
 0x1b2   :  { %v177_v43 = vadd.f32 %v200_v41, %v176_v42 }
 0x1b4   :  { %v191_v44 = vpack.c.bf16 %v177_v43, %v175_v15 }
 0x1b6   :  { %192 = vst [vmem:[%s310_s5] sm:$0xff] %v191_v44  }
 0x1b7   :  { %187 = vsyncpa [#allocation3], 1 }

// kernel: decoder_forward.14
= control target key start
LH: loop header
LB: loop body
LE: loop exit
PB: predicated region body
PF: predicated region fallthrough
CT: control target
= control target key end

     0   :  { %10 = vsyncpa [#allocation3], 0  ;;  %s1009_s18 = smov 0   ;;  %s1011_s19 = smov 0   ;;  %s1124_s0 = inlined_call_operand.vmem [shape: bf16[2,8,384], index: 0, kind: input, shape index: {}]   ;;  %s1125_s1 = inlined_call_operand.vmem [shape: s32[2,1,8], index: 1, kind: input, shape index: {}]   ;;  %s1126_s2 = inlined_call_operand.hbm [shape: f32[128,128], index: 2, kind: input, shape index: {}]   ;;  %s1127_s3 = inlined_call_operand.vmem [shape: f32[1,128], index: 3, kind: input, shape index: {}]   ;;  %s1128_s4 = inlined_call_operand.vmem [shape: f32[2,8,128], index: 4, kind: input, shape index: {}]   ;;  %s1129_s5 = inlined_call_operand.vmem [shape: f32[2,8,128], index: 5, kind: output, shape index: {}]  }
   0x1   :  { %s1013_s20 = smov 0  }
   0x2 LB: > { %s829_s21 = sadd.s32 4294967295, %s969_s20   ;;  %s28_s22 = sadd.s32 1, %s965_s19  ;;  %s969_s20 = sphi %s1013_s20, %s16_s20   ;;  %s965_s19 = sphi %s1011_s19, %s1131_s19   ;;  %s961_s18 = sphi %s1009_s18, %s1130_s18  }
   0x3   : > { %p30_p0 = scmp.ge.s32.totalorder %s28_s22, 2  ;;  %p831_p1 = scmp.ge.s32.totalorder %s969_s20, 1 }
   0x4   : > { %p183_p2 = scmp.lt.s32.totalorder %s969_s20, 3  ;;  %p862_p4 = scmp.eq.s32.totalorder %s829_s21, 0 }
   0x5   : > { %s1133_s22 = smov (%p30_p0, %s28_s22), 0  ;;  %s194_s25 = sshll.u32 %s1126_s2, 4  ;;  %s195_s25 = int_to_ptr.hbm [resolvable:$true] %s194_s25 }
   0x6   : > { %p184_p3 = pnand %p831_p1, %p183_p2  ;;  %s971_s26 = smov [#allocation2]  }
   0x7   : > { %s196_s27 = sshll.u32 %s971_s26, 4  ;;  %s972_s28 = smov 128   ;;  %s197_s27 = int_to_ptr.vmem [resolvable:$true] %s196_s27 }
   0x8   : > { %p858_p5 = pneg %p184_p3  ;;  %s973_s29 = smov 8  }
   0x9   : > { %239 = sbr.rel (%p184_p3) target bundleno = 1253 (0x4e5), region = 40 }
   0xa   : > { %p859_p6 = pnand %p862_p4, %p858_p5 }
   0xc   : > { %861 = dma.hbm_to_vmem [thread:$0]  (!%p859_p6), %s195_s25, 2048, %s197_s27, [#allocation3], %s972_s28, %s972_s28, %s973_s29  }
   0xe   : > { %956 = dma.done.wait (%p862_p4), [#allocation3], 2048  }
   0xf   : > { %958 = vsyncadd (%p862_p4), [#allocation3], 4294965248  ;;  %p280_p7 = scmp.lt.s32.totalorder %s961_s18, 1  ;;  %vm327_vm0 = vcmask 261120   ;;  %s974_s9 = smov 96   ;;  %v307_v8 = vlaneseq  ;;  %v975_v13 = vmov 0.0  }
  0x10   : > { %v976_v17 = vmov -1e+09   ;;  %vm349_vm3 = vcmask 64512   ;;  %s977_s13 = smov 32   ;;  %vm378_vm4 = vcmask 1043456   ;;  %s978_s14 = smov 64  }
  0x11   : > { %s1135_s18 = smov (!%p280_p7, %s961_s18), 1  ;;  %v308_v11 = vshrl.u32 %v307_v8, 7  ;;  %v312_v12 = vand.u32 127, %v307_v8  ;;  %v398_v59 = vld [vmem:[#allocation2 + $0x10] sm:$0xff]  ;;  %v399_v60 = vld [vmem:[#allocation2 + $0x18] sm:$0xff]  ;;  %v396_v62 = vld [vmem:[#allocation2] sm:$0xff] }
  0x12   : > { %s853_s30 = smul.u32 12, %s1135_s18  ;;  %s287_s12 = scalar_lea.vmem %s1125_s1, %s1135_s18  ;;  %v401_v61 = vpack.c.bf16 %v399_v60, %v398_v59  ;;  %v397_v63 = vld [vmem:[#allocation2 + $0x8] sm:$0xff] }
  0x13   : > { %v304_v10 = vld [vmem:[%s287_s12] sm:$0x1]  ;;  %vm313_vm2 = vcmp.ge.s32.totalorder %v308_v11, %v312_v12  ;;  %s837_s15 = sshll.u32 %s1135_s18, 3 }
  0x14   : > { %s1037_s8 = scalar_lea.vmem %s1124_s0, %s853_s30  ;;  %vm305_vm1 = vcmp.eq.s32.totalorder %v304_v10, 0  ;;  %v314_v18 = vsel %vm313_vm2, 0.0, %v976_v17  ;;  %s294_s21 = scalar_lea.vmem %s1128_s4, %s837_s15 }
  0x15   : > { %v325_v0 = vld [vmem:[%s1037_s8 + $0x4] sm:$0xf]  ;;  %v324_v3 = vld [vmem:[%s1037_s8] sm:$0xf]  ;;  %v306_v14 = vsel %vm305_vm1, -1e+09, %v975_v13  ;;  %s301_s18 = scalar_lea.vmem %s1129_s5, %s837_s15 }
  0x16   : > { %v332_v1 = vsel %vm327_vm0, %v325_v0, 0  ;;  %v408_v2 = vunpack.c.l.b16 %v325_v0  ;;  %v403_v5 = vunpack.c.l.b16 %v324_v3  ;;  %v316_v16 = vperm.slane %v306_v14, 0  ;;  %v326_v35 = vld [vmem:[%s1037_s8 + $0x8] sm:$0xf] }
  0x17   : > { %341 = vmatpush.bf16.xpose.msra.mxu0 %v332_v1  ;;  %v459_v36 = vunpack.c.l.b16 %v326_v35  ;;  %v380_v38 = vsel %vm378_vm4, %v326_v35, 0  ;;  %v400_v0 = vpack.c.bf16 %v397_v63, %v396_v62 }
  0x18   : > { %v1042_v4 = vpack.c.b16 %v408_v2, %v408_v2  ;;  %v404_v6 = vpack.c.b16 %v403_v5, %v403_v5  ;;  %v1054_v19 = vadd.f32 %v316_v16, %v314_v18  ;;  %389 = vmatpush.bf16.msra.mxu1 %v380_v38 }
  0x19   : > { %v1064_v37 = vpack.c.b16 %v459_v36, %v459_v36 }
  0x1a   : > { %410 = vrot.lane.b32.xlu0 %v1042_v4, %s974_s9 }
  0x1e   : > { %839 = vmatmul.msk.bf16.vlgmr.msra.gmra.mxu0 %vm327_vm0, %v324_v3 }
  0x22   : > { %405 = vrot.lane.b32.xlu0 %v404_v6, %s974_s9 }
  0x2a   : > { %461 = vrot.lane.b32.xlu0 %v1064_v37, %s974_s9 }
  0x32   : > { %616 = vrot.lane.b32.xlu0 %v404_v6, %s977_s13 }
  0x3a   : > { %521 = vrot.lane.b32.xlu0 %v404_v6, %s978_s14 }
  0x8c   : > { %v411_v7 = vpop.permute.xlu0 %410 }
  0x8d   : > { %v416_v9 = vsel %vm327_vm0, %v411_v7, 0 }
  0x8e   : > { %425 = vmatpush.bf16.xpose.msra.mxu2 %v416_v9 }
  0x94   : > { %v406_v15 = vpop.permute.xlu0 %405 }
  0x95   : > { %841 = vmatmul.msk.bf16.vlgmr.msra.gmra.mxu2 %vm327_vm0, %v406_v15 }
  0x9b   : > { %v343_v20 = vpop.f32.mrf.mxu0 }
  0x9c   : > { %v347_v21 = vmul.f32 0.17677669, %v343_v20  ;;  %v462_v57 = vpop.permute.xlu0 %461 }
  0x9d   : > { %v467_v58 = vsel %vm378_vm4, %v462_v57, 0 }
  0x9e   : > { %v348_v22 = vadd.f32 %v347_v21, %v1054_v19  ;;  %476 = vmatpush.bf16.msra.mxu3 %v467_v58 }
  0xa0   : > { %v350_v23 = vsel %vm349_vm3, %v348_v22, -inf }
  0xa1   : > { %351 = vmax.xlane.f32.xlu1 %v350_v23 }
  0xa2   : > { %514 = vmatpush.bf16.msrb.mxu3 %v401_v61 }
  0xa3   : > { %v345_v24 = vpop.f32.mrf.mxu0 }
  0xa4   : > { %v617_v2 = vpop.permute.xlu0 %616  ;;  %v485_v24 = vld [vmem:[#allocation2 + $0x30] sm:$0xff] }
  0xa6   : > { %515 = vmatpush.bf16.msrb.mxu3 %v400_v0 }
  0xac   : > { %v522_v11 = vpop.permute.xlu0 %521 }
 0x114   : > { %v352_v25 = vpop.xlane.xlu1 %351 }
 0x115   : > { %v353_v26 = vsub.f32 %v348_v22, %v352_v25  ;;  %v486_v25 = vld [vmem:[#allocation2 + $0x38] sm:$0xff] }
 0x117   : > { %v354_v27 = vmul.f32 1.442695, %v353_v26  ;;  %v488_v26 = vpack.c.bf16 %v486_v25, %v485_v24 }
 0x118   : > { %v427_v28 = vpop.f32.mrf.mxu2 }
 0x119   : > { %897 = vpow2.f32 %v354_v27  ;;  %v431_v29 = vmul.f32 0.17677669, %v427_v28  ;;  %498 = vmatpush.bf16.msrb.mxu1 %v488_v26  ;;  %v483_v27 = vld [vmem:[#allocation2 + $0x20] sm:$0xff]  ;;  %v484_v28 = vld [vmem:[#allocation2 + $0x28] sm:$0xff] }
 0x11a   : > { %v593_v26 = vld [vmem:[#allocation2 + $0x40] sm:$0xff] }
 0x11b   : > { %v432_v30 = vadd.f32 %v431_v29, %v1054_v19  ;;  %v487_v29 = vpack.c.bf16 %v484_v28, %v483_v27  ;;  %v594_v27 = vld [vmem:[#allocation2 + $0x48] sm:$0xff] }
 0x11c   : > { %v597_v28 = vpack.c.bf16 %v594_v27, %v593_v26 }
 0x11d   : > { %v433_v31 = vsel %vm349_vm3, %v432_v30, -inf  ;;  %499 = vmatpush.bf16.msrb.mxu1 %v487_v29  ;;  %v690_v29 = vld [vmem:[#allocation2 + $0x70] sm:$0xff] }
 0x11e   : > { %434 = vmax.xlane.f32.xlu2 %v433_v31 }
 0x11f   : > { %v898_v32 = vpop.eup %897 }
 0x120   : > { %v429_v33 = vpop.f32.mrf.mxu2  ;;  %v356_v34 = vsel %vm349_vm3, %v898_v32, 0.0 }
 0x121   : > { %357 = vadd.xlane.f32.xlu1 %v356_v34 }
 0x13a   : > { %618 = vrot.lane.b32.xlu1 %v1042_v4, %s977_s13 }
 0x191   : > { %v435_v39 = vpop.xlane.xlu2 %434 }
 0x192   : > { %v436_v40 = vsub.f32 %v432_v30, %v435_v39 }
 0x194   : > { %v437_v41 = vmul.f32 1.442695, %v436_v40  ;;  %v358_v42 = vpop.xlane.xlu1 %357 }
 0x195   : > { %899 = vrcp.f32 %v358_v42  ;;  %v370_v48 = vand.u32 2147483648, %v358_v42  ;;  %v368_v50 = vand.u32 2147483647, %v358_v42  ;;  %vm364_vm6 = vweird.f32 %v358_v42 }
 0x196   : > { %901 = vpow2.f32 %v437_v41 }
 0x197   : > { %v371_v52 = vor.u32 1.1754944e-38, %v370_v48  ;;  %vm369_vm8 = vcmp.eq.f32.partialorder %v368_v50, 8.507059e+37 }
 0x19b   : > { %v900_v43 = vpop.eup %899 }
 0x19c   : > { %v902_v44 = vpop.eup %901  ;;  %v360_v45 = vmul.f32 %v900_v43, %v358_v42  ;;  %vm365_vm5 = vweird.f32 %v900_v43 }
 0x19d   : > { %v439_v46 = vsel %vm349_vm3, %v902_v44, 0.0  ;;  %vm366_vm7 = vmor %vm364_vm6, %vm365_vm5 }
 0x19e   : > { %v361_v47 = vsub.f32 1.0, %v360_v45  ;;  %440 = vadd.xlane.f32.xlu2 %v439_v46 }
 0x1a0   : > { %v362_v49 = vmul.f32 %v900_v43, %v361_v47 }
 0x1a2   : > { %v363_v51 = vadd.f32 %v900_v43, %v362_v49 }
 0x1a4   : > { %v367_v53 = vsel %vm366_vm7, %v900_v43, %v363_v51 }
 0x1a5   : > { %v372_v54 = vsel %vm369_vm8, %v371_v52, %v367_v53 }
 0x1a6   : > { %v373_v55 = vmul.f32 %v898_v32, %v372_v54 }
 0x1a8   : > { %v374_v56 = vpack.c.bf16 %v373_v55, %v373_v55 }
 0x1aa   : > { %840 = vmatmul.msk.bf16.vlgmr.msra.gmra.mxu1 %vm349_vm3, %v374_v56 }
 0x1ac   : > { %v619_v16 = vpop.permute.xlu1 %618 }
 0x1ad   : > { %v624_v20 = vsel %vm327_vm0, %v619_v16, 0 }
 0x1b6   : > { %523 = vrot.lane.b32.xlu2 %v1042_v4, %s978_s14 }
 0x211   : > { %v441_v1 = vpop.xlane.xlu2 %440 }
 0x212   : > { %903 = vrcp.f32 %v441_v1  ;;  %v453_v8 = vand.u32 2147483648, %v441_v1  ;;  %v451_v10 = vand.u32 2147483647, %v441_v1  ;;  %vm447_vm10 = vweird.f32 %v441_v1 }
 0x214   : > { %v454_v13 = vor.u32 1.1754944e-38, %v453_v8  ;;  %vm452_vm12 = vcmp.eq.f32.partialorder %v451_v10, 8.507059e+37  ;;  %v596_v10 = vld [vmem:[#allocation2 + $0x58] sm:$0xff] }
 0x218   : > { %v904_v3 = vpop.eup %903 }
 0x219   : > { %v443_v5 = vmul.f32 %v904_v3, %v441_v1  ;;  %v524_v6 = vpop.permute.xlu2 %523  ;;  %vm448_vm9 = vweird.f32 %v904_v3 }
 0x21a   : > { %v529_v4 = vsel %vm327_vm0, %v524_v6, 0  ;;  %vm449_vm11 = vmor %vm447_vm10, %vm448_vm9 }
 0x21b   : > { %v444_v7 = vsub.f32 1.0, %v443_v5  ;;  %538 = vmatpush.bf16.xpose.msrb.mxu0 %v529_v4 }
 0x21d   : > { %v445_v9 = vmul.f32 %v904_v3, %v444_v7 }
 0x21f   : > { %v446_v12 = vadd.f32 %v904_v3, %v445_v9  ;;  %v595_v9 = vld [vmem:[#allocation2 + $0x50] sm:$0xff] }
 0x221   : > { %v450_v14 = vsel %vm449_vm11, %v904_v3, %v446_v12 }
 0x222   : > { %845 = vmatmul.msk.bf16.vlgmr.msrb.gmra.mxu0 %vm327_vm0, %v522_v11  ;;  %v455_v15 = vsel %vm452_vm12, %v454_v13, %v450_v14  ;;  %v598_v11 = vpack.c.bf16 %v596_v10, %v595_v9 }
 0x223   : > { %v456_v17 = vmul.f32 %v902_v44, %v455_v15 }
 0x224   : > { %608 = vmatpush.bf16.msra.mxu1 %v598_v11 }
 0x225   : > { %v457_v18 = vpack.c.bf16 %v456_v17, %v456_v17 }
 0x227   : > { %v391_v21 = vpop.f32.mrf.mxu1  ;;  %842 = vmatmul.msk.bf16.vlgmr.msra.gmra.mxu3 %vm349_vm3, %v457_v18 }
 0x228   : > { %633 = vmatpush.bf16.xpose.msra.mxu3 %v624_v20  ;;  %v395_v23 = vpack.c.bf16 %v391_v21, %v391_v21  ;;  %609 = vmatpush.bf16.msra.mxu1 %v597_v28 }
 0x22f   : > { %v393_v22 = vpop.f32.mrf.mxu1 }
 0x237   : > { %844 = vmatmul.msk.bf16.vlgmr.msrb.gmra.mxu3 %vm327_vm0, %v395_v23 }
 0x247   : > { %848 = vmatmul.msk.bf16.vlgmr.msra.gmra.mxu3 %vm327_vm0, %v617_v2 }
 0x29f   : > { %v540_v30 = vpop.f32.mrf.mxu0 }
 0x2a0   : > { %v544_v31 = vmul.f32 0.17677669, %v540_v30  ;;  %v691_v30 = vld [vmem:[#allocation2 + $0x78] sm:$0xff] }
 0x2a2   : > { %v545_v32 = vadd.f32 %v544_v31, %v1054_v19  ;;  %v688_v31 = vld [vmem:[#allocation2 + $0x60] sm:$0xff] }
 0x2a4   : > { %v546_v33 = vsel %vm349_vm3, %v545_v32, -inf }
 0x2a5   : > { %547 = vmax.xlane.f32.xlu0 %v546_v33  ;;  %v689_v33 = vld [vmem:[#allocation2 + $0x68] sm:$0xff] }
 0x2a7   : > { %v542_v34 = vpop.f32.mrf.mxu0 }
 0x2a8   : > { %v692_v34 = vpack.c.bf16 %v689_v33, %v688_v31 }
 0x2aa   : > { %v478_v35 = vpop.f32.mrf.mxu3 }
 0x2ab   : > { %v482_v36 = vpack.c.bf16 %v478_v35, %v478_v35 }
 0x2ad   : > { %843 = vmatmul.msk.bf16.vlgmr.msrb.gmra.mxu1 %vm327_vm0, %v482_v36 }
 0x2b2   : > { %v480_v38 = vpop.f32.mrf.mxu3 }
 0x2b9   : > { %571 = vrot.lane.b32.xlu0 %v1064_v37, %s978_s14 }
 0x2ba   : > { %v1087_v39 = vpop.f32.mrf.mxu3 }
 0x2c2   : > { %v519_v40 = vpop.f32.mrf.mxu3 }
 0x2ca   : > { %v635_v41 = vpop.f32.mrf.mxu3 }
 0x2cb   : > { %v639_v42 = vmul.f32 0.17677669, %v635_v41 }
 0x2cd   : > { %v640_v43 = vadd.f32 %v639_v42, %v1054_v19 }
 0x2cf   : > { %v641_v44 = vsel %vm349_vm3, %v640_v43, -inf }
 0x2d0   : > { %642 = vmax.xlane.f32.xlu2 %v641_v44 }
 0x2d2   : > { %v637_v45 = vpop.f32.mrf.mxu3 }
 0x318   : > { %v548_v46 = vpop.xlane.xlu0 %547 }
 0x319   : > { %v549_v47 = vsub.f32 %v545_v32, %v548_v46  ;;  %v693_v32 = vpack.c.bf16 %v691_v30, %v690_v29 }
 0x31b   : > { %v550_v48 = vmul.f32 1.442695, %v549_v47 }
 0x31d   : > { %905 = vpow2.f32 %v550_v48  ;;  %v711_v48 = vld [vmem:[%s294_s21] sm:$0xff] }
 0x323   : > { %v906_v49 = vpop.eup %905 }
 0x324   : > { %v552_v50 = vsel %vm349_vm3, %v906_v49, 0.0 }
 0x325   : > { %553 = vadd.xlane.f32.xlu1 %v552_v50  ;;  %v896_v50 = vld [vmem:[%s1127_s3] ss:$0 sm:$0xff] }
 0x32a   : > { %v1092_v51 = vpop.f32.mrf.mxu1 }
 0x32b   : > { %v572_v57 = vpop.permute.xlu0 %571  ;;  %v518_v45 = vadd.f32 %v1087_v39, %v1092_v51 }
 0x32c   : > { %v577_v58 = vsel %vm378_vm4, %v572_v57, 0 }
 0x32d   : > { %586 = vmatpush.bf16.msrb.mxu2 %v577_v58 }
 0x331   : > { %703 = vmatpush.bf16.msra.mxu2 %v693_v32 }
 0x332   : > { %v503_v52 = vpop.f32.mrf.mxu1 }
 0x335   : > { %704 = vmatpush.bf16.msra.mxu2 %v692_v34 }
 0x33e   : > { %666 = vrot.lane.b32.xlu1 %v1064_v37, %s977_s13 }
 0x343   : > { %v643_v53 = vpop.xlane.xlu2 %642 }
 0x344   : > { %v644_v19 = vsub.f32 %v640_v43, %v643_v53 }
 0x346   : > { %v645_v54 = vmul.f32 1.442695, %v644_v19 }
 0x348   : > { %907 = vpow2.f32 %v645_v54 }
 0x34e   : > { %v908_v55 = vpop.eup %907 }
 0x34f   : > { %v647_v56 = vsel %vm349_vm3, %v908_v55, 0.0 }
 0x350   : > { %648 = vadd.xlane.f32.xlu2 %v647_v56 }
 0x398   : > { %v554_v59 = vpop.xlane.xlu1 %553 }
 0x399   : > { %909 = vrcp.f32 %v554_v59  ;;  %v566_v63 = vand.u32 2147483648, %v554_v59  ;;  %v564_v37 = vand.u32 2147483647, %v554_v59  ;;  %vm560_vm14 = vweird.f32 %v554_v59 }
 0x39b   : > { %v567_v2 = vor.u32 1.1754944e-38, %v566_v63  ;;  %vm565_vm1 = vcmp.eq.f32.partialorder %v564_v37, 8.507059e+37 }
 0x39f   : > { %v910_v60 = vpop.eup %909 }
 0x3a0   : > { %v556_v61 = vmul.f32 %v910_v60, %v554_v59  ;;  %vm561_vm13 = vweird.f32 %v910_v60 }
 0x3a1   : > { %vm562_vm15 = vmor %vm560_vm14, %vm561_vm13 }
 0x3a2   : > { %v557_v62 = vsub.f32 1.0, %v556_v61 }
 0x3a4   : > { %v558_v0 = vmul.f32 %v910_v60, %v557_v62 }
 0x3a6   : > { %v559_v1 = vadd.f32 %v910_v60, %v558_v0 }
 0x3a8   : > { %v563_v3 = vsel %vm562_vm15, %v910_v60, %v559_v1 }
 0x3a9   : > { %v568_v5 = vsel %vm565_vm1, %v567_v2, %v563_v3 }
 0x3aa   : > { %v569_v6 = vmul.f32 %v906_v49, %v568_v5 }
 0x3ac   : > { %v570_v4 = vpack.c.bf16 %v569_v6, %v569_v6 }
 0x3ae   : > { %846 = vmatmul.msk.bf16.vlgmr.msrb.gmra.mxu2 %vm349_vm3, %v570_v4 }
 0x3b0   : > { %v667_v7 = vpop.permute.xlu1 %666 }
 0x3b1   : > { %v672_v8 = vsel %vm378_vm4, %v667_v7, 0 }
 0x3b2   : > { %681 = vmatpush.bf16.msra.mxu0 %v672_v8 }
 0x3c3   : > { %v649_v12 = vpop.xlane.xlu2 %648 }
 0x3c4   : > { %911 = vrcp.f32 %v649_v12  ;;  %v661_v16 = vand.u32 2147483648, %v649_v12  ;;  %v659_v18 = vand.u32 2147483647, %v649_v12  ;;  %vm655_vm5 = vweird.f32 %v649_v12 }
 0x3c6   : > { %v662_v21 = vor.u32 1.1754944e-38, %v661_v16  ;;  %vm660_vm4 = vcmp.eq.f32.partialorder %v659_v18, 8.507059e+37 }
 0x3ca   : > { %v912_v13 = vpop.eup %911 }
 0x3cb   : > { %v651_v14 = vmul.f32 %v912_v13, %v649_v12  ;;  %vm656_vm2 = vweird.f32 %v912_v13 }
 0x3cc   : > { %vm657_vm6 = vmor %vm655_vm5, %vm656_vm2 }
 0x3cd   : > { %v652_v15 = vsub.f32 1.0, %v651_v14 }
 0x3cf   : > { %v653_v17 = vmul.f32 %v912_v13, %v652_v15 }
 0x3d1   : > { %v654_v20 = vadd.f32 %v912_v13, %v653_v17 }
 0x3d3   : > { %v658_v22 = vsel %vm657_vm6, %v912_v13, %v654_v20 }
 0x3d4   : > { %v663_v23 = vsel %vm660_vm4, %v662_v21, %v658_v22 }
 0x3d5   : > { %v664_v24 = vmul.f32 %v908_v55, %v663_v23 }
 0x3d7   : > { %v665_v25 = vpack.c.bf16 %v664_v24, %v664_v24 }
 0x3d9   : > { %849 = vmatmul.msk.bf16.vlgmr.msra.gmra.mxu0 %vm349_vm3, %v665_v25 }
 0x431   : > { %v588_v35 = vpop.f32.mrf.mxu2 }
 0x432   : > { %v592_v36 = vpack.c.bf16 %v588_v35, %v588_v35 }
 0x434   : > { %847 = vmatmul.msk.bf16.vlgmr.msra.gmra.mxu1 %vm327_vm0, %v592_v36 }
 0x439   : > { %v590_v38 = vpop.f32.mrf.mxu2 }
 0x456   : > { %v683_v40 = vpop.f32.mrf.mxu0 }
 0x457   : > { %v687_v41 = vpack.c.bf16 %v683_v40, %v683_v40 }
 0x459   : > { %850 = vmatmul.msk.bf16.vlgmr.msra.gmra.mxu2 %vm327_vm0, %v687_v41 }
 0x45e   : > { %v685_v42 = vpop.f32.mrf.mxu0 }
 0x4b1   : > { %v611_v43 = vpop.f32.mrf.mxu1 }
 0x4b2   : > { %v615_v46 = vadd.f32 %v611_v43, %v518_v45 }
 0x4b9   : > { %v613_v44 = vpop.f32.mrf.mxu1 }
 0x4dc   : > { %v706_v47 = vpop.f32.mrf.mxu2 }
 0x4dd   : > { %v710_v49 = vadd.f32 %v706_v47, %v615_v46 }
 0x4df   : > { %v712_v52 = vadd.f32 %v711_v48, %v710_v49 }
 0x4e1   : > { %v717_v53 = vadd.f32 %v896_v50, %v712_v52 }
 0x4e3   : > { %718 = vst [vmem:[%s301_s18] sm:$0xff] %v717_v53 }
 0x4e4   : > { %v708_v39 = vpop.f32.mrf.mxu2 }
 0x4e5 PF: > { %s16_s20 = sadd.s32 1, %s969_s20   ;;  %s1130_s18 = smov %s965_s19 }
 0x4e6   : > { %p13_p8 = scmp.ge.s32.totalorder %s16_s20, 4   ;;  %s1131_s19 = smov %s1133_s22 }
 0x4e8   :  { %15 = sbr.rel (!%p13_p8) target bundleno = 2 (0x2), region = 82 }
 0x4ed   :  { %744 = vsyncpa [#allocation3], 1 }
 0x4ee   :  { %746 = vsyncpa [#allocation3 + $0x1], 1 }

// kernel: decoder_forward.17
= control target key start
LH: loop header
LB: loop body
LE: loop exit
PB: predicated region body
PF: predicated region fallthrough
CT: control target
= control target key end

     0   :  { %12 = vsyncpa [#allocation5], 0  ;;  %s767_s0 = inlined_call_operand.vmem [shape: f32[16,128], index: 0, kind: input, shape index: {}]   ;;  %s768_s1 = inlined_call_operand.vmem [shape: f32[1,128], index: 1, kind: input, shape index: {}]   ;;  %s769_s2 = inlined_call_operand.vmem [shape: f32[1,128], index: 2, kind: input, shape index: {}]   ;;  %s770_s3 = inlined_call_operand.hbm [shape: f32[128,512], index: 3, kind: input, shape index: {}]   ;;  %s771_s4 = inlined_call_operand.vmem [shape: f32[1,512], index: 4, kind: input, shape index: {}]   ;;  %s772_s5 = inlined_call_operand.hbm [shape: f32[512,128], index: 5, kind: input, shape index: {}]   ;;  %s773_s6 = inlined_call_operand.vmem [shape: f32[1,128], index: 6, kind: input, shape index: {}]   ;;  %s774_s7 = inlined_call_operand.vmem [shape: f32[16,128], index: 7, kind: output, shape index: {}]  }
   0x1   :  { %s24_s26 = sshll.u32 %s770_s3, 4  ;;  %s25_s26 = int_to_ptr.hbm [resolvable:$true] %s24_s26 }
   0x2   :  { %13 = vsyncpa [#allocation7], 0  ;;  %s616_s27 = smov [#allocation4]   ;;  %s39_s8 = sshll.u32 %s772_s5, 4  ;;  %s40_s8 = int_to_ptr.hbm [resolvable:$true] %s39_s8 }
   0x3   :  { %s26_s28 = sshll.u32 %s616_s27, 4  ;;  %s617_s9 = smov 512   ;;  %s27_s28 = int_to_ptr.vmem [resolvable:$true] %s26_s28 }
   0x4   :  { %s618_s10 = smov 32   ;;  %s619_s11 = smov [#allocation6]  }
   0x5   :  { %32 = dma.hbm_to_vmem [thread:$0]  %s25_s26, 8192, %s27_s28, [#allocation5], %s617_s9, %s617_s9, %s618_s10  }
   0x6   :  { %s41_s12 = sshll.u32 %s619_s11, 4  ;;  %s620_s13 = smov 128   ;;  %s42_s12 = int_to_ptr.vmem [resolvable:$true] %s41_s12 }
   0x7   :  { %s621_s14 = smov 8  }
   0x8   :  { %47 = dma.hbm_to_vmem [thread:$0]  %s40_s8, 8192, %s42_s12, [#allocation7], %s620_s13, %s620_s13, %s621_s14  }
   0x9   :  { %612 = dma.done.wait [#allocation5], 8192  }
   0xa   :  { %613 = vsyncadd [#allocation5], 4294959104 }
   0xb   :  { %614 = dma.done.wait [#allocation7], 8192  }
   0xc   :  { %615 = vsyncadd [#allocation7], 4294959104  ;;  %v673_v0 = vld [vmem:[%s767_s0] sm:$0xff]  ;;  %v679_v1 = vld [vmem:[%s767_s0 + $0x8] sm:$0xff]  ;;  %v622_v2 = vmov 128.0   ;;  %v623_v17 = vmov 127.0  }
   0xd   :  { %66 = vadd.xlane.f32.xlu0 %v673_v0  ;;  %552 = vrcp.f32 %v622_v2  ;;  %v226_v26 = vld [vmem:[#allocation4 + $0x1c0] sm:$0xff]  ;;  %v227_v28 = vld [vmem:[#allocation4 + $0x1c8] sm:$0xff]  ;;  %v228_v30 = vld [vmem:[#allocation4 + $0x1d0] sm:$0xff] }
   0xe   :  { %554 = vrcp.f32 %v623_v17  ;;  %v230_v27 = vld [vmem:[#allocation4 + $0x1e0] sm:$0xff]  ;;  %v231_v29 = vld [vmem:[#allocation4 + $0x1e8] sm:$0xff]  ;;  %v232_v31 = vld [vmem:[#allocation4 + $0x1f0] sm:$0xff] }
   0xf   :  { %v262_v32 = vpack.c.bf16 %v230_v27, %v226_v26  ;;  %v263_v33 = vpack.c.bf16 %v231_v29, %v227_v28  ;;  %v264_v34 = vpack.c.bf16 %v232_v31, %v228_v30  ;;  %v229_v35 = vld [vmem:[#allocation4 + $0x1d8] sm:$0xff]  ;;  %v218_v38 = vld [vmem:[#allocation4 + $0x180] sm:$0xff]  ;;  %v219_v40 = vld [vmem:[#allocation4 + $0x188] sm:$0xff] }
  0x10   :  { %v233_v36 = vld [vmem:[#allocation4 + $0x1f8] sm:$0xff]  ;;  %v222_v39 = vld [vmem:[#allocation4 + $0x1a0] sm:$0xff]  ;;  %v223_v42 = vld [vmem:[#allocation4 + $0x1a8] sm:$0xff] }
  0x11   :  { %v265_v37 = vpack.c.bf16 %v233_v36, %v229_v35  ;;  %282 = vmatpush.bf16.msra.mxu0 %v262_v32  ;;  %296 = vmatpush.bf16.msra.mxu1 %v263_v33  ;;  %v258_v41 = vpack.c.bf16 %v222_v39, %v218_v38  ;;  %v220_v43 = vld [vmem:[#allocation4 + $0x190] sm:$0xff]  ;;  %v259_v46 = vpack.c.bf16 %v223_v42, %v219_v40  ;;  %v221_v48 = vld [vmem:[#allocation4 + $0x198] sm:$0xff]  ;;  %v210_v54 = vld [vmem:[#allocation4 + $0x140] sm:$0xff] }
  0x12   :  { %310 = vmatpush.bf16.msra.mxu2 %v264_v34  ;;  %v224_v44 = vld [vmem:[#allocation4 + $0x1b0] sm:$0xff]  ;;  %v225_v49 = vld [vmem:[#allocation4 + $0x1b8] sm:$0xff]  ;;  %v214_v55 = vld [vmem:[#allocation4 + $0x160] sm:$0xff] }
  0x13   :  { %v553_v3 = vpop.eup %552  ;;  %324 = vmatpush.bf16.msra.mxu3 %v265_v37  ;;  %v260_v47 = vpack.c.bf16 %v224_v44, %v220_v43  ;;  %v261_v52 = vpack.c.bf16 %v225_v49, %v221_v48  ;;  %v211_v56 = vld [vmem:[#allocation4 + $0x148] sm:$0xff]  ;;  %v212_v58 = vld [vmem:[#allocation4 + $0x150] sm:$0xff]  ;;  %v254_v61 = vpack.c.bf16 %v214_v55, %v210_v54  ;;  %v213_v2 = vld [vmem:[#allocation4 + $0x158] sm:$0xff] }
  0x14   :  { %v71_v4 = vmul.f32 128.0, %v553_v3  ;;  %vm75_vm0 = vweird.f32 %v553_v3  ;;  %v555_v18 = vpop.eup %554  ;;  %v215_v57 = vld [vmem:[#allocation4 + $0x168] sm:$0xff]  ;;  %v216_v59 = vld [vmem:[#allocation4 + $0x170] sm:$0xff]  ;;  %v198_v26 = vld [vmem:[#allocation4 + $0xe0] sm:$0xff] }
  0x15   :  { %68 = vadd.xlane.f32.xlu0 %v679_v1  ;;  %v88_v19 = vmul.f32 127.0, %v555_v18  ;;  %vm92_vm1 = vweird.f32 %v555_v18  ;;  %283 = vmatpush.bf16.msra.mxu0 %v258_v41  ;;  %v255_v62 = vpack.c.bf16 %v215_v57, %v211_v56  ;;  %v256_v63 = vpack.c.bf16 %v216_v59, %v212_v58  ;;  %v195_v27 = vld [vmem:[#allocation4 + $0xc8] sm:$0xff]  ;;  %v196_v30 = vld [vmem:[#allocation4 + $0xd0] sm:$0xff]  ;;  %v197_v36 = vld [vmem:[#allocation4 + $0xd8] sm:$0xff] }
  0x16   :  { %v72_v5 = vsub.f32 1.0, %v71_v4  ;;  %297 = vmatpush.bf16.msra.mxu1 %v259_v46  ;;  %311 = vmatpush.bf16.msra.mxu2 %v260_v47  ;;  %v199_v29 = vld [vmem:[#allocation4 + $0xe8] sm:$0xff]  ;;  %v200_v31 = vld [vmem:[#allocation4 + $0xf0] sm:$0xff]  ;;  %v201_v37 = vld [vmem:[#allocation4 + $0xf8] sm:$0xff] }
  0x17   :  { %v89_v20 = vsub.f32 1.0, %v88_v19  ;;  %325 = vmatpush.bf16.msra.mxu3 %v261_v52  ;;  %v209_v19 = vld [vmem:[#allocation4 + $0x138] sm:$0xff]  ;;  %v247_v34 = vpack.c.bf16 %v199_v29, %v195_v27  ;;  %v248_v35 = vpack.c.bf16 %v200_v31, %v196_v30  ;;  %v186_v38 = vld [vmem:[#allocation4 + $0x80] sm:$0xff]  ;;  %v249_v40 = vpack.c.bf16 %v201_v37, %v197_v36  ;;  %v187_v42 = vld [vmem:[#allocation4 + $0x88] sm:$0xff] }
  0x18   :  { %v73_v6 = vmul.f32 %v553_v3, %v72_v5  ;;  %v190_v41 = vld [vmem:[#allocation4 + $0xa0] sm:$0xff]  ;;  %v191_v43 = vld [vmem:[#allocation4 + $0xa8] sm:$0xff]  ;;  %v188_v48 = vld [vmem:[#allocation4 + $0x90] sm:$0xff] }
  0x19   :  { %v90_v21 = vmul.f32 %v555_v18, %v89_v20  ;;  %284 = vmatpush.bf16.msra.mxu0 %v254_v61  ;;  %v242_v46 = vpack.c.bf16 %v190_v41, %v186_v38  ;;  %v243_v47 = vpack.c.bf16 %v191_v43, %v187_v42  ;;  %v192_v49 = vld [vmem:[#allocation4 + $0xb0] sm:$0xff]  ;;  %v193_v54 = vld [vmem:[#allocation4 + $0xb8] sm:$0xff]  ;;  %v178_v55 = vld [vmem:[#allocation4 + $0x40] sm:$0xff] }
  0x1a   :  { %v74_v7 = vadd.f32 %v553_v3, %v73_v6  ;;  %298 = vmatpush.bf16.msra.mxu1 %v255_v62  ;;  %v202_v6 = vld [vmem:[#allocation4 + $0x100] sm:$0xff]  ;;  %312 = vmatpush.bf16.msra.mxu2 %v256_v63  ;;  %v180_v61 = vld [vmem:[#allocation4 + $0x50] sm:$0xff]  ;;  %v181_v63 = vld [vmem:[#allocation4 + $0x58] sm:$0xff] }
  0x1b   :  { %v91_v22 = vadd.f32 %v555_v18, %v90_v21  ;;  %v182_v56 = vld [vmem:[#allocation4 + $0x60] sm:$0xff]  ;;  %v184_v62 = vld [vmem:[#allocation4 + $0x70] sm:$0xff]  ;;  %v367_v31 = vld [vmem:[#allocation6 + $0x78] sm:$0xff] }
  0x1c   :  { %v76_v8 = vsel %vm75_vm0, %v553_v3, %v74_v7  ;;  %v217_v3 = vld [vmem:[#allocation4 + $0x178] sm:$0xff]  ;;  %v206_v7 = vld [vmem:[#allocation4 + $0x120] sm:$0xff]  ;;  %v365_v37 = vld [vmem:[#allocation6 + $0x68] sm:$0xff] }
  0x1d   :  { %v93_v23 = vsel %vm92_vm1, %v555_v18, %v91_v22  ;;  %v257_v4 = vpack.c.bf16 %v217_v3, %v213_v2  ;;  %v205_v18 = vld [vmem:[#allocation4 + $0x118] sm:$0xff]  ;;  %v238_v3 = vpack.c.bf16 %v182_v56, %v178_v55  ;;  %v364_v36 = vld [vmem:[#allocation6 + $0x60] sm:$0xff]  ;;  %v398_v41 = vld [vmem:[#allocation6 + $0x170] sm:$0xff] }
  0x1e   :  { %v253_v21 = vpack.c.bf16 %v209_v19, %v205_v18  ;;  %v185_v2 = vld [vmem:[#allocation4 + $0x78] sm:$0xff]  ;;  %v378_v55 = vld [vmem:[#allocation6 + $0xd0] sm:$0xff] }
  0x1f   :  { %326 = vmatpush.bf16.msra.mxu3 %v257_v4 }
  0x23   :  { %327 = vmatpush.bf16.msra.mxu3 %v253_v21 }
  0x27   :  { %328 = vmatpush.bf16.msra.mxu3 %v249_v40  ;;  %v381_v40 = vld [vmem:[#allocation6 + $0xe8] sm:$0xff] }
  0x80   :  { %v67_v9 = vpop.xlane.xlu0 %66 }
  0x81   :  { %v77_v10 = vmul.f32 %v76_v8, %v67_v9  ;;  %v250_v9 = vpack.c.bf16 %v206_v7, %v202_v6  ;;  %v174_v6 = vld [vmem:[#allocation4 + $0x20] sm:$0xff] }
  0x83   :  { %v683_v11 = vsub.f32 %v673_v0, %v77_v10  ;;  %v207_v10 = vld [vmem:[#allocation4 + $0x128] sm:$0xff]  ;;  %285 = vmatpush.bf16.msra.mxu0 %v250_v9  ;;  %v241_v9 = vpack.c.bf16 %v185_v2, %v181_v63  ;;  %v354_v2 = vld [vmem:[#allocation6 + $0x10] sm:$0xff] }
  0x84   :  { %v413_v63 = vld [vmem:[#allocation6 + $0x1e8] sm:$0xff] }
  0x85   :  { %v81_v12 = vmul.f32 %v683_v11, %v683_v11 }
  0x87   :  { %83 = vadd.xlane.f32.xlu1 %v81_v12  ;;  %v204_v12 = vld [vmem:[#allocation4 + $0x110] sm:$0xff] }
  0x88   :  { %v69_v13 = vpop.xlane.xlu0 %68 }
  0x89   :  { %v78_v14 = vmul.f32 %v76_v8, %v69_v13  ;;  %v203_v8 = vld [vmem:[#allocation4 + $0x108] sm:$0xff]  ;;  %v208_v13 = vld [vmem:[#allocation4 + $0x130] sm:$0xff] }
  0x8a   :  { %v252_v17 = vpack.c.bf16 %v208_v13, %v204_v12  ;;  %v175_v12 = vld [vmem:[#allocation4 + $0x28] sm:$0xff]  ;;  %v172_v13 = vld [vmem:[#allocation4 + $0x10] sm:$0xff] }
  0x8b   :  { %v688_v15 = vsub.f32 %v679_v1, %v78_v14 }
  0x8c   :  { %313 = vmatpush.bf16.msra.mxu2 %v252_v17  ;;  %v177_v17 = vld [vmem:[#allocation4 + $0x38] sm:$0xff] }
  0x8d   :  { %v82_v16 = vmul.f32 %v688_v15, %v688_v15 }
  0x8f   :  { %85 = vadd.xlane.f32.xlu1 %v82_v16  ;;  %v251_v16 = vpack.c.bf16 %v207_v10, %v203_v8  ;;  %v240_v8 = vpack.c.bf16 %v184_v62, %v180_v61  ;;  %v171_v10 = vld [vmem:[#allocation4 + $0x8] sm:$0xff]  ;;  %v412_v62 = vld [vmem:[#allocation6 + $0x1e0] sm:$0xff] }
  0x90   :  { %314 = vmatpush.bf16.msra.mxu2 %v248_v35  ;;  %v383_v35 = vld [vmem:[#allocation6 + $0xf8] sm:$0xff] }
  0x91   :  { %299 = vmatpush.bf16.msra.mxu1 %v251_v16  ;;  %v173_v16 = vld [vmem:[#allocation4 + $0x18] sm:$0xff] }
  0x95   :  { %300 = vmatpush.bf16.msra.mxu1 %v247_v34 }
  0x99   :  { %301 = vmatpush.bf16.msra.mxu1 %v243_v47  ;;  %v415_v47 = vld [vmem:[#allocation6 + $0x1f8] sm:$0xff] }
  0xfa   :  { %v84_v24 = vpop.xlane.xlu1 %83 }
  0xfb   :  { %v692_v25 = vmul.f32 %v93_v23, %v84_v24  ;;  %v194_v24 = vld [vmem:[#allocation4 + $0xc0] sm:$0xff] }
  0xfc   :  { %v246_v28 = vpack.c.bf16 %v198_v26, %v194_v24  ;;  %v237_v24 = vpack.c.bf16 %v177_v17, %v173_v16  ;;  %v395_v16 = vld [vmem:[#allocation6 + $0x158] sm:$0xff] }
  0xfd   :  { %556 = vrsqrt.f32 %v692_v25  ;;  %vm103_vm2 = vcmp.eq.f32.partialorder %v692_v25, inf  ;;  %vm105_vm3 = vcmp.eq.f32.partialorder %v692_v25, 0.0  ;;  %v106_v39 = vand.u32 2147483648, %v692_v25 }
  0xfe   :  { %286 = vmatpush.bf16.msra.mxu0 %v246_v28 }
 0x102   :  { %v86_v45 = vpop.xlane.xlu1 %85  ;;  %287 = vmatpush.bf16.msra.mxu0 %v242_v46  ;;  %v414_v46 = vld [vmem:[#allocation6 + $0x1f0] sm:$0xff] }
 0x103   :  { %v557_v50 = vpop.eup %556  ;;  %v695_v51 = vmul.f32 %v93_v23, %v86_v45 }
 0x104   :  { %v97_v53 = vmul.f32 %v557_v50, %v692_v25 }
 0x105   :  { %558 = vrsqrt.f32 %v695_v51  ;;  %vm115_vm4 = vcmp.eq.f32.partialorder %v695_v51, inf  ;;  %v118_v19 = vand.u32 2147483648, %v695_v51  ;;  %vm117_vm5 = vcmp.eq.f32.partialorder %v695_v51, 0.0 }
 0x106   :  { %v98_v60 = vmul.f32 %v557_v50, %v97_v53  ;;  %v244_v53 = vpack.c.bf16 %v192_v49, %v188_v48  ;;  %288 = vmatpush.bf16.msra.mxu0 %v238_v3  ;;  %v355_v3 = vld [vmem:[#allocation6 + $0x18] sm:$0xff] }
 0x108   :  { %v99_v5 = vmul.f32 0.5, %v98_v60  ;;  %v183_v60 = vld [vmem:[#allocation4 + $0x68] sm:$0xff]  ;;  %315 = vmatpush.bf16.msra.mxu2 %v244_v53  ;;  %v362_v53 = vld [vmem:[#allocation6 + $0x50] sm:$0xff] }
 0x10a   :  { %v100_v14 = vsub.f32 1.5, %v99_v5  ;;  %v170_v5 = vld [vmem:[#allocation4] sm:$0xff] }
 0x10b   :  { %v559_v20 = vpop.eup %558  ;;  %v234_v21 = vpack.c.bf16 %v174_v6, %v170_v5  ;;  %v360_v6 = vld [vmem:[#allocation6 + $0x40] sm:$0xff] }
 0x10c   :  { %v101_v22 = vmul.f32 %v557_v50, %v100_v14  ;;  %v109_v23 = vmul.f32 %v559_v20, %v695_v51  ;;  %v189_v50 = vld [vmem:[#allocation4 + $0x98] sm:$0xff]  ;;  %v176_v14 = vld [vmem:[#allocation4 + $0x30] sm:$0xff]  ;;  %316 = vmatpush.bf16.msra.mxu2 %v240_v8 }
 0x10d   :  { %v245_v59 = vpack.c.bf16 %v193_v54, %v189_v50  ;;  %289 = vmatpush.bf16.msra.mxu0 %v234_v21  ;;  %v363_v54 = vld [vmem:[#allocation6 + $0x58] sm:$0xff]  ;;  %v410_v21 = vld [vmem:[#allocation6 + $0x1d0] sm:$0xff] }
 0x10e   :  { %v102_v32 = vmul.f32 %v101_v22, %v692_v25  ;;  %v110_v33 = vmul.f32 %v559_v20, %v109_v23  ;;  %v236_v23 = vpack.c.bf16 %v176_v14, %v172_v13  ;;  %v376_v13 = vld [vmem:[#allocation6 + $0xc0] sm:$0xff]  ;;  %v394_v14 = vld [vmem:[#allocation6 + $0x150] sm:$0xff] }
 0x10f   :  { %329 = vmatpush.bf16.msra.mxu3 %v245_v59  ;;  %v396_v59 = vld [vmem:[#allocation6 + $0x160] sm:$0xff] }
 0x110   :  { %v104_v44 = vsel %vm103_vm2, %v692_v25, %v102_v32  ;;  %v111_v45 = vmul.f32 0.5, %v110_v33  ;;  %v179_v25 = vld [vmem:[#allocation4 + $0x48] sm:$0xff]  ;;  %317 = vmatpush.bf16.msra.mxu2 %v236_v23  ;;  %v382_v32 = vld [vmem:[#allocation6 + $0xf0] sm:$0xff]  ;;  %v437_v23 = vpack.c.bf16 %v395_v16, %v394_v14  ;;  %v352_v14 = vld [vmem:[#allocation6] sm:$0xff] }
 0x111   :  { %v107_v52 = vsel %vm105_vm3, %v106_v39, %v104_v44  ;;  %v239_v4 = vpack.c.bf16 %v183_v60, %v179_v25  ;;  %v431_v38 = vpack.c.bf16 %v383_v35, %v382_v32  ;;  %v380_v39 = vld [vmem:[#allocation6 + $0xe0] sm:$0xff]  ;;  %v422_v44 = vpack.c.bf16 %v365_v37, %v364_v36  ;;  %v397_v25 = vld [vmem:[#allocation6 + $0x168] sm:$0xff]  ;;  %v549_v60 = vld [vmem:[%s768_s1] ss:$0 sm:$0xff] }
 0x112   :  { %v705_v57 = vadd.f32 1e-06, %v107_v52  ;;  %v112_v58 = vsub.f32 1.5, %v111_v45  ;;  %v399_v45 = vld [vmem:[#allocation6 + $0x178] sm:$0xff]  ;;  %v430_v49 = vpack.c.bf16 %v381_v40, %v380_v39  ;;  %v447_v52 = vpack.c.bf16 %v415_v47, %v414_v46  ;;  %v393_v46 = vld [vmem:[#allocation6 + $0x148] sm:$0xff]  ;;  %v408_v47 = vld [vmem:[#allocation6 + $0x1c0] sm:$0xff] }
 0x113   :  { %302 = vmatpush.bf16.msra.mxu1 %v239_v4  ;;  %330 = vmatpush.bf16.msra.mxu3 %v241_v9  ;;  %v439_v50 = vpack.c.bf16 %v399_v45, %v398_v41  ;;  %v421_v4 = vpack.c.bf16 %v363_v54, %v362_v53  ;;  %v438_v5 = vpack.c.bf16 %v397_v25, %v396_v59  ;;  %v550_v35 = vld [vmem:[%s769_s2] ss:$0 sm:$0xff]  ;;  %v374_v41 = vld [vmem:[#allocation6 + $0xb0] sm:$0xff]  ;;  %v392_v45 = vld [vmem:[#allocation6 + $0x140] sm:$0xff] }
 0x114   :  { %560 = vrcp.f32 %v705_v57  ;;  %v113_v7 = vmul.f32 %v559_v20, %v112_v58  ;;  %v235_v20 = vpack.c.bf16 %v175_v12, %v171_v10  ;;  %v136_v42 = vand.u32 2147483647, %v705_v57  ;;  %v379_v58 = vld [vmem:[#allocation6 + $0xd8] sm:$0xff]  ;;  %v357_v53 = vld [vmem:[#allocation6 + $0x28] sm:$0xff]  ;;  %v372_v54 = vld [vmem:[#allocation6 + $0xa0] sm:$0xff] }
 0x115   :  { %v138_v43 = vand.u32 2147483648, %v705_v57  ;;  %vm132_vm7 = vweird.f32 %v705_v57  ;;  %476 = vmatpush.bf16.msrb.mxu2 %v439_v50  ;;  %v429_v12 = vpack.c.bf16 %v379_v58, %v378_v55  ;;  %v124_v32 = vmul.f32 %v549_v60, %v688_v15  ;;  %v358_v15 = vld [vmem:[#allocation6 + $0x30] sm:$0xff]  ;;  %v359_v40 = vld [vmem:[#allocation6 + $0x38] sm:$0xff]  ;;  %v353_v16 = vld [vmem:[#allocation6 + $0x8] sm:$0xff] }
 0x116   :  { %v114_v18 = vmul.f32 %v113_v7, %v695_v51  ;;  %vm736_vm9 = vcmp.eq.f32.partialorder %v136_v42, 8.507059e+37  ;;  %v361_v7 = vld [vmem:[#allocation6 + $0x48] sm:$0xff]  ;;  %v419_v42 = vpack.c.bf16 %v359_v40, %v358_v15  ;;  %v390_v59 = vld [vmem:[#allocation6 + $0x130] sm:$0xff]  ;;  %v391_v25 = vld [vmem:[#allocation6 + $0x138] sm:$0xff] }
 0x117   :  { %303 = vmatpush.bf16.msra.mxu1 %v235_v20  ;;  %331 = vmatpush.bf16.msra.mxu3 %v237_v24  ;;  %v139_v9 = vor.u32 1.1754944e-38, %v138_v43  ;;  %v411_v20 = vld [vmem:[#allocation6 + $0x1d8] sm:$0xff] }
 0x118   :  { %v116_v22 = vsel %vm115_vm4, %v695_v51, %v114_v18  ;;  %v366_v51 = vld [vmem:[#allocation6 + $0x70] sm:$0xff]  ;;  %v445_v24 = vpack.c.bf16 %v411_v20, %v410_v21  ;;  %v375_v43 = vld [vmem:[#allocation6 + $0xb8] sm:$0xff] }
 0x119   :  { %v119_v27 = vsel %vm117_vm5, %v118_v19, %v116_v22  ;;  %v423_v34 = vpack.c.bf16 %v367_v31, %v366_v51  ;;  %v377_v19 = vld [vmem:[#allocation6 + $0xc8] sm:$0xff]  ;;  %477 = vmatpush.bf16.msrb.mxu2 %v438_v5  ;;  %v417_v5 = vpack.c.bf16 %v355_v3, %v354_v2  ;;  %v386_v20 = vld [vmem:[#allocation6 + $0x110] sm:$0xff] }
 0x11a   :  { %v713_v26 = vpop.eup %560  ;;  %v717_v29 = vadd.f32 1e-06, %v119_v27  ;;  %v420_v27 = vpack.c.bf16 %v361_v7, %v360_v6  ;;  %v428_v51 = vpack.c.bf16 %v377_v19, %v376_v13  ;;  %v388_v7 = vld [vmem:[#allocation6 + $0x120] sm:$0xff]  ;;  %v369_v19 = vld [vmem:[#allocation6 + $0x88] sm:$0xff] }
 0x11b   :  { %v128_v28 = vmul.f32 %v713_v26, %v705_v57  ;;  %vm133_vm6 = vweird.f32 %v713_v26  ;;  %448 = vmatpush.bf16.msrb.mxu0 %v423_v34  ;;  %462 = vmatpush.bf16.msrb.mxu1 %v431_v38  ;;  %v446_v57 = vpack.c.bf16 %v413_v63, %v412_v62  ;;  %v407_v62 = vld [vmem:[#allocation6 + $0x1b8] sm:$0xff] }
 0x11c   :  { %562 = vrcp.f32 %v717_v29  ;;  %490 = vmatpush.bf16.msrb.mxu3 %v447_v52  ;;  %vm732_vm8 = vmor %vm132_vm7, %vm133_vm6  ;;  %v151_v17 = vand.u32 2147483647, %v717_v29  ;;  %v153_v18 = vand.u32 2147483648, %v717_v29  ;;  %vm147_vm11 = vweird.f32 %v717_v29  ;;  %v356_v52 = vld [vmem:[#allocation6 + $0x20] sm:$0xff] }
 0x11d   :  { %v129_v30 = vsub.f32 1.0, %v128_v28  ;;  %v123_v28 = vmul.f32 %v549_v60, %v683_v11  ;;  %478 = vmatpush.bf16.msrb.mxu2 %v437_v23  ;;  %v418_v55 = vpack.c.bf16 %v357_v53, %v356_v52  ;;  %v406_v60 = vld [vmem:[#allocation6 + $0x1b0] sm:$0xff] }
 0x11e   :  { %v154_v31 = vor.u32 1.1754944e-38, %v153_v18  ;;  %vm152_vm13 = vcmp.eq.f32.partialorder %v151_v17, 8.507059e+37  ;;  %v443_v63 = vpack.c.bf16 %v407_v62, %v406_v60  ;;  %v368_v17 = vld [vmem:[#allocation6 + $0x80] sm:$0xff]  ;;  %v416_v18 = vpack.c.bf16 %v353_v16, %v352_v14  ;;  %v402_v23 = vld [vmem:[#allocation6 + $0x190] sm:$0xff] }
 0x11f   :  { %v130_v33 = vmul.f32 %v713_v26, %v129_v30  ;;  %449 = vmatpush.bf16.msrb.mxu0 %v422_v44  ;;  %463 = vmatpush.bf16.msrb.mxu1 %v430_v49  ;;  %v427_v44 = vpack.c.bf16 %v375_v43, %v374_v41  ;;  %v409_v49 = vld [vmem:[#allocation6 + $0x1c8] sm:$0xff]  ;;  %v424_v21 = vpack.c.bf16 %v369_v19, %v368_v17 }
 0x120   :  { %491 = vmatpush.bf16.msrb.mxu3 %v446_v57  ;;  %v444_v50 = vpack.c.bf16 %v409_v49, %v408_v47  ;;  %v371_v57 = vld [vmem:[#allocation6 + $0x98] sm:$0xff] }
 0x121   :  { %v131_v48 = vadd.f32 %v713_v26, %v130_v33 }
 0x122   :  { %v563_v56 = vpop.eup %562 }
 0x123   :  { %v143_v61 = vmul.f32 %v563_v56, %v717_v29  ;;  %v135_v8 = vsel %vm732_vm8, %v713_v26, %v131_v48  ;;  %vm148_vm10 = vweird.f32 %v563_v56  ;;  %450 = vmatpush.bf16.msrb.mxu0 %v421_v4  ;;  %464 = vmatpush.bf16.msrb.mxu1 %v429_v12  ;;  %v436_v48 = vpack.c.bf16 %v393_v46, %v392_v45  ;;  %v370_v4 = vld [vmem:[#allocation6 + $0x90] sm:$0xff]  ;;  %v405_v12 = vld [vmem:[#allocation6 + $0x1a8] sm:$0xff] }
 0x124   :  { %v140_v26 = vsel %vm736_vm9, %v139_v9, %v135_v8  ;;  %vm149_vm12 = vmor %vm147_vm11, %vm148_vm10  ;;  %492 = vmatpush.bf16.msrb.mxu3 %v445_v24  ;;  %v425_v6 = vpack.c.bf16 %v371_v57, %v370_v4  ;;  %v389_v8 = vld [vmem:[#allocation6 + $0x128] sm:$0xff]  ;;  %v404_v9 = vld [vmem:[#allocation6 + $0x1a0] sm:$0xff] }
 0x125   :  { %v144_v10 = vsub.f32 1.0, %v143_v61  ;;  %v141_v33 = vmul.f32 %v140_v26, %v123_v28  ;;  %479 = vmatpush.bf16.msrb.mxu2 %v436_v48  ;;  %v435_v61 = vpack.c.bf16 %v391_v25, %v390_v59  ;;  %v442_v13 = vpack.c.bf16 %v405_v12, %v404_v9  ;;  %v403_v26 = vld [vmem:[#allocation6 + $0x198] sm:$0xff]  ;;  %v384_v28 = vld [vmem:[#allocation6 + $0x100] sm:$0xff] }
 0x127   :  { %v145_v22 = vmul.f32 %v563_v56, %v144_v10  ;;  %451 = vmatpush.bf16.msrb.mxu0 %v420_v27  ;;  %465 = vmatpush.bf16.msrb.mxu1 %v428_v51  ;;  %v160_v29 = vadd.f32 %v550_v35, %v141_v33  ;;  %v434_v10 = vpack.c.bf16 %v389_v8, %v388_v7  ;;  %v400_v51 = vld [vmem:[#allocation6 + $0x180] sm:$0xff]  ;;  %v551_v8 = vld [vmem:[%s773_s6] ss:$0 sm:$0xff] }
 0x128   :  { %493 = vmatpush.bf16.msrb.mxu3 %v444_v50  ;;  %v441_v27 = vpack.c.bf16 %v403_v26, %v402_v23 }
 0x129   :  { %v146_v30 = vadd.f32 %v563_v56, %v145_v22  ;;  %480 = vmatpush.bf16.msrb.mxu2 %v435_v61  ;;  %v387_v22 = vld [vmem:[#allocation6 + $0x118] sm:$0xff] }
 0x12a   :  { %v433_v24 = vpack.c.bf16 %v387_v22, %v386_v20 }
 0x12b   :  { %v150_v34 = vsel %vm149_vm12, %v563_v56, %v146_v30  ;;  %452 = vmatpush.bf16.msrb.mxu0 %v419_v42  ;;  %466 = vmatpush.bf16.msrb.mxu1 %v427_v44  ;;  %v373_v56 = vld [vmem:[#allocation6 + $0xa8] sm:$0xff] }
 0x12c   :  { %v155_v36 = vsel %vm152_vm13, %v154_v31, %v150_v34  ;;  %v426_v58 = vpack.c.bf16 %v373_v56, %v372_v54  ;;  %494 = vmatpush.bf16.msrb.mxu3 %v443_v63  ;;  %v385_v30 = vld [vmem:[#allocation6 + $0x108] sm:$0xff]  ;;  %v266_v34 = vld [vmem:[%s771_s4] sm:$0xf] }
 0x12d   :  { %v156_v11 = vmul.f32 %v155_v36, %v124_v32  ;;  %481 = vmatpush.bf16.msrb.mxu2 %v434_v10  ;;  %v432_v31 = vpack.c.bf16 %v385_v30, %v384_v28  ;;  %v401_v32 = vld [vmem:[#allocation6 + $0x188] sm:$0xff]  ;;  %v270_v44 = vperm.slane %v266_v34, 2  ;;  %v271_v45 = vperm.slane %v266_v34, 3 }
 0x12e   :  { %v440_v33 = vpack.c.bf16 %v401_v32, %v400_v51 }
 0x12f   :  { %v161_v37 = vadd.f32 %v550_v35, %v156_v11  ;;  %453 = vmatpush.bf16.msrb.mxu0 %v418_v55  ;;  %467 = vmatpush.bf16.msrb.mxu1 %v426_v58  ;;  %v268_v11 = vperm.slane %v266_v34, 0 }
 0x130   :  { %495 = vmatpush.bf16.msrb.mxu3 %v442_v13 }
 0x131   :  { %v539_v38 = vpack.c.bf16 %v161_v37, %v160_v29  ;;  %482 = vmatpush.bf16.msrb.mxu2 %v433_v24  ;;  %v269_v29 = vperm.slane %v266_v34, 1 }
 0x133   :  { %540 = vst [vmem:[#allocation2] sm:$0xff] %v539_v38   ;;  %454 = vmatpush.bf16.msrb.mxu0 %v417_v5  ;;  %468 = vmatpush.bf16.msrb.mxu1 %v425_v6 }
 0x134   :  { %496 = vmatpush.bf16.msrb.mxu3 %v441_v27 }
 0x135   :  { %483 = vmatpush.bf16.msrb.mxu2 %v432_v31 }
 0x137   :  { %455 = vmatpush.bf16.msrb.mxu0 %v416_v18  ;;  %469 = vmatpush.bf16.msrb.mxu1 %v424_v21 }
 0x138   :  { %497 = vmatpush.bf16.msrb.mxu3 %v440_v33 }
 0x13a   :  { %v535_v39 = vld [vmem:[#allocation2] sm:$0xff] }
 0x13b   :  { %290 = vmatmul.bf16.vlgmr.msra.gmra.mxu0 %v535_v39  ;;  %304 = vmatmul.bf16.vlgmr.msra.gmra.mxu1 %v535_v39 }
 0x13c   :  { %318 = vmatmul.bf16.vlgmr.msra.gmra.mxu2 %v535_v39  ;;  %332 = vmatmul.bf16.vlgmr.msra.gmra.mxu3 %v535_v39 }
 0x1b8   :  { %v291_v35 = vpop.f32.mrf.mxu0  ;;  %v305_v36 = vpop.f32.mrf.mxu1 }
 0x1b9   :  { %v292_v37 = vadd.f32 %v291_v35, %v268_v11  ;;  %v306_v38 = vadd.f32 %v305_v36, %v269_v29 }
 0x1bb   :  { %v338_v46 = vmax.f32 %v292_v37, 0.0  ;;  %v339_v47 = vmax.f32 %v306_v38, 0.0 }
 0x1bf   :  { %v319_v39 = vpop.f32.mrf.mxu2  ;;  %v333_v15 = vpop.f32.mrf.mxu3 }
 0x1c0   :  { %v293_v40 = vpop.f32.mrf.mxu0  ;;  %v307_v41 = vpop.f32.mrf.mxu1  ;;  %v320_v53 = vadd.f32 %v319_v39, %v270_v44  ;;  %v334_v54 = vadd.f32 %v333_v15, %v271_v45 }
 0x1c1   :  { %v294_v42 = vadd.f32 %v293_v40, %v268_v11  ;;  %v308_v43 = vadd.f32 %v307_v41, %v269_v29 }
 0x1c2   :  { %v340_v25 = vmax.f32 %v320_v53, 0.0  ;;  %v341_v60 = vmax.f32 %v334_v54, 0.0 }
 0x1c3   :  { %v342_v48 = vmax.f32 %v294_v42, 0.0  ;;  %v343_v49 = vmax.f32 %v308_v43, 0.0 }
 0x1c5   :  { %v348_v50 = vpack.c.bf16 %v342_v48, %v338_v46  ;;  %v349_v52 = vpack.c.bf16 %v343_v49, %v339_v47 }
 0x1c7   :  { %v321_v55 = vpop.f32.mrf.mxu2  ;;  %v335_v56 = vpop.f32.mrf.mxu3  ;;  %456 = vmatmul.bf16.vlgmr.msrb.gmra.mxu0 %v348_v50  ;;  %470 = vmatmul.bf16.vlgmr.msrb.gmra.mxu1 %v349_v52 }
 0x1c8   :  { %v322_v58 = vadd.f32 %v321_v55, %v270_v44  ;;  %v336_v59 = vadd.f32 %v335_v56, %v271_v45 }
 0x1ca   :  { %v344_v61 = vmax.f32 %v322_v58, 0.0  ;;  %v345_v62 = vmax.f32 %v336_v59, 0.0 }
 0x1cc   :  { %v350_v63 = vpack.c.bf16 %v344_v61, %v340_v25  ;;  %v351_v2 = vpack.c.bf16 %v345_v62, %v341_v60 }
 0x1ce   :  { %484 = vmatmul.bf16.vlgmr.msrb.gmra.mxu2 %v350_v63  ;;  %498 = vmatmul.bf16.vlgmr.msrb.gmra.mxu3 %v351_v2 }
 0x244   :  { %v457_v3 = vpop.f32.mrf.mxu0  ;;  %v471_v4 = vpop.f32.mrf.mxu1 }
 0x245   :  { %v472_v5 = vadd.f32 %v471_v4, %v457_v3 }
 0x24c   :  { %v459_v10 = vpop.f32.mrf.mxu0  ;;  %v473_v12 = vpop.f32.mrf.mxu1 }
 0x24d   :  { %v474_v14 = vadd.f32 %v473_v12, %v459_v10 }
 0x251   :  { %v485_v57 = vpop.f32.mrf.mxu2  ;;  %v499_v6 = vpop.f32.mrf.mxu3 }
 0x252   :  { %v486_v7 = vadd.f32 %v485_v57, %v472_v5 }
 0x254   :  { %v500_v9 = vadd.f32 %v499_v6, %v486_v7 }
 0x256   :  { %v517_v13 = vadd.f32 %v551_v8, %v500_v9 }
 0x258   :  { %v521_v16 = vadd.f32 %v517_v13, %v673_v0 }
 0x259   :  { %v487_v17 = vpop.f32.mrf.mxu2  ;;  %v501_v19 = vpop.f32.mrf.mxu3 }
 0x25a   :  { %523 = vst [vmem:[%s774_s7] sm:$0xff] %v521_v16  ;;  %v488_v18 = vadd.f32 %v487_v17, %v474_v14 }
 0x25c   :  { %v502_v21 = vadd.f32 %v501_v19, %v488_v18 }
 0x25e   :  { %v518_v20 = vadd.f32 %v551_v8, %v502_v21 }
 0x260   :  { %v522_v22 = vadd.f32 %v518_v20, %v679_v1 }
 0x262   :  { %524 = vst [vmem:[%s774_s7 + $0x8] sm:$0xff] %v522_v22 }
 0x263   :  { %529 = vsyncpa [#allocation5], 1 }
 0x264   :  { %530 = vsyncpa [#allocation7], 1 }

// kernel: decoder_forward.23
= control target key start
LH: loop header
LB: loop body
LE: loop exit
PB: predicated region body
PF: predicated region fallthrough
CT: control target
= control target key end

     0   :  { %s230_s0 = inlined_call_operand.vmem [shape: f32[16,128], index: 0, kind: input, shape index: {}]   ;;  %s231_s1 = inlined_call_operand.vmem [shape: f32[1,128], index: 1, kind: input, shape index: {}]   ;;  %s232_s2 = inlined_call_operand.vmem [shape: f32[1,128], index: 2, kind: input, shape index: {}]   ;;  %s233_s3 = inlined_call_operand.hbm [shape: f32[16,128], index: 3, kind: output, shape index: {}]  }
   0x1   :  { %v15_v0 = vld [vmem:[%s230_s0] sm:$0xff] }
   0x2   :  { %19 = vadd.xlane.f32.xlu0 %v15_v0 }
   0x3   :  { %8 = vsyncpa [#allocation3], 0  ;;  %v16_v1 = vld [vmem:[%s230_s0 + $0x8] sm:$0xff]  ;;  %v180_v2 = vmov 128.0   ;;  %v181_v17 = vmov 127.0   ;;  %s123_s21 = sshll.u32 %s233_s3, 4  ;;  %s124_s21 = int_to_ptr.hbm [resolvable:$true] %s123_s21 }
   0x4   :  { %142 = vrcp.f32 %v180_v2  ;;  %v140_v54 = vld [vmem:[%s231_s1] ss:$0 sm:$0xff]  ;;  %s182_s1 = smov [#allocation2]   ;;  %s183_s22 = smov 128  }
   0x5   :  { %144 = vrcp.f32 %v181_v17  ;;  %v141_v63 = vld [vmem:[%s232_s2] ss:$0 sm:$0xff]  ;;  %s121_s19 = sshll.u32 %s182_s1, 4  ;;  %s184_s23 = smov 8   ;;  %s122_s19 = int_to_ptr.vmem [resolvable:$true] %s121_s19 }
   0xa   :  { %21 = vadd.xlane.f32.xlu0 %v16_v1  ;;  %v143_v3 = vpop.eup %142 }
   0xb   :  { %v24_v4 = vmul.f32 128.0, %v143_v3  ;;  %vm28_vm0 = vweird.f32 %v143_v3  ;;  %v145_v18 = vpop.eup %144 }
   0xc   :  { %v41_v19 = vmul.f32 127.0, %v145_v18  ;;  %vm45_vm1 = vweird.f32 %v145_v18 }
   0xd   :  { %v25_v5 = vsub.f32 1.0, %v24_v4 }
   0xe   :  { %v42_v20 = vsub.f32 1.0, %v41_v19 }
   0xf   :  { %v26_v6 = vmul.f32 %v143_v3, %v25_v5 }
  0x10   :  { %v43_v21 = vmul.f32 %v145_v18, %v42_v20 }
  0x11   :  { %v27_v7 = vadd.f32 %v143_v3, %v26_v6 }
  0x12   :  { %v44_v22 = vadd.f32 %v145_v18, %v43_v21 }
  0x13   :  { %v29_v8 = vsel %vm28_vm0, %v143_v3, %v27_v7 }
  0x14   :  { %v46_v23 = vsel %vm45_vm1, %v145_v18, %v44_v22 }
  0x75   :  { %v20_v9 = vpop.xlane.xlu0 %19 }
  0x76   :  { %v30_v10 = vmul.f32 %v29_v8, %v20_v9 }
  0x78   :  { %v211_v11 = vsub.f32 %v15_v0, %v30_v10 }
  0x7a   :  { %v34_v12 = vmul.f32 %v211_v11, %v211_v11  ;;  %v76_v60 = vmul.f32 %v140_v54, %v211_v11 }
  0x7c   :  { %36 = vadd.xlane.f32.xlu1 %v34_v12 }
  0x7d   :  { %v22_v13 = vpop.xlane.xlu0 %21 }
  0x7e   :  { %v31_v14 = vmul.f32 %v29_v8, %v22_v13 }
  0x80   :  { %v215_v15 = vsub.f32 %v16_v1, %v31_v14 }
  0x82   :  { %v35_v16 = vmul.f32 %v215_v15, %v215_v15  ;;  %v77_v9 = vmul.f32 %v140_v54, %v215_v15 }
  0x84   :  { %38 = vadd.xlane.f32.xlu1 %v35_v16 }
  0xef   :  { %v37_v24 = vpop.xlane.xlu1 %36 }
  0xf0   :  { %v47_v25 = vmul.f32 %v46_v23, %v37_v24 }
  0xf2   :  { %146 = vrsqrt.f32 %v47_v25  ;;  %vm56_vm2 = vcmp.eq.f32.partialorder %v47_v25, inf  ;;  %v59_v38 = vand.u32 2147483648, %v47_v25  ;;  %vm58_vm3 = vcmp.eq.f32.partialorder %v47_v25, 0.0 }
  0xf7   :  { %v39_v26 = vpop.xlane.xlu1 %38 }
  0xf8   :  { %v147_v27 = vpop.eup %146  ;;  %v48_v28 = vmul.f32 %v46_v23, %v39_v26 }
  0xf9   :  { %v50_v29 = vmul.f32 %v147_v27, %v47_v25 }
  0xfa   :  { %148 = vrsqrt.f32 %v48_v28  ;;  %vm68_vm4 = vcmp.eq.f32.partialorder %v48_v28, inf  ;;  %v71_v46 = vand.u32 2147483648, %v48_v28  ;;  %vm70_vm5 = vcmp.eq.f32.partialorder %v48_v28, 0.0 }
  0xfb   :  { %v51_v30 = vmul.f32 %v147_v27, %v50_v29 }
  0xfd   :  { %v52_v31 = vmul.f32 0.5, %v51_v30 }
  0xff   :  { %v53_v32 = vsub.f32 1.5, %v52_v31 }
 0x100   :  { %v149_v33 = vpop.eup %148 }
 0x101   :  { %v54_v34 = vmul.f32 %v147_v27, %v53_v32  ;;  %v62_v35 = vmul.f32 %v149_v33, %v48_v28 }
 0x103   :  { %v55_v36 = vmul.f32 %v54_v34, %v47_v25  ;;  %v63_v37 = vmul.f32 %v149_v33, %v62_v35 }
 0x105   :  { %v57_v39 = vsel %vm56_vm2, %v47_v25, %v55_v36  ;;  %v64_v40 = vmul.f32 0.5, %v63_v37 }
 0x106   :  { %v60_v41 = vsel %vm58_vm3, %v59_v38, %v57_v39 }
 0x107   :  { %v78_v42 = vadd.f32 1e-06, %v60_v41  ;;  %v65_v43 = vsub.f32 1.5, %v64_v40 }
 0x109   :  { %150 = vrcp.f32 %v78_v42  ;;  %v66_v44 = vmul.f32 %v149_v33, %v65_v43  ;;  %v91_v53 = vand.u32 2147483648, %v78_v42  ;;  %v89_v56 = vand.u32 2147483647, %v78_v42 }
 0x10a   :  { %vm85_vm7 = vweird.f32 %v78_v42 }
 0x10b   :  { %v67_v45 = vmul.f32 %v66_v44, %v48_v28  ;;  %v92_v59 = vor.u32 1.1754944e-38, %v91_v53  ;;  %vm90_vm9 = vcmp.eq.f32.partialorder %v89_v56, 8.507059e+37 }
 0x10d   :  { %v69_v47 = vsel %vm68_vm4, %v48_v28, %v67_v45 }
 0x10e   :  { %v72_v48 = vsel %vm70_vm5, %v71_v46, %v69_v47 }
 0x10f   :  { %v151_v49 = vpop.eup %150  ;;  %v79_v50 = vadd.f32 1e-06, %v72_v48 }
 0x110   :  { %v81_v51 = vmul.f32 %v151_v49, %v78_v42  ;;  %vm86_vm6 = vweird.f32 %v151_v49 }
 0x111   :  { %152 = vrcp.f32 %v79_v50  ;;  %vm87_vm8 = vmor %vm85_vm7, %vm86_vm6  ;;  %v106_v3 = vand.u32 2147483648, %v79_v50  ;;  %v104_v5 = vand.u32 2147483647, %v79_v50  ;;  %vm100_vm11 = vweird.f32 %v79_v50 }
 0x112   :  { %v82_v52 = vsub.f32 1.0, %v81_v51 }
 0x113   :  { %v107_v8 = vor.u32 1.1754944e-38, %v106_v3  ;;  %vm105_vm13 = vcmp.eq.f32.partialorder %v104_v5, 8.507059e+37 }
 0x114   :  { %v83_v55 = vmul.f32 %v151_v49, %v82_v52 }
 0x116   :  { %v84_v57 = vadd.f32 %v151_v49, %v83_v55 }
 0x117   :  { %v153_v58 = vpop.eup %152 }
 0x118   :  { %v88_v61 = vsel %vm87_vm8, %v151_v49, %v84_v57  ;;  %v96_v62 = vmul.f32 %v153_v58, %v79_v50  ;;  %vm101_vm10 = vweird.f32 %v153_v58 }
 0x119   :  { %v93_v0 = vsel %vm90_vm9, %v92_v59, %v88_v61  ;;  %vm102_vm12 = vmor %vm100_vm11, %vm101_vm10 }
 0x11a   :  { %v94_v1 = vmul.f32 %v93_v0, %v76_v60  ;;  %v97_v2 = vsub.f32 1.0, %v96_v62 }
 0x11c   :  { %v98_v4 = vmul.f32 %v153_v58, %v97_v2  ;;  %v113_v6 = vadd.f32 %v141_v63, %v94_v1 }
 0x11e   :  { %v99_v7 = vadd.f32 %v153_v58, %v98_v4  ;;  %115 = vst [vmem:[#allocation2] sm:$0xff] %v113_v6 }
 0x120   :  { %v103_v10 = vsel %vm102_vm12, %v153_v58, %v99_v7 }
 0x121   :  { %v108_v11 = vsel %vm105_vm13, %v107_v8, %v103_v10 }
 0x122   :  { %v109_v12 = vmul.f32 %v108_v11, %v77_v9 }
 0x124   :  { %v114_v13 = vadd.f32 %v141_v63, %v109_v12 }
 0x126   :  { %116 = vst [vmem:[#allocation2 + $0x8] sm:$0xff] %v114_v13 }
 0x127   :  { %129 = dma.vmem_to_hbm [thread:$0]  %s122_s19, 256, %s124_s21, [#allocation3], %s183_s22, %s183_s22, %s184_s23  }
 0x128   :  { %178 = dma.done.wait [#allocation3], 256  }
 0x129   :  { %179 = vsyncadd [#allocation3], 4294967040 }
 0x12a   :  { %134 = vsyncpa [#allocation3], 1 }

// kernel: decoder_forward.16
= control target key start
LH: loop header
LB: loop body
LE: loop exit
PB: predicated region body
PF: predicated region fallthrough
CT: control target
= control target key end

     0   :  { %11 = vsyncpa [#allocation3], 0  ;;  %s1074_s21 = smov 0   ;;  %s1076_s22 = smov 0   ;;  %s1192_s0 = inlined_call_operand.vmem [shape: bf16[2,8,128], index: 0, kind: input, shape index: {}]   ;;  %s1193_s1 = inlined_call_operand.vmem [shape: bf16[2,16,256], index: 1, kind: input, shape index: {}]   ;;  %s1194_s2 = inlined_call_operand.vmem [shape: s32[2,1,16], index: 2, kind: input, shape index: {}]   ;;  %s1195_s3 = inlined_call_operand.hbm [shape: f32[128,128], index: 3, kind: input, shape index: {}]   ;;  %s1196_s4 = inlined_call_operand.vmem [shape: f32[1,128], index: 4, kind: input, shape index: {}]   ;;  %s1197_s5 = inlined_call_operand.vmem [shape: f32[2,8,128], index: 5, kind: input, shape index: {}]   ;;  %s1198_s6 = inlined_call_operand.vmem [shape: f32[2,8,128], index: 6, kind: output, shape index: {}]  }
   0x1   :  { %s1078_s23 = smov 0  }
   0x2 LB: > { %s879_s24 = sadd.s32 4294967295, %s1030_s23   ;;  %s29_s25 = sadd.s32 1, %s1026_s22  ;;  %s1030_s23 = sphi %s1078_s23, %s17_s23   ;;  %s1026_s22 = sphi %s1076_s22, %s1200_s22   ;;  %s1022_s21 = sphi %s1074_s21, %s1199_s21  }
   0x3   : > { %p31_p0 = scmp.ge.s32.totalorder %s29_s25, 2  ;;  %p881_p1 = scmp.ge.s32.totalorder %s1030_s23, 1 }
   0x4   : > { %p212_p2 = scmp.lt.s32.totalorder %s1030_s23, 3  ;;  %p924_p4 = scmp.eq.s32.totalorder %s879_s24, 0 }
   0x5   : > { %s1202_s25 = smov (%p31_p0, %s29_s25), 0  ;;  %s223_s28 = sshll.u32 %s1195_s3, 4  ;;  %s224_s28 = int_to_ptr.hbm [resolvable:$true] %s223_s28 }
   0x6   : > { %p213_p3 = pnand %p881_p1, %p212_p2  ;;  %s1032_s29 = smov [#allocation2]  }
   0x7   : > { %s225_s30 = sshll.u32 %s1032_s29, 4  ;;  %s1033_s7 = smov 128   ;;  %s226_s30 = int_to_ptr.vmem [resolvable:$true] %s225_s30 }
   0x8   : > { %p920_p5 = pneg %p213_p3  ;;  %s1034_s8 = smov 8  }
   0x9   : > { %278 = sbr.rel (%p213_p3) target bundleno = 1250 (0x4e2), region = 44 }
   0xa   : > { %p921_p6 = pnand %p924_p4, %p920_p5 }
   0xc   : > { %923 = dma.hbm_to_vmem [thread:$0]  (!%p921_p6), %s224_s28, 2048, %s226_s30, [#allocation3], %s1033_s7, %s1033_s7, %s1034_s8  }
   0xe   : > { %1017 = dma.done.wait (%p924_p4), [#allocation3], 2048  }
   0xf   : > { %1019 = vsyncadd (%p924_p4), [#allocation3], 4294965248  ;;  %p328_p7 = scmp.lt.s32.totalorder %s1022_s21, 1  ;;  %vm371_vm0 = vcmask 261120   ;;  %s1035_s17 = smov 96   ;;  %v1036_v11 = vmov 0.0  }
  0x10   : > { %vm396_vm2 = vcmask 130048   ;;  %s1037_s24 = smov 32   ;;  %s1038_s26 = smov 64   ;;  %v447_v51 = vld [vmem:[#allocation2 + $0x10] sm:$0xff]  ;;  %v448_v52 = vld [vmem:[#allocation2 + $0x18] sm:$0xff]  ;;  %v445_v54 = vld [vmem:[#allocation2] sm:$0xff] }
  0x11   : > { %s1204_s21 = smov (!%p328_p7, %s1022_s21), 1  ;;  %v450_v53 = vpack.c.bf16 %v448_v52, %v447_v51  ;;  %v446_v55 = vld [vmem:[#allocation2 + $0x8] sm:$0xff] }
  0x12   : > { %s913_s9 = sshll.u32 %s1204_s21, 4  ;;  %s886_s10 = sshll.u32 %s1204_s21, 2  ;;  %v449_v56 = vpack.c.bf16 %v446_v55, %v445_v54 }
  0x13   : > { %s1103_s13 = scalar_lea.vmem %s1193_s1, %s913_s9  ;;  %s334_s16 = scalar_lea.vmem %s1192_s0, %s886_s10 }
  0x14   : > { %v893_v0 = vld [vmem:[%s1103_s13] sm:$0xf]  ;;  %v914_v1 = vld [vmem:[%s1103_s13 + $0x4] sm:$0xf0]  ;;  %s342_s20 = scalar_lea.vmem %s1194_s2, %s1204_s21  ;;  %v898_v29 = vld [vmem:[%s1103_s13 + $0x4] sm:$0xf] }
  0x15   : > { %v361_v2 = vld [vmem:[%s334_s16] sm:$0xf]  ;;  %v1110_v3 = vor.u32 %v914_v1, %v893_v0  ;;  %v915_v30 = vld [vmem:[%s1103_s13 + $0x8] sm:$0xf0]  ;;  %s889_s27 = sshll.u32 %s1204_s21, 3 }
  0x16   : > { %v452_v5 = vunpack.c.l.b16 %v361_v2  ;;  %v358_v10 = vld [vmem:[%s342_s20] sm:$0x1]  ;;  %v1135_v31 = vor.u32 %v915_v30, %v898_v29  ;;  %s349_s30 = scalar_lea.vmem %s1197_s5, %s889_s27  ;;  %s356_s21 = scalar_lea.vmem %s1198_s6, %s889_s27 }
  0x17   : > { %456 = vrot.lane.b32.xlu0 %v1110_v3, %s1035_s17  ;;  %v376_v4 = vsel %vm371_vm0, %v1110_v3, 0  ;;  %vm359_vm1 = vcmp.eq.s32.totalorder %v358_v10, 0 }
  0x18   : > { %385 = vmatpush.bf16.xpose.msra.mxu0 %v376_v4  ;;  %v453_v6 = vpack.c.b16 %v452_v5, %v452_v5  ;;  %v360_v12 = vsel %vm359_vm1, -1e+09, %v1036_v11  ;;  %438 = vmatpush.bf16.msra.mxu1 %v1135_v31 }
  0x19   : > { %v1124_v13 = vperm.slane %v360_v12, 0 }
  0x1f   : > { %454 = vrot.lane.b32.xlu0 %v453_v6, %s1035_s17  ;;  %895 = vmatmul.msk.bf16.vlgmr.msra.gmra.mxu0 %vm371_vm0, %v361_v2 }
  0x27   : > { %504 = vrot.lane.b32.xlu0 %v1135_v31, %s1035_s17 }
  0x2f   : > { %655 = vrot.lane.b32.xlu0 %v453_v6, %s1037_s24 }
  0x37   : > { %562 = vrot.lane.b32.xlu0 %v453_v6, %s1038_s26 }
  0x89   : > { %v457_v7 = vpop.permute.xlu0 %456 }
  0x8a   : > { %v462_v8 = vsel %vm371_vm0, %v457_v7, 0 }
  0x8b   : > { %471 = vmatpush.bf16.xpose.msra.mxu2 %v462_v8 }
  0x91   : > { %v455_v9 = vpop.permute.xlu0 %454 }
  0x92   : > { %901 = vmatmul.msk.bf16.vlgmr.msra.gmra.mxu2 %vm371_vm0, %v455_v9 }
  0x99   : > { %v505_v50 = vpop.permute.xlu0 %504 }
  0x9a   : > { %517 = vmatpush.bf16.msra.mxu3 %v505_v50 }
  0x9c   : > { %v387_v14 = vpop.f32.mrf.mxu0 }
  0x9d   : > { %v391_v15 = vmul.f32 0.17677669, %v387_v14 }
  0x9e   : > { %555 = vmatpush.bf16.msrb.mxu3 %v450_v53 }
  0x9f   : > { %v395_v16 = vadd.f32 %v1124_v13, %v391_v15 }
  0xa1   : > { %v397_v17 = vsel %vm396_vm2, %v395_v16, -inf  ;;  %v656_v58 = vpop.permute.xlu0 %655 }
  0xa2   : > { %398 = vmax.xlane.f32.xlu1 %v397_v17  ;;  %556 = vmatpush.bf16.msrb.mxu3 %v449_v56  ;;  %v527_v17 = vld [vmem:[#allocation2 + $0x38] sm:$0xff] }
  0xa4   : > { %v389_v18 = vpop.f32.mrf.mxu0 }
 0x115   : > { %v473_v19 = vpop.f32.mrf.mxu2  ;;  %v399_v20 = vpop.xlane.xlu1 %398 }
 0x116   : > { %v477_v21 = vmul.f32 0.17677669, %v473_v19  ;;  %v400_v22 = vsub.f32 %v395_v16, %v399_v20  ;;  %v526_v16 = vld [vmem:[#allocation2 + $0x30] sm:$0xff]  ;;  %v524_v19 = vld [vmem:[#allocation2 + $0x20] sm:$0xff]  ;;  %v525_v20 = vld [vmem:[#allocation2 + $0x28] sm:$0xff] }
 0x117   : > { %v529_v18 = vpack.c.bf16 %v527_v17, %v526_v16  ;;  %v632_v16 = vld [vmem:[#allocation2 + $0x40] sm:$0xff]  ;;  %v633_v17 = vld [vmem:[#allocation2 + $0x48] sm:$0xff] }
 0x118   : > { %v401_v23 = vmul.f32 1.442695, %v400_v22  ;;  %v478_v24 = vadd.f32 %v477_v21, %v1124_v13  ;;  %v528_v21 = vpack.c.bf16 %v525_v20, %v524_v19  ;;  %v727_v19 = vld [vmem:[#allocation2 + $0x70] sm:$0xff]  ;;  %v728_v20 = vld [vmem:[#allocation2 + $0x78] sm:$0xff] }
 0x119   : > { %539 = vmatpush.bf16.msrb.mxu1 %v529_v18  ;;  %v636_v18 = vpack.c.bf16 %v633_v17, %v632_v16 }
 0x11a   : > { %958 = vpow2.f32 %v401_v23  ;;  %v479_v25 = vsel %vm396_vm2, %v478_v24, -inf }
 0x11b   : > { %480 = vmax.xlane.f32.xlu2 %v479_v25 }
 0x11d   : > { %v475_v26 = vpop.f32.mrf.mxu2  ;;  %540 = vmatpush.bf16.msrb.mxu1 %v528_v21  ;;  %v725_v21 = vld [vmem:[#allocation2 + $0x60] sm:$0xff] }
 0x120   : > { %v959_v27 = vpop.eup %958 }
 0x121   : > { %v403_v28 = vsel %vm396_vm2, %v959_v27, 0.0 }
 0x122   : > { %404 = vadd.xlane.f32.xlu1 %v403_v28 }
 0x13b   : > { %657 = vrot.lane.b32.xlu1 %v1110_v3, %s1037_s24 }
 0x18e   : > { %v481_v32 = vpop.xlane.xlu2 %480 }
 0x18f   : > { %v482_v33 = vsub.f32 %v478_v24, %v481_v32 }
 0x191   : > { %v483_v34 = vmul.f32 1.442695, %v482_v33 }
 0x193   : > { %960 = vpow2.f32 %v483_v34 }
 0x195   : > { %v405_v35 = vpop.xlane.xlu1 %404 }
 0x196   : > { %962 = vrcp.f32 %v405_v35  ;;  %v417_v41 = vand.u32 2147483648, %v405_v35  ;;  %v415_v43 = vand.u32 2147483647, %v405_v35  ;;  %vm411_vm4 = vweird.f32 %v405_v35 }
 0x198   : > { %v418_v45 = vor.u32 1.1754944e-38, %v417_v41  ;;  %vm416_vm6 = vcmp.eq.f32.partialorder %v415_v43, 8.507059e+37 }
 0x199   : > { %v961_v36 = vpop.eup %960 }
 0x19a   : > { %v485_v37 = vsel %vm396_vm2, %v961_v36, 0.0 }
 0x19b   : > { %486 = vadd.xlane.f32.xlu2 %v485_v37 }
 0x19c   : > { %v963_v38 = vpop.eup %962 }
 0x19d   : > { %v407_v39 = vmul.f32 %v963_v38, %v405_v35  ;;  %vm412_vm3 = vweird.f32 %v963_v38 }
 0x19e   : > { %vm413_vm5 = vmor %vm411_vm4, %vm412_vm3 }
 0x19f   : > { %v408_v40 = vsub.f32 1.0, %v407_v39 }
 0x1a1   : > { %v409_v42 = vmul.f32 %v963_v38, %v408_v40 }
 0x1a3   : > { %v410_v44 = vadd.f32 %v963_v38, %v409_v42 }
 0x1a5   : > { %v414_v46 = vsel %vm413_vm5, %v963_v38, %v410_v44 }
 0x1a6   : > { %v419_v47 = vsel %vm416_vm6, %v418_v45, %v414_v46 }
 0x1a7   : > { %v420_v48 = vmul.f32 %v959_v27, %v419_v47 }
 0x1a9   : > { %v421_v49 = vpack.c.bf16 %v420_v48, %v420_v48 }
 0x1ab   : > { %900 = vmatmul.msk.bf16.vlgmr.msra.gmra.mxu1 %vm396_vm2, %v421_v49 }
 0x1ad   : > { %v658_v8 = vpop.permute.xlu1 %657 }
 0x1ae   : > { %v663_v11 = vsel %vm371_vm0, %v658_v8, 0 }
 0x1b3   : > { %564 = vrot.lane.b32.xlu2 %v1110_v3, %s1038_s26  ;;  %v563_v3 = vpop.permute.xlu0 %562 }
 0x20e   : > { %v487_v57 = vpop.xlane.xlu2 %486 }
 0x20f   : > { %964 = vrcp.f32 %v487_v57  ;;  %v499_v0 = vand.u32 2147483648, %v487_v57  ;;  %v497_v2 = vand.u32 2147483647, %v487_v57  ;;  %vm493_vm8 = vweird.f32 %v487_v57 }
 0x211   : > { %v500_v5 = vor.u32 1.1754944e-38, %v499_v0  ;;  %vm498_vm10 = vcmp.eq.f32.partialorder %v497_v2, 8.507059e+37  ;;  %v635_v0 = vld [vmem:[#allocation2 + $0x58] sm:$0xff] }
 0x215   : > { %v965_v59 = vpop.eup %964 }
 0x216   : > { %v489_v60 = vmul.f32 %v965_v59, %v487_v57  ;;  %v565_v61 = vpop.permute.xlu2 %564  ;;  %vm494_vm7 = vweird.f32 %v965_v59 }
 0x217   : > { %v570_v62 = vsel %vm371_vm0, %v565_v61, 0  ;;  %vm495_vm9 = vmor %vm493_vm8, %vm494_vm7 }
 0x218   : > { %v490_v63 = vsub.f32 1.0, %v489_v60  ;;  %579 = vmatpush.bf16.xpose.msrb.mxu0 %v570_v62 }
 0x21a   : > { %v491_v1 = vmul.f32 %v965_v59, %v490_v63  ;;  %v634_v63 = vld [vmem:[#allocation2 + $0x50] sm:$0xff] }
 0x21c   : > { %v492_v4 = vadd.f32 %v965_v59, %v491_v1  ;;  %v637_v1 = vpack.c.bf16 %v635_v0, %v634_v63 }
 0x21e   : > { %v496_v6 = vsel %vm495_vm9, %v965_v59, %v492_v4  ;;  %647 = vmatpush.bf16.msra.mxu1 %v637_v1 }
 0x21f   : > { %905 = vmatmul.msk.bf16.vlgmr.msrb.gmra.mxu0 %vm371_vm0, %v563_v3  ;;  %v501_v7 = vsel %vm498_vm10, %v500_v5, %v496_v6 }
 0x220   : > { %v502_v9 = vmul.f32 %v961_v36, %v501_v7 }
 0x222   : > { %v503_v10 = vpack.c.bf16 %v502_v9, %v502_v9  ;;  %648 = vmatpush.bf16.msra.mxu1 %v636_v18 }
 0x224   : > { %902 = vmatmul.msk.bf16.vlgmr.msra.gmra.mxu3 %vm396_vm2, %v503_v10 }
 0x225   : > { %672 = vmatpush.bf16.xpose.msra.mxu3 %v663_v11 }
 0x228   : > { %v440_v12 = vpop.f32.mrf.mxu1 }
 0x229   : > { %v444_v15 = vpack.c.bf16 %v440_v12, %v440_v12 }
 0x230   : > { %v442_v14 = vpop.f32.mrf.mxu1 }
 0x234   : > { %904 = vmatmul.msk.bf16.vlgmr.msrb.gmra.mxu3 %vm371_vm0, %v444_v15 }
 0x244   : > { %908 = vmatmul.msk.bf16.vlgmr.msra.gmra.mxu3 %vm371_vm0, %v656_v58 }
 0x29c   : > { %v581_v22 = vpop.f32.mrf.mxu0 }
 0x29d   : > { %v585_v23 = vmul.f32 0.17677669, %v581_v22  ;;  %v730_v22 = vpack.c.bf16 %v728_v20, %v727_v19 }
 0x29f   : > { %v586_v24 = vadd.f32 %v585_v23, %v1124_v13  ;;  %v726_v23 = vld [vmem:[#allocation2 + $0x68] sm:$0xff] }
 0x2a1   : > { %v587_v25 = vsel %vm396_vm2, %v586_v24, -inf }
 0x2a2   : > { %588 = vmax.xlane.f32.xlu0 %v587_v25 }
 0x2a4   : > { %v583_v26 = vpop.f32.mrf.mxu0 }
 0x2a7   : > { %v519_v27 = vpop.f32.mrf.mxu3 }
 0x2a8   : > { %v523_v28 = vpack.c.bf16 %v519_v27, %v519_v27 }
 0x2aa   : > { %903 = vmatmul.msk.bf16.vlgmr.msrb.gmra.mxu1 %vm371_vm0, %v523_v28 }
 0x2af   : > { %v521_v29 = vpop.f32.mrf.mxu3 }
 0x2b6   : > { %612 = vrot.lane.b32.xlu0 %v1135_v31, %s1038_s26 }
 0x2b7   : > { %v1157_v30 = vpop.f32.mrf.mxu3 }
 0x2bf   : > { %v560_v32 = vpop.f32.mrf.mxu3 }
 0x2c7   : > { %v674_v33 = vpop.f32.mrf.mxu3 }
 0x2c8   : > { %v678_v34 = vmul.f32 0.17677669, %v674_v33 }
 0x2ca   : > { %v679_v35 = vadd.f32 %v678_v34, %v1124_v13 }
 0x2cc   : > { %v680_v36 = vsel %vm396_vm2, %v679_v35, -inf }
 0x2cd   : > { %681 = vmax.xlane.f32.xlu2 %v680_v36 }
 0x2cf   : > { %v676_v37 = vpop.f32.mrf.mxu3 }
 0x315   : > { %v589_v38 = vpop.xlane.xlu0 %588 }
 0x316   : > { %v590_v39 = vsub.f32 %v586_v24, %v589_v38  ;;  %v729_v24 = vpack.c.bf16 %v726_v23, %v725_v21  ;;  %v748_v38 = vld [vmem:[%s349_s30] sm:$0xff] }
 0x318   : > { %v591_v40 = vmul.f32 1.442695, %v590_v39 }
 0x31a   : > { %966 = vpow2.f32 %v591_v40  ;;  %v957_v40 = vld [vmem:[%s1196_s4] ss:$0 sm:$0xff] }
 0x320   : > { %v967_v41 = vpop.eup %966 }
 0x321   : > { %v593_v42 = vsel %vm396_vm2, %v967_v41, 0.0 }
 0x322   : > { %594 = vadd.xlane.f32.xlu1 %v593_v42 }
 0x327   : > { %v1162_v43 = vpop.f32.mrf.mxu1 }
 0x328   : > { %v613_v49 = vpop.permute.xlu0 %612 }
 0x329   : > { %625 = vmatpush.bf16.msrb.mxu2 %v613_v49 }
 0x32d   : > { %740 = vmatpush.bf16.msra.mxu2 %v730_v22 }
 0x32f   : > { %v544_v44 = vpop.f32.mrf.mxu1 }
 0x331   : > { %741 = vmatpush.bf16.msra.mxu2 %v729_v24 }
 0x33b   : > { %705 = vrot.lane.b32.xlu1 %v1135_v31, %s1037_s24 }
 0x340   : > { %v682_v45 = vpop.xlane.xlu2 %681 }
 0x341   : > { %v683_v13 = vsub.f32 %v679_v35, %v682_v45  ;;  %v559_v35 = vadd.f32 %v1157_v30, %v1162_v43 }
 0x343   : > { %v684_v46 = vmul.f32 1.442695, %v683_v13 }
 0x345   : > { %968 = vpow2.f32 %v684_v46 }
 0x34b   : > { %v969_v47 = vpop.eup %968 }
 0x34c   : > { %v686_v48 = vsel %vm396_vm2, %v969_v47, 0.0 }
 0x34d   : > { %687 = vadd.xlane.f32.xlu2 %v686_v48 }
 0x395   : > { %v595_v50 = vpop.xlane.xlu1 %594 }
 0x396   : > { %970 = vrcp.f32 %v595_v50  ;;  %v607_v54 = vand.u32 2147483648, %v595_v50  ;;  %v605_v56 = vand.u32 2147483647, %v595_v50  ;;  %vm601_vm12 = vweird.f32 %v595_v50 }
 0x398   : > { %v608_v57 = vor.u32 1.1754944e-38, %v607_v54  ;;  %vm606_vm14 = vcmp.eq.f32.partialorder %v605_v56, 8.507059e+37 }
 0x39c   : > { %v971_v51 = vpop.eup %970 }
 0x39d   : > { %v597_v52 = vmul.f32 %v971_v51, %v595_v50  ;;  %vm602_vm11 = vweird.f32 %v971_v51 }
 0x39e   : > { %vm603_vm13 = vmor %vm601_vm12, %vm602_vm11 }
 0x39f   : > { %v598_v53 = vsub.f32 1.0, %v597_v52 }
 0x3a1   : > { %v599_v55 = vmul.f32 %v971_v51, %v598_v53 }
 0x3a3   : > { %v600_v31 = vadd.f32 %v971_v51, %v599_v55 }
 0x3a5   : > { %v604_v58 = vsel %vm603_vm13, %v971_v51, %v600_v31 }
 0x3a6   : > { %v609_v59 = vsel %vm606_vm14, %v608_v57, %v604_v58 }
 0x3a7   : > { %v610_v60 = vmul.f32 %v967_v41, %v609_v59 }
 0x3a9   : > { %v611_v61 = vpack.c.bf16 %v610_v60, %v610_v60 }
 0x3ab   : > { %906 = vmatmul.msk.bf16.vlgmr.msrb.gmra.mxu2 %vm396_vm2, %v611_v61 }
 0x3ad   : > { %v706_v62 = vpop.permute.xlu1 %705 }
 0x3ae   : > { %718 = vmatpush.bf16.msra.mxu0 %v706_v62 }
 0x3c0   : > { %v688_v2 = vpop.xlane.xlu2 %687 }
 0x3c1   : > { %972 = vrcp.f32 %v688_v2  ;;  %v700_v6 = vand.u32 2147483648, %v688_v2  ;;  %v698_v8 = vand.u32 2147483647, %v688_v2  ;;  %vm694_vm1 = vweird.f32 %v688_v2 }
 0x3c3   : > { %v701_v10 = vor.u32 1.1754944e-38, %v700_v6  ;;  %vm699_vm4 = vcmp.eq.f32.partialorder %v698_v8, 8.507059e+37 }
 0x3c7   : > { %v973_v3 = vpop.eup %972 }
 0x3c8   : > { %v690_v4 = vmul.f32 %v973_v3, %v688_v2  ;;  %vm695_vm15 = vweird.f32 %v973_v3 }
 0x3c9   : > { %vm696_vm3 = vmor %vm694_vm1, %vm695_vm15 }
 0x3ca   : > { %v691_v5 = vsub.f32 1.0, %v690_v4 }
 0x3cc   : > { %v692_v7 = vmul.f32 %v973_v3, %v691_v5 }
 0x3ce   : > { %v693_v9 = vadd.f32 %v973_v3, %v692_v7 }
 0x3d0   : > { %v697_v11 = vsel %vm696_vm3, %v973_v3, %v693_v9 }
 0x3d1   : > { %v702_v12 = vsel %vm699_vm4, %v701_v10, %v697_v11 }
 0x3d2   : > { %v703_v14 = vmul.f32 %v969_v47, %v702_v12 }
 0x3d4   : > { %v704_v15 = vpack.c.bf16 %v703_v14, %v703_v14 }
 0x3d6   : > { %909 = vmatmul.msk.bf16.vlgmr.msra.gmra.mxu0 %vm396_vm2, %v704_v15 }
 0x42e   : > { %v627_v25 = vpop.f32.mrf.mxu2 }
 0x42f   : > { %v631_v26 = vpack.c.bf16 %v627_v25, %v627_v25 }
 0x431   : > { %907 = vmatmul.msk.bf16.vlgmr.msra.gmra.mxu1 %vm371_vm0, %v631_v26 }
 0x436   : > { %v629_v27 = vpop.f32.mrf.mxu2 }
 0x453   : > { %v720_v28 = vpop.f32.mrf.mxu0 }
 0x454   : > { %v724_v29 = vpack.c.bf16 %v720_v28, %v720_v28 }
 0x456   : > { %910 = vmatmul.msk.bf16.vlgmr.msra.gmra.mxu2 %vm371_vm0, %v724_v29 }
 0x45b   : > { %v722_v32 = vpop.f32.mrf.mxu0 }
 0x4ae   : > { %v650_v33 = vpop.f32.mrf.mxu1 }
 0x4af   : > { %v654_v36 = vadd.f32 %v650_v33, %v559_v35 }
 0x4b6   : > { %v652_v34 = vpop.f32.mrf.mxu1 }
 0x4d9   : > { %v743_v37 = vpop.f32.mrf.mxu2 }
 0x4da   : > { %v747_v39 = vadd.f32 %v743_v37, %v654_v36 }
 0x4dc   : > { %v749_v41 = vadd.f32 %v748_v38, %v747_v39 }
 0x4de   : > { %v754_v42 = vadd.f32 %v957_v40, %v749_v41 }
 0x4e0   : > { %755 = vst [vmem:[%s356_s21] sm:$0xff] %v754_v42 }
 0x4e1   : > { %v745_v30 = vpop.f32.mrf.mxu2 }
 0x4e2 PF: > { %s17_s23 = sadd.s32 1, %s1030_s23   ;;  %s1199_s21 = smov %s1026_s22 }
 0x4e3   : > { %p14_p8 = scmp.ge.s32.totalorder %s17_s23, 4   ;;  %s1200_s22 = smov %s1202_s25 }
 0x4e5   :  { %16 = sbr.rel (!%p14_p8) target bundleno = 2 (0x2), region = 88 }
 0x4ea   :  { %781 = vsyncpa [#allocation3], 1 }
 0x4eb   :  { %783 = vsyncpa [#allocation3 + $0x1], 1 }

</bundles_post_ra>
